<compile_context>
chip_gen: v7x
topology: tpu7x:2x2x1
jax: 0.10.0
libtpu: 0.0.40
codegen_flags: <defaults>
</compile_context>

<pallas_src>
import functools

import jax
import jax.numpy as jnp
from jax.experimental import pallas as pl
from jax.experimental.pallas import tpu as pltpu

BN_EPS = 1e-5
FUSE_MAX_ROWS = 256                 # rows <= this -> single fully-fused kernel per BN layer
VMEM_LIMIT = 32 * 1024 * 1024

_CPARAMS = pltpu.CompilerParams(
    dimension_semantics=("parallel",),
    vmem_limit_bytes=VMEM_LIMIT,
)

# (phase, window-position) -> ConvTranspose kernel tap, for k=4, s=2, p=1 subpixel decomp.
_SUBPIXEL_TAP = {(0, 0): 3, (0, 1): 1, (1, 1): 2, (1, 2): 0}


def _round_up(x, m):
    return ((x + m - 1) // m) * m


def _plan_rows(m):
    """Per-layer row tiling: (padded_rows, tile_rows, num_tiles)."""
    if m <= FUSE_MAX_ROWS:
        mp = _round_up(m, 8)
        return mp, mp, 1
    tile = 1024 if m >= 4096 else (512 if m >= 1024 else 256)
    mp = _round_up(m, tile)
    return mp, tile, mp // tile


# ----------------------------- Pallas kernels ------------------------------ #

def _fused_mm_bn_relu_kernel(p_ref, w_ref, g_ref, b_ref, o_ref, *,
                             n_groups, inv_count):
    """Single-tile layer: matmul + batch-stat BN + ReLU fully fused (no HBM y)."""
    y = jnp.dot(p_ref[...], w_ref[...], preferred_element_type=jnp.float32)
    ncols = y.shape[1]
    gp = ncols // n_groups
    ssum = jnp.sum(y, axis=0, keepdims=True)             # (1, ncols)
    ssq = jnp.sum(y * y, axis=0, keepdims=True)
    # Pool statistics across the phase groups (same BN channel appears in every group).
    ssum_c, ssq_c = ssum[:, :gp], ssq[:, :gp]
    for g in range(1, n_groups):
        ssum_c = ssum_c + ssum[:, g * gp:(g + 1) * gp]
        ssq_c = ssq_c + ssq[:, g * gp:(g + 1) * gp]
    mean = ssum_c * inv_count
    var = jnp.maximum(ssq_c * inv_count - mean * mean, 0.0)
    scale = g_ref[...] * jax.lax.rsqrt(var + BN_EPS)      # (1, gp)
    shift = b_ref[...] - mean * scale
    if n_groups > 1:
        scale = jnp.concatenate([scale] * n_groups, axis=1)
        shift = jnp.concatenate([shift] * n_groups, axis=1)
    o_ref[...] = jnp.maximum(y * scale + shift, 0.0).astype(o_ref.dtype)


def _matmul_stats_kernel(p_ref, w_ref, y_ref, s_ref):
    """y = patches @ W (bf16 MXU, f32 acc); y stored bf16 + f32 per-tile BN partials."""
    y = jnp.dot(p_ref[...], w_ref[...], preferred_element_type=jnp.float32)
    ssum = jnp.sum(y, axis=0, keepdims=True)
    ssq = jnp.sum(y * y, axis=0, keepdims=True)
    s_ref[...] = jnp.concatenate([ssum, ssq], axis=0)[None]   # (1, 2, ncols)
    y_ref[...] = y.astype(y_ref.dtype)


def _bn_relu_kernel(y_ref, scale_ref, shift_ref, o_ref):
    """BN affine (precomputed scale/shift) + ReLU; f32 math, bf16 load/store."""
    y = y_ref[...].astype(jnp.float32)
    o_ref[...] = jnp.maximum(y * scale_ref[...] + shift_ref[...], 0.0).astype(o_ref.dtype)


def _matmul_bias_tanh_kernel(p_ref, w_ref, b_ref, o_ref):
    y = jnp.dot(p_ref[...], w_ref[...], preferred_element_type=jnp.float32)
    o_ref[...] = jnp.tanh(y + b_ref[...]).astype(o_ref.dtype)


# --------------------------- pallas_call wrappers --------------------------- #

def _call_fused_mm_bn_relu(patches, wmat, gamma2d, beta2d, n_groups, inv_count):
    mp, kk = patches.shape
    ncols = wmat.shape[1]
    gp = ncols // n_groups
    kern = functools.partial(_fused_mm_bn_relu_kernel,
                             n_groups=n_groups, inv_count=inv_count)
    return pl.pallas_call(
        kern,
        out_shape=jax.ShapeDtypeStruct((mp, ncols), jnp.bfloat16),
        grid_spec=pltpu.PrefetchScalarGridSpec(
            num_scalar_prefetch=0, grid=(1,),
            in_specs=[pl.BlockSpec((mp, kk), lambda i: (0, 0)),
                      pl.BlockSpec((kk, ncols), lambda i: (0, 0)),
                      pl.BlockSpec((1, gp), lambda i: (0, 0)),
                      pl.BlockSpec((1, gp), lambda i: (0, 0))],
            out_specs=pl.BlockSpec((mp, ncols), lambda i: (0, 0))),
        compiler_params=_CPARAMS,
    )(patches, wmat, gamma2d, beta2d)


def _call_matmul_stats(patches, wmat, tile):
    mp, kk = patches.shape
    ncols = wmat.shape[1]
    nt = mp // tile
    return pl.pallas_call(
        _matmul_stats_kernel,
        out_shape=(jax.ShapeDtypeStruct((mp, ncols), jnp.bfloat16),
                   jax.ShapeDtypeStruct((nt, 2, ncols), jnp.float32)),
        grid_spec=pltpu.PrefetchScalarGridSpec(
            num_scalar_prefetch=0, grid=(nt,),
            in_specs=[pl.BlockSpec((tile, kk), lambda i: (i, 0)),
                      pl.BlockSpec((kk, ncols), lambda i: (0, 0))],
            out_specs=(pl.BlockSpec((tile, ncols), lambda i: (i, 0)),
                       pl.BlockSpec((1, 2, ncols), lambda i: (i, 0, 0)))),
        compiler_params=_CPARAMS,
    )(patches, wmat)


def _call_bn_relu(y, scale_row, shift_row, tile):
    mp, ncols = y.shape
    nt = mp // tile
    return pl.pallas_call(
        _bn_relu_kernel,
        out_shape=jax.ShapeDtypeStruct((mp, ncols), jnp.bfloat16),
        grid_spec=pltpu.PrefetchScalarGridSpec(
            num_scalar_prefetch=0, grid=(nt,),
            in_specs=[pl.BlockSpec((tile, ncols), lambda i: (i, 0)),
                      pl.BlockSpec((1, ncols), lambda i: (0, 0)),
                      pl.BlockSpec((1, ncols), lambda i: (0, 0))],
            out_specs=pl.BlockSpec((tile, ncols), lambda i: (i, 0))),
        compiler_params=_CPARAMS,
    )(y, scale_row, shift_row)


def _call_matmul_bias_tanh(patches, wmat, bias_row, tile):
    mp, kk = patches.shape
    ncols = wmat.shape[1]
    nt = mp // tile
    return pl.pallas_call(
        _matmul_bias_tanh_kernel,
        out_shape=jax.ShapeDtypeStruct((mp, ncols), jnp.bfloat16),
        grid_spec=pltpu.PrefetchScalarGridSpec(
            num_scalar_prefetch=0, grid=(nt,),
            in_specs=[pl.BlockSpec((tile, kk), lambda i: (i, 0)),
                      pl.BlockSpec((kk, ncols), lambda i: (0, 0)),
                      pl.BlockSpec((1, ncols), lambda i: (0, 0))],
            out_specs=pl.BlockSpec((tile, ncols), lambda i: (i, 0))),
        compiler_params=_CPARAMS,
    )(patches, wmat, bias_row)


# ------------------- transposed-conv glue (JAX, NHWC, bf16) ----------------- #

def _subpixel_patches(x_nhwc):
    """3x3 patches of the 1-padded input; feeds the subpixel (stride^2) matmul."""
    n, h, w, c = x_nhwc.shape
    xp = jnp.pad(x_nhwc, ((0, 0), (1, 1), (1, 1), (0, 0)))
    cols = [xp[:, s:s + h, t:t + w, :] for s in range(3) for t in range(3)]
    patches = jnp.stack(cols, axis=3)                   # (N, H, W, 9, C)
    return patches.reshape(n * h * w, 9 * c), (n, h, w)


def _s1_patches(x_nhwc, k, pad):
    """Stride-1 ConvTranspose == pad by (k-1-pad) + correlate with flipped kernel."""
    n, h, w, c = x_nhwc.shape
    e = k - 1 - pad
    xp = jnp.pad(x_nhwc, ((0, 0), (e, e), (e, e), (0, 0)))
    ho, wo = h + 2 * e - k + 1, w + 2 * e - k + 1
    cols = [xp[:, a:a + ho, b:b + wo, :] for a in range(k) for b in range(k)]
    patches = jnp.stack(cols, axis=3)                   # (N, Ho, Wo, k*k, C)
    return patches.reshape(n * ho * wo, k * k * c), (n, ho, wo)


def _assemble_subpixel(y2d, n, h, w, gp, cout):
    """(N*H*W, 4*gp) phase-grouped columns -> (N, 2H, 2W, cout)."""
    y = y2d.reshape(n, h, w, 2, 2, gp)                  # (..., r, c, channel)
    y = y.transpose(0, 1, 3, 2, 4, 5).reshape(n, 2 * h, 2 * w, gp)
    return y[..., :cout]


def _pad_rows(patches, mp):
    m = patches.shape[0]
    if mp > m:
        patches = jnp.pad(patches, ((0, mp - m), (0, 0)))
    return patches


def _matmul_bn_relu(patches, wmat, gamma, beta, n_groups):
    """patches (M,K) bf16 @ wmat (K,G*gp) bf16 -> BN(batch stats) + ReLU, bf16 (M,G*gp)."""
    m = patches.shape[0]
    ncols = wmat.shape[1]
    gp = ncols // n_groups
    mp, tile, nt = _plan_rows(m)
    patches = _pad_rows(patches, mp)                    # zero rows: 0 contribution to sums
    inv_count = 1.0 / float(m * n_groups)               # divisor = true output-pixel count
    if nt == 1:
        y = _call_fused_mm_bn_relu(patches, wmat, gamma.reshape(1, gp),
                                   beta.reshape(1, gp), n_groups, inv_count)
    else:
        y16, stats = _call_matmul_stats(patches, wmat, tile)
        s = jnp.sum(stats, axis=0).reshape(2, n_groups, gp).sum(axis=1)   # (2, gp)
        mean = s[0] * inv_count
        var = jnp.maximum(s[1] * inv_count - mean * mean, 0.0)
        scale = gamma * jax.lax.rsqrt(var + BN_EPS)
        shift = beta - mean * scale
        y = _call_bn_relu(y16,
                          jnp.tile(scale, n_groups).reshape(1, ncols),
                          jnp.tile(shift, n_groups).reshape(1, ncols), tile)
    return y[:m]


def convt_bn_relu_s1(x_nhwc, wmat, gamma, beta, cout, k, pad):
    patches, (n, ho, wo) = _s1_patches(x_nhwc.astype(jnp.bfloat16), k, pad)
    y = _matmul_bn_relu(patches, wmat, gamma, beta, n_groups=1)
    return y.reshape(n, ho, wo, wmat.shape[1])[..., :cout]


def convt_bn_relu_s2(x_nhwc, wmat, gamma, beta, cout):
    patches, (n, h, w) = _subpixel_patches(x_nhwc.astype(jnp.bfloat16))
    y = _matmul_bn_relu(patches, wmat, gamma, beta, n_groups=4)
    return _assemble_subpixel(y, n, h, w, wmat.shape[1] // 4, cout)


def convt_bias_tanh_s2(x_nhwc, wmat, bias_row, cout):
    patches, (n, h, w) = _subpixel_patches(x_nhwc.astype(jnp.bfloat16))
    m = patches.shape[0]
    mp, tile, _ = _plan_rows(m)
    patches = _pad_rows(patches, mp)
    y = _call_matmul_bias_tanh(patches, wmat, bias_row, tile)[:m]
    return _assemble_subpixel(y, n, h, w, wmat.shape[1] // 4, cout)


# -------------------------- weight pre-processing --------------------------- #

def _weight_to_mat_s1(w, gp):
    # w: (Cin, Cout, k, k) PyTorch ConvTranspose2d layout, stride 1.
    cin, cout, k, _ = w.shape
    wf = w[:, :, ::-1, ::-1]                                     # spatial flip
    wm = wf.transpose(2, 3, 0, 1).reshape(k * k * cin, cout)     # rows: (a, b, cin)
    return jnp.pad(wm, ((0, 0), (0, gp - cout)))                 # zero-padded cols (BN-safe)


def _weight_to_subpixel_mat(w, gp):
    # w: (Cin, Cout, 4, 4) PyTorch ConvTranspose2d layout; stride=2, padding=1 assumed.
    cin, cout, k, _ = w.shape
    assert k == 4
    wm = jnp.zeros((3, 3, cin, 2, 2, gp), jnp.float32)           # (s, t, cin, r, c, co)
    for (r, s), kh in _SUBPIXEL_TAP.items():
        for (c, t), kw in _SUBPIXEL_TAP.items():
            wm = wm.at[s, t, :, r, c, :cout].set(w[:, :, kh, kw])
    return wm.reshape(9 * cin, 4 * gp)


# ----------------------------- Generator model ------------------------------ #

def build_generator(latent_dim, num_channels, features_g, num_classes,
                    image_size, embed_size):
    fg = features_g
    first_cfg = (latent_dim + embed_size, fg * 16, 4, 1, 0)            # k=4, s=1, p=0
    s2_cfgs = [(fg * 16, fg * 8), (fg * 8, fg * 4), (fg * 4, fg * 2)]  # k=4, s=2, p=1
    final_cfg = (fg * 2, num_channels)                                 # k=4, s=2, p=1

    def init(key):
        keys = jax.random.split(key, len(s2_cfgs) + 3)
        cin, cout, k, s, p = first_cfg
        gp0 = _round_up(cout, 128)
        w0 = 0.02 * jax.random.normal(keys[0], (cin, cout, k, k), jnp.float32)
        blocks = [{
            "wmat": _weight_to_mat_s1(w0, gp0).astype(jnp.bfloat16),
            "gamma": jnp.pad(jnp.ones((cout,), jnp.float32), (0, gp0 - cout)),
            "beta": jnp.zeros((gp0,), jnp.float32),
        }]
        for i, (cin, cout) in enumerate(s2_cfgs):
            gp = _round_up(cout, 32)        # 4 phase groups -> total cols multiple of 128
            w = 0.02 * jax.random.normal(keys[i + 1], (cin, cout, 4, 4), jnp.float32)
            blocks.append({
                "wmat": _weight_to_subpixel_mat(w, gp).astype(jnp.bfloat16),
                "gamma": jnp.pad(jnp.ones((cout,), jnp.float32), (0, gp - cout)),
                "beta": jnp.zeros((gp,), jnp.float32),
            })
        cin, cout = final_cfg
        gp = _round_up(cout, 32)
        wf = 0.02 * jax.random.normal(keys[-2], (cin, cout, 4, 4), jnp.float32)
        return {
            "blocks": blocks,
            "final_wmat": _weight_to_subpixel_mat(wf, gp).astype(jnp.bfloat16),
            "final_b": jnp.zeros((gp,), jnp.float32),
            "embed": jax.random.normal(keys[-1], (num_classes, embed_size), jnp.float32),
        }

    @jax.jit
    def forward(params, x, labels):
        # x: (N, latent_dim, 1, 1) NCHW; labels: (N,) int32
        emb = params["embed"][labels]                          # (N, embed_size)
        h = jnp.concatenate([x[:, :, 0, 0], emb], axis=1)      # channel concat (1x1 spatial)
        h = h[:, None, None, :]                                # NHWC (N, 1, 1, C)
        _, cout, k, _, p = first_cfg
        b0 = params["blocks"][0]
        h = convt_bn_relu_s1(h, b0["wmat"], b0["gamma"], b0["beta"], cout, k, p)
        for blk, (_, cout) in zip(params["blocks"][1:], s2_cfgs):
            h = convt_bn_relu_s2(h, blk["wmat"], blk["gamma"], blk["beta"], cout)
        bias_row = jnp.tile(params["final_b"], 4).reshape(1, -1)
        out = convt_bias_tanh_s2(h, params["final_wmat"], bias_row, final_cfg[1])
        return out.astype(jnp.float32).transpose(0, 3, 1, 2)   # NCHW at the boundary

    return init, forward


# --------------------------------- main -------------------------------------- #

if __name__ == "__main__":
    latent_dim, num_channels, features_g = 16, 3, 8
    num_classes, image_size, embed_size = 10, 64, 8
    batch = 2

    key = jax.random.PRNGKey(0)
    kp, kx = jax.random.split(key)

    init_fn, forward_fn = build_generator(latent_dim, num_channels, features_g,
                                          num_classes, image_size, embed_size)
    params = init_fn(kp)
    x = jax.random.normal(kx, (batch, latent_dim, 1, 1), jnp.float32)
    labels = jnp.array([3, 7], dtype=jnp.int32)

    out = jax.block_until_ready(forward_fn(params, x, labels))

    assert out.shape == (batch, num_channels, image_size, image_size), out.shape
    assert bool(jnp.all(jnp.isfinite(out)))
    assert bool(jnp.all(jnp.abs(out) <= 1.0 + 1e-6))   # tanh range
    print("KERNEL_OK")
</pallas_src>

<mosaic_0001>
module attributes {stable_mosaic.version = 11 : i64} {
  func.func @_fused_mm_bn_relu_kernel(%arg0: i32, %arg1: memref<32x384xbf16, #tpu.memory_space<vmem>>, %arg2: memref<384x128xbf16, #tpu.memory_space<vmem>>, %arg3: memref<1x128xf32, #tpu.memory_space<vmem>>, %arg4: memref<1x128xf32, #tpu.memory_space<vmem>>, %arg5: memref<32x128xbf16, #tpu.memory_space<vmem>>) attributes {dimension_semantics = [#tpu.dimension_semantics<parallel>], iteration_bounds = array<i64: 1>, scalar_prefetch = 0 : i64, scratch_operands = 0 : i64, tpu.core_type = #tpu.core_type<tc>, window_params = [{pipeline_mode = #tpu.pipeline_mode<synchronous>, transform_indices = @transform_0, window_bounds = array<i64: 32, 384>}, {pipeline_mode = #tpu.pipeline_mode<synchronous>, transform_indices = @transform_1, window_bounds = array<i64: 384, 128>}, {pipeline_mode = #tpu.pipeline_mode<synchronous>, transform_indices = @transform_2, window_bounds = array<i64: 1, 128>}, {pipeline_mode = #tpu.pipeline_mode<synchronous>, transform_indices = @transform_3, window_bounds = array<i64: 1, 128>}, {pipeline_mode = #tpu.pipeline_mode<synchronous>, transform_indices = @transform_4, window_bounds = array<i64: 32, 128>}]} {
    %c0 = arith.constant 0 : index
    %c0_0 = arith.constant 0 : index
    %0 = vector.load %arg1[%c0, %c0_0] : memref<32x384xbf16, #tpu.memory_space<vmem>>, vector<32x384xbf16>
    %c0_1 = arith.constant 0 : index
    %c0_2 = arith.constant 0 : index
    %1 = vector.load %arg2[%c0_1, %c0_2] : memref<384x128xbf16, #tpu.memory_space<vmem>>, vector<384x128xbf16>
    %cst = arith.constant dense<0.000000e+00> : vector<32x128xf32>
    %2 = tpu.matmul %0, %1, %cst {dimension_numbers = #tpu.dot_dimension_numbers<[1], [0], [0], [1], [0, 0, 1, 1], [], []>} : vector<32x384xbf16>, vector<384x128xbf16>, vector<32x128xf32> -> vector<32x128xf32>
    %cst_3 = arith.constant dense<0.000000e+00> : vector<128xf32>
    %3 = vector.multi_reduction <add>, %2, %cst_3 [0] : vector<32x128xf32> to vector<128xf32>
    %4 = vector.shape_cast %3 : vector<128xf32> to vector<1x128xf32>
    %5 = arith.mulf %2, %2 : vector<32x128xf32>
    %cst_4 = arith.constant dense<0.000000e+00> : vector<128xf32>
    %6 = vector.multi_reduction <add>, %5, %cst_4 [0] : vector<32x128xf32> to vector<128xf32>
    %7 = vector.shape_cast %6 : vector<128xf32> to vector<1x128xf32>
    %cst_5 = arith.constant 3.125000e-02 : f32
    %8 = vector.broadcast %cst_5 : f32 to vector<1x128xf32>
    %9 = arith.mulf %4, %8 : vector<1x128xf32>
    %cst_6 = arith.constant 3.125000e-02 : f32
    %10 = vector.broadcast %cst_6 : f32 to vector<1x128xf32>
    %11 = arith.mulf %7, %10 : vector<1x128xf32>
    %12 = arith.mulf %9, %9 : vector<1x128xf32>
    %13 = arith.subf %11, %12 : vector<1x128xf32>
    %cst_7 = arith.constant 0.000000e+00 : f32
    %14 = vector.broadcast %cst_7 : f32 to vector<1x128xf32>
    %15 = arith.maximumf %13, %14 : vector<1x128xf32>
    %c0_8 = arith.constant 0 : index
    %c0_9 = arith.constant 0 : index
    %16 = vector.load %arg3[%c0_8, %c0_9] : memref<1x128xf32, #tpu.memory_space<vmem>>, vector<1x128xf32>
    %cst_10 = arith.constant 9.99999974E-6 : f32
    %17 = vector.broadcast %cst_10 : f32 to vector<1x128xf32>
    %18 = arith.addf %15, %17 : vector<1x128xf32>
    %19 = math.rsqrt %18 : vector<1x128xf32>
    %20 = arith.mulf %16, %19 : vector<1x128xf32>
    %c0_11 = arith.constant 0 : index
    %c0_12 = arith.constant 0 : index
    %21 = vector.load %arg4[%c0_11, %c0_12] : memref<1x128xf32, #tpu.memory_space<vmem>>, vector<1x128xf32>
    %22 = arith.mulf %9, %20 : vector<1x128xf32>
    %23 = arith.subf %21, %22 : vector<1x128xf32>
    %24 = vector.broadcast %20 : vector<1x128xf32> to vector<32x128xf32>
    %25 = arith.mulf %2, %24 : vector<32x128xf32>
    %26 = vector.broadcast %23 : vector<1x128xf32> to vector<32x128xf32>
    %27 = arith.addf %25, %26 : vector<32x128xf32>
    %cst_13 = arith.constant 0.000000e+00 : f32
    %28 = vector.broadcast %cst_13 : f32 to vector<32x128xf32>
    %29 = arith.maximumf %27, %28 : vector<32x128xf32>
    %30 = arith.truncf %29 : vector<32x128xf32> to vector<32x128xbf16>
    %c0_14 = arith.constant 0 : index
    %c0_15 = arith.constant 0 : index
    %31 = vector.load %arg5[%c0_14, %c0_15] : memref<32x128xbf16, #tpu.memory_space<vmem>>, vector<32x128xbf16>
    tpu.vector_store %arg5[%c0_14, %c0_15], %30 {strides = array<i32>} : memref<32x128xbf16, #tpu.memory_space<vmem>>, vector<32x128xbf16>,
    return
  }
  func.func @transform_0(%arg0: i32) -> (i32, i32) {
    %c0_i32 = arith.constant 0 : i32
    %c0_i32_0 = arith.constant 0 : i32
    %c0_i32_1 = arith.constant 0 : i32
    return %c0_i32, %c0_i32_0 : i32, i32
  }
  func.func @transform_1(%arg0: i32) -> (i32, i32) {
    %c0_i32 = arith.constant 0 : i32
    %c0_i32_0 = arith.constant 0 : i32
    %c0_i32_1 = arith.constant 0 : i32
    return %c0_i32, %c0_i32_0 : i32, i32
  }
  func.func @transform_2(%arg0: i32) -> (i32, i32) {
    %c0_i32 = arith.constant 0 : i32
    %c0_i32_0 = arith.constant 0 : i32
    %c0_i32_1 = arith.constant 0 : i32
    return %c0_i32, %c0_i32_0 : i32, i32
  }
  func.func @transform_3(%arg0: i32) -> (i32, i32) {
    %c0_i32 = arith.constant 0 : i32
    %c0_i32_0 = arith.constant 0 : i32
    %c0_i32_1 = arith.constant 0 : i32
    return %c0_i32, %c0_i32_0 : i32, i32
  }
  func.func @transform_4(%arg0: i32) -> (i32, i32) {
    %c0_i32 = arith.constant 0 : i32
    %c0_i32_0 = arith.constant 0 : i32
    %c0_i32_1 = arith.constant 0 : i32
    return %c0_i32, %c0_i32_0 : i32, i32
  }
}

module attributes {stable_mosaic.version = 11 : i64} {
  func.func @_fused_mm_bn_relu_kernel(%arg0: i32, %arg1: memref<32x1152xbf16, #tpu.memory_space<vmem>>, %arg2: memref<1152x256xbf16, #tpu.memory_space<vmem>>, %arg3: memref<1x64xf32, #tpu.memory_space<vmem>>, %arg4: memref<1x64xf32, #tpu.memory_space<vmem>>, %arg5: memref<32x256xbf16, #tpu.memory_space<vmem>>) attributes {dimension_semantics = [#tpu.dimension_semantics<parallel>], iteration_bounds = array<i64: 1>, scalar_prefetch = 0 : i64, scratch_operands = 0 : i64, tpu.core_type = #tpu.core_type<tc>, window_params = [{pipeline_mode = #tpu.pipeline_mode<synchronous>, transform_indices = @transform_0, window_bounds = array<i64: 32, 1152>}, {pipeline_mode = #tpu.pipeline_mode<synchronous>, transform_indices = @transform_1, window_bounds = array<i64: 1152, 256>}, {pipeline_mode = #tpu.pipeline_mode<synchronous>, transform_indices = @transform_2, window_bounds = array<i64: 1, 64>}, {pipeline_mode = #tpu.pipeline_mode<synchronous>, transform_indices = @transform_3, window_bounds = array<i64: 1, 64>}, {pipeline_mode = #tpu.pipeline_mode<synchronous>, transform_indices = @transform_4, window_bounds = array<i64: 32, 256>}]} {
    %c0 = arith.constant 0 : index
    %c0_0 = arith.constant 0 : index
    %0 = vector.load %arg1[%c0, %c0_0] : memref<32x1152xbf16, #tpu.memory_space<vmem>>, vector<32x1152xbf16>
    %c0_1 = arith.constant 0 : index
    %c0_2 = arith.constant 0 : index
    %1 = vector.load %arg2[%c0_1, %c0_2] : memref<1152x256xbf16, #tpu.memory_space<vmem>>, vector<1152x256xbf16>
    %cst = arith.constant dense<0.000000e+00> : vector<32x256xf32>
    %2 = tpu.matmul %0, %1, %cst {dimension_numbers = #tpu.dot_dimension_numbers<[1], [0], [0], [1], [0, 0, 1, 1], [], []>} : vector<32x1152xbf16>, vector<1152x256xbf16>, vector<32x256xf32> -> vector<32x256xf32>
    %cst_3 = arith.constant dense<0.000000e+00> : vector<256xf32>
    %3 = vector.multi_reduction <add>, %2, %cst_3 [0] : vector<32x256xf32> to vector<256xf32>
    %4 = vector.shape_cast %3 : vector<256xf32> to vector<1x256xf32>
    %5 = arith.mulf %2, %2 : vector<32x256xf32>
    %cst_4 = arith.constant dense<0.000000e+00> : vector<256xf32>
    %6 = vector.multi_reduction <add>, %5, %cst_4 [0] : vector<32x256xf32> to vector<256xf32>
    %7 = vector.shape_cast %6 : vector<256xf32> to vector<1x256xf32>
    %8 = vector.extract_strided_slice %4 {offsets = [0, 0], sizes = [1, 64], strides = [1, 1]} : vector<1x256xf32> to vector<1x64xf32>
    %9 = vector.extract_strided_slice %7 {offsets = [0, 0], sizes = [1, 64], strides = [1, 1]} : vector<1x256xf32> to vector<1x64xf32>
    %10 = vector.extract_strided_slice %4 {offsets = [0, 64], sizes = [1, 64], strides = [1, 1]} : vector<1x256xf32> to vector<1x64xf32>
    %11 = arith.addf %8, %10 : vector<1x64xf32>
    %12 = vector.extract_strided_slice %7 {offsets = [0, 64], sizes = [1, 64], strides = [1, 1]} : vector<1x256xf32> to vector<1x64xf32>
    %13 = arith.addf %9, %12 : vector<1x64xf32>
    %14 = vector.extract_strided_slice %4 {offsets = [0, 128], sizes = [1, 64], strides = [1, 1]} : vector<1x256xf32> to vector<1x64xf32>
    %15 = arith.addf %11, %14 : vector<1x64xf32>
    %16 = vector.extract_strided_slice %7 {offsets = [0, 128], sizes = [1, 64], strides = [1, 1]} : vector<1x256xf32> to vector<1x64xf32>
    %17 = arith.addf %13, %16 : vector<1x64xf32>
    %18 = vector.extract_strided_slice %4 {offsets = [0, 192], sizes = [1, 64], strides = [1, 1]} : vector<1x256xf32> to vector<1x64xf32>
    %19 = arith.addf %15, %18 : vector<1x64xf32>
    %20 = vector.extract_strided_slice %7 {offsets = [0, 192], sizes = [1, 64], strides = [1, 1]} : vector<1x256xf32> to vector<1x64xf32>
    %21 = arith.addf %17, %20 : vector<1x64xf32>
    %cst_5 = arith.constant 7.812500e-03 : f32
    %22 = vector.broadcast %cst_5 : f32 to vector<1x64xf32>
    %23 = arith.mulf %19, %22 : vector<1x64xf32>
    %cst_6 = arith.constant 7.812500e-03 : f32
    %24 = vector.broadcast %cst_6 : f32 to vector<1x64xf32>
    %25 = arith.mulf %21, %24 : vector<1x64xf32>
    %26 = arith.mulf %23, %23 : vector<1x64xf32>
    %27 = arith.subf %25, %26 : vector<1x64xf32>
    %cst_7 = arith.constant 0.000000e+00 : f32
    %28 = vector.broadcast %cst_7 : f32 to vector<1x64xf32>
    %29 = arith.maximumf %27, %28 : vector<1x64xf32>
    %c0_8 = arith.constant 0 : index
    %c0_9 = arith.constant 0 : index
    %30 = vector.load %arg3[%c0_8, %c0_9] : memref<1x64xf32, #tpu.memory_space<vmem>>, vector<1x64xf32>
    %cst_10 = arith.constant 9.99999974E-6 : f32
    %31 = vector.broadcast %cst_10 : f32 to vector<1x64xf32>
    %32 = arith.addf %29, %31 : vector<1x64xf32>
    %33 = math.rsqrt %32 : vector<1x64xf32>
    %34 = arith.mulf %30, %33 : vector<1x64xf32>
    %c0_11 = arith.constant 0 : index
    %c0_12 = arith.constant 0 : index
    %35 = vector.load %arg4[%c0_11, %c0_12] : memref<1x64xf32, #tpu.memory_space<vmem>>, vector<1x64xf32>
    %36 = arith.mulf %23, %34 : vector<1x64xf32>
    %37 = arith.subf %35, %36 : vector<1x64xf32>
    %38 = tpu.concatenate %34, %34, %34, %34 in 1 : vector<1x64xf32>, vector<1x64xf32>, vector<1x64xf32>, vector<1x64xf32> -> vector<1x256xf32>
    %39 = tpu.concatenate %37, %37, %37, %37 in 1 : vector<1x64xf32>, vector<1x64xf32>, vector<1x64xf32>, vector<1x64xf32> -> vector<1x256xf32>
    %40 = vector.broadcast %38 : vector<1x256xf32> to vector<32x256xf32>
    %41 = arith.mulf %2, %40 : vector<32x256xf32>
    %42 = vector.broadcast %39 : vector<1x256xf32> to vector<32x256xf32>
    %43 = arith.addf %41, %42 : vector<32x256xf32>
    %cst_13 = arith.constant 0.000000e+00 : f32
    %44 = vector.broadcast %cst_13 : f32 to vector<32x256xf32>
    %45 = arith.maximumf %43, %44 : vector<32x256xf32>
    %46 = arith.truncf %45 : vector<32x256xf32> to vector<32x256xbf16>
    %c0_14 = arith.constant 0 : index
    %c0_15 = arith.constant 0 : index
    %47 = vector.load %arg5[%c0_14, %c0_15] : memref<32x256xbf16, #tpu.memory_space<vmem>>, vector<32x256xbf16>
    tpu.vector_store %arg5[%c0_14, %c0_15], %46 {strides = array<i32>} : memref<32x256xbf16, #tpu.memory_space<vmem>>, vector<32x256xbf16>,
    return
  }
  func.func @transform_0(%arg0: i32) -> (i32, i32) {
    %c0_i32 = arith.constant 0 : i32
    %c0_i32_0 = arith.constant 0 : i32
    %c0_i32_1 = arith.constant 0 : i32
    return %c0_i32, %c0_i32_0 : i32, i32
  }
  func.func @transform_1(%arg0: i32) -> (i32, i32) {
    %c0_i32 = arith.constant 0 : i32
    %c0_i32_0 = arith.constant 0 : i32
    %c0_i32_1 = arith.constant 0 : i32
    return %c0_i32, %c0_i32_0 : i32, i32
  }
  func.func @transform_2(%arg0: i32) -> (i32, i32) {
    %c0_i32 = arith.constant 0 : i32
    %c0_i32_0 = arith.constant 0 : i32
    %c0_i32_1 = arith.constant 0 : i32
    return %c0_i32, %c0_i32_0 : i32, i32
  }
  func.func @transform_3(%arg0: i32) -> (i32, i32) {
    %c0_i32 = arith.constant 0 : i32
    %c0_i32_0 = arith.constant 0 : i32
    %c0_i32_1 = arith.constant 0 : i32
    return %c0_i32, %c0_i32_0 : i32, i32
  }
  func.func @transform_4(%arg0: i32) -> (i32, i32) {
    %c0_i32 = arith.constant 0 : i32
    %c0_i32_0 = arith.constant 0 : i32
    %c0_i32_1 = arith.constant 0 : i32
    return %c0_i32, %c0_i32_0 : i32, i32
  }
}

module attributes {stable_mosaic.version = 11 : i64} {
  func.func @_fused_mm_bn_relu_kernel(%arg0: i32, %arg1: memref<128x576xbf16, #tpu.memory_space<vmem>>, %arg2: memref<576x128xbf16, #tpu.memory_space<vmem>>, %arg3: memref<1x32xf32, #tpu.memory_space<vmem>>, %arg4: memref<1x32xf32, #tpu.memory_space<vmem>>, %arg5: memref<128x128xbf16, #tpu.memory_space<vmem>>) attributes {dimension_semantics = [#tpu.dimension_semantics<parallel>], iteration_bounds = array<i64: 1>, scalar_prefetch = 0 : i64, scratch_operands = 0 : i64, tpu.core_type = #tpu.core_type<tc>, window_params = [{pipeline_mode = #tpu.pipeline_mode<synchronous>, transform_indices = @transform_0, window_bounds = array<i64: 128, 576>}, {pipeline_mode = #tpu.pipeline_mode<synchronous>, transform_indices = @transform_1, window_bounds = array<i64: 576, 128>}, {pipeline_mode = #tpu.pipeline_mode<synchronous>, transform_indices = @transform_2, window_bounds = array<i64: 1, 32>}, {pipeline_mode = #tpu.pipeline_mode<synchronous>, transform_indices = @transform_3, window_bounds = array<i64: 1, 32>}, {pipeline_mode = #tpu.pipeline_mode<synchronous>, transform_indices = @transform_4, window_bounds = array<i64: 128, 128>}]} {
    %c0 = arith.constant 0 : index
    %c0_0 = arith.constant 0 : index
    %0 = vector.load %arg1[%c0, %c0_0] : memref<128x576xbf16, #tpu.memory_space<vmem>>, vector<128x576xbf16>
    %c0_1 = arith.constant 0 : index
    %c0_2 = arith.constant 0 : index
    %1 = vector.load %arg2[%c0_1, %c0_2] : memref<576x128xbf16, #tpu.memory_space<vmem>>, vector<576x128xbf16>
    %cst = arith.constant dense<0.000000e+00> : vector<128x128xf32>
    %2 = tpu.matmul %0, %1, %cst {dimension_numbers = #tpu.dot_dimension_numbers<[1], [0], [0], [1], [0, 0, 1, 1], [], []>} : vector<128x576xbf16>, vector<576x128xbf16>, vector<128x128xf32> -> vector<128x128xf32>
    %cst_3 = arith.constant dense<0.000000e+00> : vector<128xf32>
    %3 = vector.multi_reduction <add>, %2, %cst_3 [0] : vector<128x128xf32> to vector<128xf32>
    %4 = vector.shape_cast %3 : vector<128xf32> to vector<1x128xf32>
    %5 = arith.mulf %2, %2 : vector<128x128xf32>
    %cst_4 = arith.constant dense<0.000000e+00> : vector<128xf32>
    %6 = vector.multi_reduction <add>, %5, %cst_4 [0] : vector<128x128xf32> to vector<128xf32>
    %7 = vector.shape_cast %6 : vector<128xf32> to vector<1x128xf32>
    %8 = vector.extract_strided_slice %4 {offsets = [0, 0], sizes = [1, 32], strides = [1, 1]} : vector<1x128xf32> to vector<1x32xf32>
    %9 = vector.extract_strided_slice %7 {offsets = [0, 0], sizes = [1, 32], strides = [1, 1]} : vector<1x128xf32> to vector<1x32xf32>
    %10 = vector.extract_strided_slice %4 {offsets = [0, 32], sizes = [1, 32], strides = [1, 1]} : vector<1x128xf32> to vector<1x32xf32>
    %11 = arith.addf %8, %10 : vector<1x32xf32>
    %12 = vector.extract_strided_slice %7 {offsets = [0, 32], sizes = [1, 32], strides = [1, 1]} : vector<1x128xf32> to vector<1x32xf32>
    %13 = arith.addf %9, %12 : vector<1x32xf32>
    %14 = vector.extract_strided_slice %4 {offsets = [0, 64], sizes = [1, 32], strides = [1, 1]} : vector<1x128xf32> to vector<1x32xf32>
    %15 = arith.addf %11, %14 : vector<1x32xf32>
    %16 = vector.extract_strided_slice %7 {offsets = [0, 64], sizes = [1, 32], strides = [1, 1]} : vector<1x128xf32> to vector<1x32xf32>
    %17 = arith.addf %13, %16 : vector<1x32xf32>
    %18 = vector.extract_strided_slice %4 {offsets = [0, 96], sizes = [1, 32], strides = [1, 1]} : vector<1x128xf32> to vector<1x32xf32>
    %19 = arith.addf %15, %18 : vector<1x32xf32>
    %20 = vector.extract_strided_slice %7 {offsets = [0, 96], sizes = [1, 32], strides = [1, 1]} : vector<1x128xf32> to vector<1x32xf32>
    %21 = arith.addf %17, %20 : vector<1x32xf32>
    %cst_5 = arith.constant 0.001953125 : f32
    %22 = vector.broadcast %cst_5 : f32 to vector<1x32xf32>
    %23 = arith.mulf %19, %22 : vector<1x32xf32>
    %cst_6 = arith.constant 0.001953125 : f32
    %24 = vector.broadcast %cst_6 : f32 to vector<1x32xf32>
    %25 = arith.mulf %21, %24 : vector<1x32xf32>
    %26 = arith.mulf %23, %23 : vector<1x32xf32>
    %27 = arith.subf %25, %26 : vector<1x32xf32>
    %cst_7 = arith.constant 0.000000e+00 : f32
    %28 = vector.broadcast %cst_7 : f32 to vector<1x32xf32>
    %29 = arith.maximumf %27, %28 : vector<1x32xf32>
    %c0_8 = arith.constant 0 : index
    %c0_9 = arith.constant 0 : index
    %30 = vector.load %arg3[%c0_8, %c0_9] : memref<1x32xf32, #tpu.memory_space<vmem>>, vector<1x32xf32>
    %cst_10 = arith.constant 9.99999974E-6 : f32
    %31 = vector.broadcast %cst_10 : f32 to vector<1x32xf32>
    %32 = arith.addf %29, %31 : vector<1x32xf32>
    %33 = math.rsqrt %32 : vector<1x32xf32>
    %34 = arith.mulf %30, %33 : vector<1x32xf32>
    %c0_11 = arith.constant 0 : index
    %c0_12 = arith.constant 0 : index
    %35 = vector.load %arg4[%c0_11, %c0_12] : memref<1x32xf32, #tpu.memory_space<vmem>>, vector<1x32xf32>
    %36 = arith.mulf %23, %34 : vector<1x32xf32>
    %37 = arith.subf %35, %36 : vector<1x32xf32>
    %38 = tpu.concatenate %34, %34, %34, %34 in 1 : vector<1x32xf32>, vector<1x32xf32>, vector<1x32xf32>, vector<1x32xf32> -> vector<1x128xf32>
    %39 = tpu.concatenate %37, %37, %37, %37 in 1 : vector<1x32xf32>, vector<1x32xf32>, vector<1x32xf32>, vector<1x32xf32> -> vector<1x128xf32>
    %40 = vector.broadcast %38 : vector<1x128xf32> to vector<128x128xf32>
    %41 = arith.mulf %2, %40 : vector<128x128xf32>
    %42 = vector.broadcast %39 : vector<1x128xf32> to vector<128x128xf32>
    %43 = arith.addf %41, %42 : vector<128x128xf32>
    %cst_13 = arith.constant 0.000000e+00 : f32
    %44 = vector.broadcast %cst_13 : f32 to vector<128x128xf32>
    %45 = arith.maximumf %43, %44 : vector<128x128xf32>
    %46 = arith.truncf %45 : vector<128x128xf32> to vector<128x128xbf16>
    %c0_14 = arith.constant 0 : index
    %c0_15 = arith.constant 0 : index
    %47 = vector.load %arg5[%c0_14, %c0_15] : memref<128x128xbf16, #tpu.memory_space<vmem>>, vector<128x128xbf16>
    tpu.vector_store %arg5[%c0_14, %c0_15], %46 {strides = array<i32>} : memref<128x128xbf16, #tpu.memory_space<vmem>>, vector<128x128xbf16>,
    return
  }
  func.func @transform_0(%arg0: i32) -> (i32, i32) {
    %c0_i32 = arith.constant 0 : i32
    %c0_i32_0 = arith.constant 0 : i32
    %c0_i32_1 = arith.constant 0 : i32
    return %c0_i32, %c0_i32_0 : i32, i32
  }
  func.func @transform_1(%arg0: i32) -> (i32, i32) {
    %c0_i32 = arith.constant 0 : i32
    %c0_i32_0 = arith.constant 0 : i32
    %c0_i32_1 = arith.constant 0 : i32
    return %c0_i32, %c0_i32_0 : i32, i32
  }
  func.func @transform_2(%arg0: i32) -> (i32, i32) {
    %c0_i32 = arith.constant 0 : i32
    %c0_i32_0 = arith.constant 0 : i32
    %c0_i32_1 = arith.constant 0 : i32
    return %c0_i32, %c0_i32_0 : i32, i32
  }
  func.func @transform_3(%arg0: i32) -> (i32, i32) {
    %c0_i32 = arith.constant 0 : i32
    %c0_i32_0 = arith.constant 0 : i32
    %c0_i32_1 = arith.constant 0 : i32
    return %c0_i32, %c0_i32_0 : i32, i32
  }
  func.func @transform_4(%arg0: i32) -> (i32, i32) {
    %c0_i32 = arith.constant 0 : i32
    %c0_i32_0 = arith.constant 0 : i32
    %c0_i32_1 = arith.constant 0 : i32
    return %c0_i32, %c0_i32_0 : i32, i32
  }
}

module attributes {stable_mosaic.version = 11 : i64} {
  func.func @_matmul_stats_kernel(%arg0: i32, %arg1: memref<256x288xbf16, #tpu.memory_space<vmem>>, %arg2: memref<288x128xbf16, #tpu.memory_space<vmem>>, %arg3: memref<256x128xbf16, #tpu.memory_space<vmem>>, %arg4: memref<1x2x128xf32, #tpu.memory_space<vmem>>) attributes {dimension_semantics = [#tpu.dimension_semantics<parallel>], iteration_bounds = array<i64: 2>, scalar_prefetch = 0 : i64, scratch_operands = 0 : i64, tpu.core_type = #tpu.core_type<tc>, window_params = [{transform_indices = @transform_0, window_bounds = array<i64: 256, 288>}, {pipeline_mode = #tpu.pipeline_mode<synchronous>, transform_indices = @transform_1, window_bounds = array<i64: 288, 128>}, {transform_indices = @transform_2, window_bounds = array<i64: 256, 128>}, {transform_indices = @transform_3, window_bounds = array<i64: 1, 2, 128>}]} {
    %c0 = arith.constant 0 : index
    %c0_0 = arith.constant 0 : index
    %0 = vector.load %arg1[%c0, %c0_0] : memref<256x288xbf16, #tpu.memory_space<vmem>>, vector<256x288xbf16>
    %c0_1 = arith.constant 0 : index
    %c0_2 = arith.constant 0 : index
    %1 = vector.load %arg2[%c0_1, %c0_2] : memref<288x128xbf16, #tpu.memory_space<vmem>>, vector<288x128xbf16>
    %cst = arith.constant dense<0.000000e+00> : vector<256x128xf32>
    %2 = tpu.matmul %0, %1, %cst {dimension_numbers = #tpu.dot_dimension_numbers<[1], [0], [0], [1], [0, 0, 1, 1], [], []>} : vector<256x288xbf16>, vector<288x128xbf16>, vector<256x128xf32> -> vector<256x128xf32>
    %cst_3 = arith.constant dense<0.000000e+00> : vector<128xf32>
    %3 = vector.multi_reduction <add>, %2, %cst_3 [0] : vector<256x128xf32> to vector<128xf32>
    %4 = vector.shape_cast %3 : vector<128xf32> to vector<1x128xf32>
    %5 = arith.mulf %2, %2 : vector<256x128xf32>
    %cst_4 = arith.constant dense<0.000000e+00> : vector<128xf32>
    %6 = vector.multi_reduction <add>, %5, %cst_4 [0] : vector<256x128xf32> to vector<128xf32>
    %7 = vector.shape_cast %6 : vector<128xf32> to vector<1x128xf32>
    %8 = tpu.concatenate %4, %7 in 0 : vector<1x128xf32>, vector<1x128xf32> -> vector<2x128xf32>
    %9 = vector.shape_cast %8 : vector<2x128xf32> to vector<1x2x128xf32>
    %c0_5 = arith.constant 0 : index
    %c0_6 = arith.constant 0 : index
    %c0_7 = arith.constant 0 : index
    %10 = vector.load %arg4[%c0_5, %c0_6, %c0_7] : memref<1x2x128xf32, #tpu.memory_space<vmem>>, vector<1x2x128xf32>
    tpu.vector_store %arg4[%c0_5, %c0_6, %c0_7], %9 {strides = array<i32>} : memref<1x2x128xf32, #tpu.memory_space<vmem>>, vector<1x2x128xf32>,
    %11 = arith.truncf %2 : vector<256x128xf32> to vector<256x128xbf16>
    %c0_8 = arith.constant 0 : index
    %c0_9 = arith.constant 0 : index
    %12 = vector.load %arg3[%c0_8, %c0_9] : memref<256x128xbf16, #tpu.memory_space<vmem>>, vector<256x128xbf16>
    tpu.vector_store %arg3[%c0_8, %c0_9], %11 {strides = array<i32>} : memref<256x128xbf16, #tpu.memory_space<vmem>>, vector<256x128xbf16>,
    return
  }
  func.func @transform_0(%arg0: i32) -> (i32, i32) {
    %c0_i32 = arith.constant 0 : i32
    %c0_i32_0 = arith.constant 0 : i32
    return %arg0, %c0_i32 : i32, i32
  }
  func.func @transform_1(%arg0: i32) -> (i32, i32) {
    %c0_i32 = arith.constant 0 : i32
    %c0_i32_0 = arith.constant 0 : i32
    %c0_i32_1 = arith.constant 0 : i32
    return %c0_i32, %c0_i32_0 : i32, i32
  }
  func.func @transform_2(%arg0: i32) -> (i32, i32) {
    %c0_i32 = arith.constant 0 : i32
    %c0_i32_0 = arith.constant 0 : i32
    return %arg0, %c0_i32 : i32, i32
  }
  func.func @transform_3(%arg0: i32) -> (i32, i32, i32) {
    %c0_i32 = arith.constant 0 : i32
    %c0_i32_0 = arith.constant 0 : i32
    %c0_i32_1 = arith.constant 0 : i32
    return %arg0, %c0_i32, %c0_i32_0 : i32, i32, i32
  }
}

module attributes {stable_mosaic.version = 11 : i64} {
  func.func @_bn_relu_kernel(%arg0: i32, %arg1: memref<256x128xbf16, #tpu.memory_space<vmem>>, %arg2: memref<1x128xf32, #tpu.memory_space<vmem>>, %arg3: memref<1x128xf32, #tpu.memory_space<vmem>>, %arg4: memref<256x128xbf16, #tpu.memory_space<vmem>>) attributes {dimension_semantics = [#tpu.dimension_semantics<parallel>], iteration_bounds = array<i64: 2>, scalar_prefetch = 0 : i64, scratch_operands = 0 : i64, tpu.core_type = #tpu.core_type<tc>, window_params = [{transform_indices = @transform_0, window_bounds = array<i64: 256, 128>}, {pipeline_mode = #tpu.pipeline_mode<synchronous>, transform_indices = @transform_1, window_bounds = array<i64: 1, 128>}, {pipeline_mode = #tpu.pipeline_mode<synchronous>, transform_indices = @transform_2, window_bounds = array<i64: 1, 128>}, {transform_indices = @transform_3, window_bounds = array<i64: 256, 128>}]} {
    %c0 = arith.constant 0 : index
    %c0_0 = arith.constant 0 : index
    %0 = vector.load %arg1[%c0, %c0_0] : memref<256x128xbf16, #tpu.memory_space<vmem>>, vector<256x128xbf16>
    %1 = arith.extf %0 : vector<256x128xbf16> to vector<256x128xf32>
    %c0_1 = arith.constant 0 : index
    %c0_2 = arith.constant 0 : index
    %2 = vector.load %arg2[%c0_1, %c0_2] : memref<1x128xf32, #tpu.memory_space<vmem>>, vector<1x128xf32>
    %3 = vector.broadcast %2 : vector<1x128xf32> to vector<256x128xf32>
    %4 = arith.mulf %1, %3 : vector<256x128xf32>
    %c0_3 = arith.constant 0 : index
    %c0_4 = arith.constant 0 : index
    %5 = vector.load %arg3[%c0_3, %c0_4] : memref<1x128xf32, #tpu.memory_space<vmem>>, vector<1x128xf32>
    %6 = vector.broadcast %5 : vector<1x128xf32> to vector<256x128xf32>
    %7 = arith.addf %4, %6 : vector<256x128xf32>
    %cst = arith.constant 0.000000e+00 : f32
    %8 = vector.broadcast %cst : f32 to vector<256x128xf32>
    %9 = arith.maximumf %7, %8 : vector<256x128xf32>
    %10 = arith.truncf %9 : vector<256x128xf32> to vector<256x128xbf16>
    %c0_5 = arith.constant 0 : index
    %c0_6 = arith.constant 0 : index
    %11 = vector.load %arg4[%c0_5, %c0_6] : memref<256x128xbf16, #tpu.memory_space<vmem>>, vector<256x128xbf16>
    tpu.vector_store %arg4[%c0_5, %c0_6], %10 {strides = array<i32>} : memref<256x128xbf16, #tpu.memory_space<vmem>>, vector<256x128xbf16>,
    return
  }
  func.func @transform_0(%arg0: i32) -> (i32, i32) {
    %c0_i32 = arith.constant 0 : i32
    %c0_i32_0 = arith.constant 0 : i32
    return %arg0, %c0_i32 : i32, i32
  }
  func.func @transform_1(%arg0: i32) -> (i32, i32) {
    %c0_i32 = arith.constant 0 : i32
    %c0_i32_0 = arith.constant 0 : i32
    %c0_i32_1 = arith.constant 0 : i32
    return %c0_i32, %c0_i32_0 : i32, i32
  }
  func.func @transform_2(%arg0: i32) -> (i32, i32) {
    %c0_i32 = arith.constant 0 : i32
    %c0_i32_0 = arith.constant 0 : i32
    %c0_i32_1 = arith.constant 0 : i32
    return %c0_i32, %c0_i32_0 : i32, i32
  }
  func.func @transform_3(%arg0: i32) -> (i32, i32) {
    %c0_i32 = arith.constant 0 : i32
    %c0_i32_0 = arith.constant 0 : i32
    return %arg0, %c0_i32 : i32, i32
  }
}

module attributes {stable_mosaic.version = 11 : i64} {
  func.func @_matmul_bias_tanh_kernel(%arg0: i32, %arg1: memref<512x144xbf16, #tpu.memory_space<vmem>>, %arg2: memref<144x128xbf16, #tpu.memory_space<vmem>>, %arg3: memref<1x128xf32, #tpu.memory_space<vmem>>, %arg4: memref<512x128xbf16, #tpu.memory_space<vmem>>) attributes {dimension_semantics = [#tpu.dimension_semantics<parallel>], iteration_bounds = array<i64: 4>, scalar_prefetch = 0 : i64, scratch_operands = 0 : i64, tpu.core_type = #tpu.core_type<tc>, window_params = [{transform_indices = @transform_0, window_bounds = array<i64: 512, 144>}, {pipeline_mode = #tpu.pipeline_mode<synchronous>, transform_indices = @transform_1, window_bounds = array<i64: 144, 128>}, {pipeline_mode = #tpu.pipeline_mode<synchronous>, transform_indices = @transform_2, window_bounds = array<i64: 1, 128>}, {transform_indices = @transform_3, window_bounds = array<i64: 512, 128>}]} {
    %c0 = arith.constant 0 : index
    %c0_0 = arith.constant 0 : index
    %0 = vector.load %arg1[%c0, %c0_0] : memref<512x144xbf16, #tpu.memory_space<vmem>>, vector<512x144xbf16>
    %c0_1 = arith.constant 0 : index
    %c0_2 = arith.constant 0 : index
    %1 = vector.load %arg2[%c0_1, %c0_2] : memref<144x128xbf16, #tpu.memory_space<vmem>>, vector<144x128xbf16>
    %cst = arith.constant dense<0.000000e+00> : vector<512x128xf32>
    %2 = tpu.matmul %0, %1, %cst {dimension_numbers = #tpu.dot_dimension_numbers<[1], [0], [0], [1], [0, 0, 1, 1], [], []>} : vector<512x144xbf16>, vector<144x128xbf16>, vector<512x128xf32> -> vector<512x128xf32>
    %c0_3 = arith.constant 0 : index
    %c0_4 = arith.constant 0 : index
    %3 = vector.load %arg3[%c0_3, %c0_4] : memref<1x128xf32, #tpu.memory_space<vmem>>, vector<1x128xf32>
    %4 = vector.broadcast %3 : vector<1x128xf32> to vector<512x128xf32>
    %5 = arith.addf %2, %4 : vector<512x128xf32>
    %6 = math.tanh %5 : vector<512x128xf32>
    %7 = arith.truncf %6 : vector<512x128xf32> to vector<512x128xbf16>
    %c0_5 = arith.constant 0 : index
    %c0_6 = arith.constant 0 : index
    %8 = vector.load %arg4[%c0_5, %c0_6] : memref<512x128xbf16, #tpu.memory_space<vmem>>, vector<512x128xbf16>
    tpu.vector_store %arg4[%c0_5, %c0_6], %7 {strides = array<i32>} : memref<512x128xbf16, #tpu.memory_space<vmem>>, vector<512x128xbf16>,
    return
  }
  func.func @transform_0(%arg0: i32) -> (i32, i32) {
    %c0_i32 = arith.constant 0 : i32
    %c0_i32_0 = arith.constant 0 : i32
    return %arg0, %c0_i32 : i32, i32
  }
  func.func @transform_1(%arg0: i32) -> (i32, i32) {
    %c0_i32 = arith.constant 0 : i32
    %c0_i32_0 = arith.constant 0 : i32
    %c0_i32_1 = arith.constant 0 : i32
    return %c0_i32, %c0_i32_0 : i32, i32
  }
  func.func @transform_2(%arg0: i32) -> (i32, i32) {
    %c0_i32 = arith.constant 0 : i32
    %c0_i32_0 = arith.constant 0 : i32
    %c0_i32_1 = arith.constant 0 : i32
    return %c0_i32, %c0_i32_0 : i32, i32
  }
  func.func @transform_3(%arg0: i32) -> (i32, i32) {
    %c0_i32 = arith.constant 0 : i32
    %c0_i32_0 = arith.constant 0 : i32
    return %arg0, %c0_i32 : i32, i32
  }
}

</mosaic_0001>

<bundles_post_ra>
// kernel: forward.6
= control target key start
LH: loop header
LB: loop body
LE: loop exit
PB: predicated region body
PF: predicated region fallthrough
CT: control target
= control target key end

     0   :  { %9 = vsyncpa [#allocation3], 0  ;;  %s782_s0 = inlined_call_operand.vmem [shape: bf16[32,384], index: 0, kind: input, shape index: {}]   ;;  %s783_s1 = inlined_call_operand.hbm [shape: bf16[384,128], index: 1, kind: input, shape index: {}]   ;;  %s784_s2 = inlined_call_operand.hbm [shape: f32[1,128], index: 2, kind: input, shape index: {}]   ;;  %s785_s3 = inlined_call_operand.hbm [shape: f32[1,128], index: 3, kind: input, shape index: {}]   ;;  %s786_s4 = inlined_call_operand.vmem [shape: bf16[32,128], index: 4, kind: output, shape index: {}]  }
   0x1   :  { %10 = vsyncpa [#allocation5], 0  ;;  %s685_s15 = smov [#allocation4]   ;;  %s686_s17 = smov [#allocation2]  }
   0x2   :  { %s31_s16 = sshll.u32 %s685_s15, 4  ;;  %s18_s18 = sshll.u32 %s686_s17, 4  ;;  %s32_s16 = int_to_ptr.vmem [resolvable:$true] %s31_s16  ;;  %s715_s18 = int_to_ptr.vmem [resolvable:$true] %s18_s18 }
   0x3   :  { %s615_s21 = scalar_lea.hbm %s784_s2, 16 }
   0x4   :  { %p616_p0 = scmp.ne.s32.totalorder %s784_s2, %s615_s21  ;;  %p619_p1 = scmp.lt.u32.totalorder %s615_s21, %s784_s2 }
   0x6   :  { %p621_p2 = pnand %p619_p1, %p616_p0 }
   0x8   :  { %624 = shalt.err (!%p621_p2)
}
   0x9   :  { %s625_s26 = scalar_lea.vmem %s32_s16, 16  ;;  %s629_s27 = scalar_lea.vmem %s32_s16, 32 }
   0xa   :  { %p626_p3 = scmp.ne.s32.totalorder %s32_s16, %s625_s26  ;;  %p630_p4 = scmp.lt.s32.totalorder %s32_s16, %s32_s16 }
   0xb   :  { %p631_p5 = scmp.lt.s32.totalorder %s629_s27, %s625_s26 }
   0xd   :  { %p632_p6 = por %p631_p5, %p630_p4 }
   0xf   :  { %p633_p7 = pnand %p632_p6, %p626_p3 }
  0x11   :  { %636 = shalt.err (!%p633_p7)
}
  0x12   :  { %34 = dma.hbm_to_vmem [thread:$0]  %s784_s2, 16, %s32_s16, [#allocation5]  }
  0x13   :  { %s637_s6 = scalar_lea.hbm %s783_s1, 3072 }
  0x14   :  { %p638_p8 = scmp.ne.s32.totalorder %s783_s1, %s637_s6  ;;  %p641_p9 = scmp.lt.u32.totalorder %s637_s6, %s783_s1 }
  0x16   :  { %p643_p10 = pnand %p641_p9, %p638_p8 }
  0x18   :  { %646 = shalt.err (!%p643_p10)
}
  0x19   :  { %s647_s11 = scalar_lea.vmem %s715_s18, 3072  ;;  %p652_p12 = scmp.lt.s32.totalorder %s715_s18, %s715_s18 }
  0x1a   :  { %p648_p11 = scmp.ne.s32.totalorder %s715_s18, %s647_s11  ;;  %p653_p13 = scmp.lt.s32.totalorder %s647_s11, %s647_s11 }
  0x1c   :  { %p654_p0 = por %p653_p13, %p652_p12 }
  0x1e   :  { %p655_p1 = pnand %p654_p0, %p648_p11 }
  0x20   :  { %658 = shalt.err (!%p655_p1)
}
  0x21   :  { %s687_s2 = smov 64   ;;  %s688_s12 = smov 4  }
  0x22   :  { %24 = dma.hbm_to_vmem [thread:$0]  %s783_s1, 3072, %s715_s18, [#allocation3], %s687_s2, %s687_s2, %s688_s12  }
  0x23   :  { %s689_s15 = smov [#allocation6]   ;;  %s659_s20 = scalar_lea.hbm %s785_s3, 16 }
  0x24   :  { %s41_s16 = sshll.u32 %s689_s15, 4  ;;  %p660_p2 = scmp.ne.s32.totalorder %s785_s3, %s659_s20  ;;  %s42_s16 = int_to_ptr.vmem [resolvable:$true] %s41_s16 }
  0x25   :  { %p663_p3 = scmp.lt.u32.totalorder %s659_s20, %s785_s3 }
  0x27   :  { %p665_p4 = pnand %p663_p3, %p660_p2 }
  0x29   :  { %668 = shalt.err (!%p665_p4)
}
  0x2a   :  { %s669_s25 = scalar_lea.vmem %s42_s16, 16  ;;  %s673_s1 = scalar_lea.vmem %s42_s16, 32 }
  0x2b   :  { %p670_p5 = scmp.ne.s32.totalorder %s42_s16, %s669_s25  ;;  %p674_p6 = scmp.lt.s32.totalorder %s42_s16, %s42_s16 }
  0x2c   :  { %p675_p7 = scmp.lt.s32.totalorder %s673_s1, %s669_s25 }
  0x2e   :  { %p676_p8 = por %p675_p7, %p674_p6 }
  0x30   :  { %p677_p9 = pnand %p676_p8, %p670_p5 }
  0x32   :  { %680 = shalt.err (!%p677_p9)
}
  0x33   :  { %44 = dma.hbm_to_vmem [thread:$0]  %s785_s3, 16, %s42_s16, [#allocation5]  }
  0x34   :  { %681 = dma.done.wait [#allocation3], 3072  }
  0x35   :  { %682 = vsyncadd [#allocation3], 4294964224 }
  0x36   :  { %683 = dma.done.wait [#allocation5], 32  }
  0x37   :  { %684 = vsyncadd [#allocation5], 4294967264  ;;  %v581_v0 = vld [vmem:[#allocation2 + $0x40] sm:$0xff]   ;;  %v584_v3 = vld [vmem:[#allocation2 + $0x48] sm:$0xff]  }
  0x38   :  { %v582_v1 = vld [vmem:[#allocation2] sm:$0xff]   ;;  %518 = vmatprep.subr.bf16.mxu0 %v581_v0  ;;  %v585_v4 = vld [vmem:[#allocation2 + $0x8] sm:$0xff]   ;;  %v587_v6 = vld [vmem:[#allocation2 + $0x50] sm:$0xff]  }
  0x39   :  { %v583_v2 = vld [vmem:[#allocation2 + $0x80] sm:$0xff]   ;;  %519 = vmatpush3.bf16.msra.mxu0 %v582_v1  ;;  %v586_v5 = vld [vmem:[#allocation2 + $0x88] sm:$0xff]   ;;  %v588_v7 = vld [vmem:[#allocation2 + $0x10] sm:$0xff]  }
  0x3a   :  { %556 = vmatprep.subr.bf16.mxu1 %v583_v2  ;;  %520 = vmatprep.subr.bf16.mxu0 %v584_v3  ;;  %v589_v8 = vld [vmem:[#allocation2 + $0x90] sm:$0xff]   ;;  %v590_v9 = vld [vmem:[#allocation2 + $0x58] sm:$0xff]   ;;  %v593_v12 = vld [vmem:[#allocation2 + $0x60] sm:$0xff]  }
  0x3b   :  { %557 = vmatpush3.bf16.msra.mxu1 %v583_v2  ;;  %v591_v10 = vld [vmem:[#allocation2 + $0x18] sm:$0xff]   ;;  %v595_v13 = vld [vmem:[#allocation2 + $0xa0] sm:$0xff]   ;;  %v596_v15 = vld [vmem:[#allocation2 + $0x68] sm:$0xff]  }
  0x3c   :  { %558 = vmatprep.subr.bf16.mxu1 %v586_v5  ;;  %v592_v11 = vld [vmem:[#allocation2 + $0x98] sm:$0xff]   ;;  %v594_v14 = vld [vmem:[#allocation2 + $0x20] sm:$0xff]   ;;  %v598_v16 = vld [vmem:[#allocation2 + $0xa8] sm:$0xff]  }
  0x3d   :  { %521 = vmatpush3.bf16.msra.mxu0 %v585_v4  ;;  %v597_v17 = vld [vmem:[#allocation2 + $0x28] sm:$0xff]   ;;  %v599_v18 = vld [vmem:[#allocation2 + $0x70] sm:$0xff]   ;;  %v602_v21 = vld [vmem:[#allocation2 + $0x78] sm:$0xff]  }
  0x3e   :  { %522 = vmatprep.subr.bf16.mxu0 %v587_v6  ;;  %v600_v19 = vld [vmem:[#allocation2 + $0x30] sm:$0xff]   ;;  %v604_v22 = vld [vmem:[#allocation2 + $0xb8] sm:$0xff]   ;;  %v605_v26 = vld [vmem:[%s782_s0] ss:$12 sps:$4 sm:$0xff]  }
  0x3f   :  { %559 = vmatpush3.bf16.msra.mxu1 %v586_v5  ;;  %v601_v20 = vld [vmem:[#allocation2 + $0xb0] sm:$0xff]   ;;  %v603_v25 = vld [vmem:[#allocation2 + $0x38] sm:$0xff]   ;;  %v609_v28 = vld [vmem:[%s782_s0 + $0x20] ss:$12 sps:$4 sm:$0xff]  }
  0x40   :  { %560 = vmatprep.subr.bf16.mxu1 %v589_v8  ;;  %v607_v23 = vld [vmem:[%s782_s0 + $0x4] ss:$12 sps:$4 sm:$0xff]   ;;  %v608_v24 = vld [vmem:[%s782_s0 + $0x8] ss:$12 sps:$4 sm:$0xff]  }
  0x41   :  { %523 = vmatpush3.bf16.msra.mxu0 %v588_v7  ;;  %319 = vmatprep.mubr.bf16.mxu0 %v607_v23  ;;  %v610_v27 = vld [vmem:[%s782_s0 + $0x1c] ss:$12 sps:$4 sm:$0xff]   ;;  %v612_v29 = vld [vmem:[%s782_s0 + $0x18] ss:$12 sps:$4 sm:$0xff]  }
  0x42   :  { %524 = vmatprep.subr.bf16.mxu0 %v590_v9  ;;  %572 = vmatprep.mubr.bf16.mxu1 %v608_v24 }
  0x43   :  { %561 = vmatpush3.bf16.msra.mxu1 %v589_v8 }
  0x44   :  { %562 = vmatprep.subr.bf16.mxu1 %v592_v11 }
  0x45   :  { %525 = vmatpush3.bf16.msra.mxu0 %v591_v10 }
  0x46   :  { %526 = vmatprep.subr.bf16.mxu0 %v593_v12 }
  0x47   :  { %563 = vmatpush3.bf16.msra.mxu1 %v592_v11 }
  0x48   :  { %564 = vmatprep.subr.bf16.mxu1 %v595_v13 }
  0x49   :  { %527 = vmatpush3.bf16.msra.mxu0 %v594_v14  ;;  %v420_v14 = vlaneseq }
  0x4a   :  { %528 = vmatprep.subr.bf16.mxu0 %v596_v15 }
  0x4b   :  { %565 = vmatpush3.bf16.msra.mxu1 %v595_v13  ;;  %v421_v15 = vshrl.u32 %v420_v14, 7 }
  0x4c   :  { %566 = vmatprep.subr.bf16.mxu1 %v598_v16 }
  0x4d   :  { %529 = vmatpush3.bf16.msra.mxu0 %v597_v17  ;;  %v422_v17 = vsub.s32 0, %v421_v15 }
  0x4e   :  { %530 = vmatprep.subr.bf16.mxu0 %v599_v18 }
  0x4f   :  { %567 = vmatpush3.bf16.msra.mxu1 %v598_v16  ;;  %v412_v16 = vld [vmem:[#allocation4] sm:$0x1] }
  0x50   :  { %568 = vmatprep.subr.bf16.mxu1 %v601_v20 }
  0x51   :  { %531 = vmatpush3.bf16.msra.mxu0 %v600_v19 }
  0x52   :  { %532 = vmatprep.subr.bf16.mxu0 %v602_v21 }
  0x53   :  { %569 = vmatpush3.bf16.msra.mxu1 %v601_v20  ;;  %v416_v20 = vld [vmem:[#allocation6] sm:$0x1] }
  0x54   :  { %570 = vmatprep.subr.bf16.mxu1 %v604_v22 }
  0x55   :  { %533 = vmatpush3.bf16.msra.mxu0 %v603_v25 }
  0x57   :  { %571 = vmatpush3.bf16.msra.mxu1 %v604_v22 }
  0x58   :  { %320 = vmatmul.mubr.bf16.vlgmr.msra.gmra.mrb[0].mxu0 %v605_v26 }
  0x59   :  { %327 = vmatprep.mubr.bf16.mxu0 %v610_v27 }
  0x5a   :  { %573 = vmatmul.mubr.bf16.vlgmr.msra.gmra.mrb[0].mxu1 %v609_v28 }
  0x60   :  { %328 = vmatmul.mubr.bf16.gmra.mrb[4].mxu0 %v612_v29 }
 0x12b   :  { %v534_v30 = vpop.f32.mrb[0].mxu0 }
 0x12c   :  { %v535_v31 = vpop.f32.mrb[1].mxu0 }
 0x12d   :  { %v536_v32 = vadd.f32 %v535_v31, %v534_v30  ;;  %v537_v33 = vpop.f32.mrb[2].mxu0  ;;  %v574_v34 = vpop.f32.mrb[0].mxu1 }
 0x12e   :  { %v538_v35 = vpop.f32.mrb[3].mxu0  ;;  %v370_v36 = vpop.f32.mrb[1].mxu1 }
 0x12f   :  { %v539_v37 = vadd.f32 %v538_v35, %v537_v33  ;;  %v371_v38 = vadd.f32 %v536_v32, %v370_v36  ;;  %v575_v39 = vpop.f32.mrb[2].mxu1 }
 0x130   :  { %v373_v40 = vpop.f32.mrb[3].mxu1 }
 0x131   :  { %v374_v41 = vadd.f32 %v539_v37, %v373_v40  ;;  %v394_v42 = vmul.f32 %v371_v38, %v371_v38 }
 0x133   :  { %v385_v43 = vadd.f32 %v374_v41, %v371_v38  ;;  %v395_v44 = vmul.f32 %v374_v41, %v374_v41  ;;  %v540_v45 = vpop.f32.mrb[4].mxu0 }
 0x134   :  { %v541_v46 = vpop.f32.mrb[5].mxu0 }
 0x135   :  { %v398_v47 = vadd.f32 %v395_v44, %v394_v42  ;;  %v542_v48 = vadd.f32 %v541_v46, %v540_v45  ;;  %v543_v49 = vpop.f32.mrb[6].mxu0 }
 0x136   :  { %v544_v50 = vpop.f32.mrb[7].mxu0 }
 0x137   :  { %v379_v51 = vadd.f32 %v574_v34, %v542_v48  ;;  %v545_v52 = vadd.f32 %v544_v50, %v543_v49 }
 0x139   :  { %v386_v53 = vadd.f32 %v385_v43, %v379_v51  ;;  %v396_v54 = vmul.f32 %v379_v51, %v379_v51  ;;  %v382_v55 = vadd.f32 %v575_v39, %v545_v52 }
 0x13b   :  { %v399_v56 = vadd.f32 %v398_v47, %v396_v54  ;;  %v387_v57 = vadd.f32 %v386_v53, %v382_v55  ;;  %v397_v58 = vmul.f32 %v382_v55, %v382_v55 }
 0x13d   :  { %v388_v59 = vrot.slane %v387_v57, 4  ;;  %v400_v60 = vadd.f32 %v399_v56, %v397_v58 }
 0x13f   :  { %v389_v61 = vadd.f32 %v388_v59, %v387_v57  ;;  %v401_v62 = vrot.slane %v400_v60, 4 }
 0x141   :  { %v390_v63 = vrot.slane %v389_v61, 2  ;;  %v402_v0 = vadd.f32 %v401_v62, %v400_v60 }
 0x143   :  { %v391_v1 = vadd.f32 %v390_v63, %v389_v61  ;;  %v403_v2 = vrot.slane %v402_v0, 2 }
 0x145   :  { %v392_v3 = vrot.slane %v391_v1, 1  ;;  %v404_v4 = vadd.f32 %v403_v2, %v402_v0 }
 0x147   :  { %v393_v5 = vadd.f32 %v392_v3, %v391_v1  ;;  %v405_v6 = vrot.slane %v404_v4, 1 }
 0x149   :  { %v406_v7 = vadd.f32 %v405_v6, %v404_v4  ;;  %v407_v8 = vmul.f32 0.03125, %v393_v5 }
 0x14b   :  { %v408_v9 = vmul.f32 0.03125, %v406_v7  ;;  %v409_v10 = vmul.f32 %v407_v8, %v407_v8 }
 0x14d   :  { %v410_v11 = vsub.f32 %v408_v9, %v409_v10 }
 0x14f   :  { %v411_v12 = vmax.f32 %v410_v11, 0.0 }
 0x151   :  { %v413_v13 = vadd.f32 1e-05, %v411_v12 }
 0x153   :  { %613 = vrsqrt.f32 %v413_v13 }
 0x15d   :  { %v614_v18 = vpop.eup %613 }
 0x15e   :  { %v415_v19 = vmul.f32 %v614_v18, %v412_v16 }
 0x160   :  { %v417_v21 = vmul.f32 %v415_v19, %v407_v8  ;;  %v423_v22 = vrot.slane %v415_v19, %v422_v17 }
 0x162   :  { %v418_v23 = vsub.f32 %v416_v20, %v417_v21  ;;  %v425_v24 = vmul.f32 %v423_v22, %v371_v38  ;;  %v426_v25 = vmul.f32 %v423_v22, %v374_v41  ;;  %v427_v26 = vmul.f32 %v423_v22, %v379_v51 }
 0x163   :  { %v428_v27 = vmul.f32 %v423_v22, %v382_v55 }
 0x164   :  { %v433_v28 = vrot.slane %v418_v23, %v422_v17 }
 0x166   :  { %v435_v29 = vadd.f32 %v433_v28, %v425_v24  ;;  %v436_v30 = vadd.f32 %v433_v28, %v426_v25  ;;  %v437_v31 = vadd.f32 %v433_v28, %v427_v26  ;;  %v438_v32 = vadd.f32 %v433_v28, %v428_v27 }
 0x168   :  { %v439_v33 = vmax.f32 %v435_v29, 0.0  ;;  %v440_v34 = vmax.f32 %v436_v30, 0.0  ;;  %v441_v35 = vmax.f32 %v437_v31, 0.0  ;;  %v442_v36 = vmax.f32 %v438_v32, 0.0 }
 0x16a   :  { %v510_v37 = vpack.c.bf16 %v440_v34, %v439_v33  ;;  %v515_v39 = vpack.c.bf16 %v442_v36, %v441_v35 }
 0x16c   :  { %511 = vst [vmem:[%s786_s4] sm:$0xff] %v510_v37   ;;  %517 = vst [vmem:[%s786_s4 + $0x8] sm:$0xff] %v515_v39  }
 0x16d   :  { %467 = vsyncpa [#allocation3], 1 }
 0x16e   :  { %468 = vsyncpa [#allocation5], 1 }

// kernel: forward.7
= control target key start
LH: loop header
LB: loop body
LE: loop exit
PB: predicated region body
PF: predicated region fallthrough
CT: control target
= control target key end

     0   :  { %9 = vsyncpa [#allocation3], 0  ;;  %s2193_s0 = inlined_call_operand.vmem [shape: bf16[32,1152], index: 0, kind: input, shape index: {}]   ;;  %s2194_s1 = inlined_call_operand.hbm [shape: bf16[1152,256], index: 1, kind: input, shape index: {}]   ;;  %s2195_s2 = inlined_call_operand.hbm [shape: f32[1,64], index: 2, kind: input, shape index: {}]   ;;  %s2196_s3 = inlined_call_operand.hbm [shape: f32[1,64], index: 3, kind: input, shape index: {}]   ;;  %s2197_s4 = inlined_call_operand.vmem [shape: bf16[32,256], index: 4, kind: output, shape index: {}]  }
   0x1   :  { %10 = vsyncpa [#allocation5], 0  ;;  %s1998_s15 = smov [#allocation4]   ;;  %s1999_s17 = smov [#allocation2]  }
   0x2   :  { %s31_s16 = sshll.u32 %s1998_s15, 4  ;;  %s18_s18 = sshll.u32 %s1999_s17, 4  ;;  %s32_s16 = int_to_ptr.vmem [resolvable:$true] %s31_s16  ;;  %s2030_s18 = int_to_ptr.vmem [resolvable:$true] %s18_s18 }
   0x3   :  { %s1928_s21 = scalar_lea.hbm %s2195_s2, 16 }
   0x4   :  { %p1929_p0 = scmp.ne.s32.totalorder %s2195_s2, %s1928_s21  ;;  %p1932_p1 = scmp.lt.u32.totalorder %s1928_s21, %s2195_s2 }
   0x6   :  { %p1934_p2 = pnand %p1932_p1, %p1929_p0 }
   0x8   :  { %1937 = shalt.err (!%p1934_p2)
}
   0x9   :  { %s1938_s26 = scalar_lea.vmem %s32_s16, 16  ;;  %s1942_s27 = scalar_lea.vmem %s32_s16, 32 }
   0xa   :  { %p1939_p3 = scmp.ne.s32.totalorder %s32_s16, %s1938_s26  ;;  %p1943_p4 = scmp.lt.s32.totalorder %s32_s16, %s32_s16 }
   0xb   :  { %p1944_p5 = scmp.lt.s32.totalorder %s1942_s27, %s1938_s26 }
   0xd   :  { %p1945_p6 = por %p1944_p5, %p1943_p4 }
   0xf   :  { %p1946_p7 = pnand %p1945_p6, %p1939_p3 }
  0x11   :  { %1949 = shalt.err (!%p1946_p7)
}
  0x12   :  { %34 = dma.hbm_to_vmem [thread:$0]  %s2195_s2, 16, %s32_s16, [#allocation5]  }
  0x13   :  { %s1950_s6 = scalar_lea.hbm %s2194_s1, 18432 }
  0x14   :  { %p1951_p8 = scmp.ne.s32.totalorder %s2194_s1, %s1950_s6  ;;  %p1954_p9 = scmp.lt.u32.totalorder %s1950_s6, %s2194_s1 }
  0x16   :  { %p1956_p10 = pnand %p1954_p9, %p1951_p8 }
  0x18   :  { %1959 = shalt.err (!%p1956_p10)
}
  0x19   :  { %s1960_s11 = scalar_lea.vmem %s2030_s18, 18432  ;;  %p1965_p12 = scmp.lt.s32.totalorder %s2030_s18, %s2030_s18 }
  0x1a   :  { %p1961_p11 = scmp.ne.s32.totalorder %s2030_s18, %s1960_s11  ;;  %p1966_p13 = scmp.lt.s32.totalorder %s1960_s11, %s1960_s11 }
  0x1c   :  { %p1967_p0 = por %p1966_p13, %p1965_p12 }
  0x1e   :  { %p1968_p1 = pnand %p1967_p0, %p1961_p11 }
  0x20   :  { %1971 = shalt.err (!%p1968_p1)
}
  0x21   :  { %s2000_s2 = smov 128   ;;  %s2001_s12 = smov 8  }
  0x22   :  { %24 = dma.hbm_to_vmem [thread:$0]  %s2194_s1, 18432, %s2030_s18, [#allocation3], %s2000_s2, %s2000_s2, %s2001_s12  }
  0x23   :  { %s2002_s15 = smov [#allocation6]   ;;  %s1972_s20 = scalar_lea.hbm %s2196_s3, 16 }
  0x24   :  { %s41_s16 = sshll.u32 %s2002_s15, 4  ;;  %p1973_p2 = scmp.ne.s32.totalorder %s2196_s3, %s1972_s20  ;;  %s42_s16 = int_to_ptr.vmem [resolvable:$true] %s41_s16 }
  0x25   :  { %p1976_p3 = scmp.lt.u32.totalorder %s1972_s20, %s2196_s3 }
  0x27   :  { %p1978_p4 = pnand %p1976_p3, %p1973_p2 }
  0x29   :  { %1981 = shalt.err (!%p1978_p4)
}
  0x2a   :  { %s1982_s25 = scalar_lea.vmem %s42_s16, 16  ;;  %s1986_s1 = scalar_lea.vmem %s42_s16, 32 }
  0x2b   :  { %p1983_p5 = scmp.ne.s32.totalorder %s42_s16, %s1982_s25  ;;  %p1987_p6 = scmp.lt.s32.totalorder %s42_s16, %s42_s16 }
  0x2c   :  { %p1988_p7 = scmp.lt.s32.totalorder %s1986_s1, %s1982_s25 }
  0x2e   :  { %p1989_p8 = por %p1988_p7, %p1987_p6 }
  0x30   :  { %p1990_p9 = pnand %p1989_p8, %p1983_p5 }
  0x32   :  { %1993 = shalt.err (!%p1990_p9)
}
  0x33   :  { %44 = dma.hbm_to_vmem [thread:$0]  %s2196_s3, 16, %s42_s16, [#allocation5]  }
  0x34   :  { %1994 = dma.done.wait [#allocation3], 18432  }
  0x35   :  { %1995 = vsyncadd [#allocation3], 4294948864 }
  0x36   :  { %1996 = dma.done.wait [#allocation5], 32  }
  0x37   :  { %1997 = vsyncadd [#allocation5], 4294967264  ;;  %v1684_v0 = vld [vmem:[#allocation2 + $0x4] ss:$8 sps:$4 sm:$0xff]   ;;  %v1688_v2 = vld [vmem:[#allocation2] ss:$8 sps:$4 sm:$0xff]  }
  0x38   :  { %v1686_v1 = vld [vmem:[#allocation2 + $0x204] ss:$8 sps:$4 sm:$0xff]   ;;  %1031 = vmatprep.subr.bf16.mxu1 %v1684_v0  ;;  %v1689_v3 = vld [vmem:[#allocation2 + $0x200] ss:$8 sps:$4 sm:$0xff]   ;;  %v1690_v4 = vld [vmem:[#allocation2 + $0x14] ss:$8 sps:$4 sm:$0xff]  }
  0x39   :  { %1137 = vmatprep.subr.bf16.mxu0 %v1686_v1  ;;  %1032 = vmatpush1.bf16.msra.mxu1 %v1688_v2  ;;  %v1692_v5 = vld [vmem:[#allocation2 + $0x214] ss:$8 sps:$4 sm:$0xff]   ;;  %v1694_v6 = vld [vmem:[#allocation2 + $0x10] ss:$8 sps:$4 sm:$0xff]   ;;  %v1696_v8 = vld [vmem:[#allocation2 + $0x24] ss:$8 sps:$4 sm:$0xff]  }
  0x3a   :  { %1138 = vmatpush1.bf16.msra.mxu0 %v1689_v3  ;;  %1033 = vmatprep.subr.bf16.mxu1 %v1690_v4  ;;  %v1695_v7 = vld [vmem:[#allocation2 + $0x210] ss:$8 sps:$4 sm:$0xff]   ;;  %v1698_v9 = vld [vmem:[#allocation2 + $0x224] ss:$8 sps:$4 sm:$0xff]   ;;  %v1700_v10 = vld [vmem:[#allocation2 + $0x20] ss:$8 sps:$4 sm:$0xff]  }
  0x3b   :  { %1139 = vmatprep.subr.bf16.mxu0 %v1692_v5  ;;  %v1701_v11 = vld [vmem:[#allocation2 + $0x220] ss:$8 sps:$4 sm:$0xff]   ;;  %v1702_v12 = vld [vmem:[#allocation2 + $0x34] ss:$8 sps:$4 sm:$0xff]   ;;  %v1706_v14 = vld [vmem:[#allocation2 + $0x30] ss:$8 sps:$4 sm:$0xff]  }
  0x3c   :  { %v1704_v13 = vld [vmem:[#allocation2 + $0x234] ss:$8 sps:$4 sm:$0xff]   ;;  %v1707_v15 = vld [vmem:[#allocation2 + $0x230] ss:$8 sps:$4 sm:$0xff]   ;;  %v1708_v16 = vld [vmem:[#allocation2 + $0x44] ss:$8 sps:$4 sm:$0xff]  }
  0x3d   :  { %1034 = vmatpush1.bf16.msra.mxu1 %v1694_v6  ;;  %v1710_v17 = vld [vmem:[#allocation2 + $0x244] ss:$8 sps:$4 sm:$0xff]   ;;  %v1712_v18 = vld [vmem:[#allocation2 + $0x40] ss:$8 sps:$4 sm:$0xff]   ;;  %v1714_v20 = vld [vmem:[#allocation2 + $0x54] ss:$8 sps:$4 sm:$0xff]  }
  0x3e   :  { %1140 = vmatpush1.bf16.msra.mxu0 %v1695_v7  ;;  %1035 = vmatprep.subr.bf16.mxu1 %v1696_v8  ;;  %v1713_v19 = vld [vmem:[#allocation2 + $0x240] ss:$8 sps:$4 sm:$0xff]   ;;  %v1716_v21 = vld [vmem:[#allocation2 + $0x254] ss:$8 sps:$4 sm:$0xff]   ;;  %v1718_v22 = vld [vmem:[#allocation2 + $0x50] ss:$8 sps:$4 sm:$0xff]  }
  0x3f   :  { %1141 = vmatprep.subr.bf16.mxu0 %v1698_v9  ;;  %v1719_v23 = vld [vmem:[#allocation2 + $0x250] ss:$8 sps:$4 sm:$0xff]   ;;  %v1720_v24 = vld [vmem:[#allocation2 + $0x64] ss:$8 sps:$4 sm:$0xff]   ;;  %v1724_v26 = vld [vmem:[#allocation2 + $0x60] ss:$8 sps:$4 sm:$0xff]  }
  0x40   :  { %v1722_v25 = vld [vmem:[#allocation2 + $0x264] ss:$8 sps:$4 sm:$0xff]   ;;  %v1725_v27 = vld [vmem:[#allocation2 + $0x260] ss:$8 sps:$4 sm:$0xff]   ;;  %v1726_v28 = vld [vmem:[#allocation2 + $0x74] ss:$8 sps:$4 sm:$0xff]  }
  0x41   :  { %1036 = vmatpush1.bf16.msra.mxu1 %v1700_v10  ;;  %v1728_v29 = vld [vmem:[#allocation2 + $0x274] ss:$8 sps:$4 sm:$0xff]   ;;  %v1730_v30 = vld [vmem:[#allocation2 + $0x70] ss:$8 sps:$4 sm:$0xff]   ;;  %v1732_v32 = vld [vmem:[#allocation2 + $0x84] ss:$8 sps:$4 sm:$0xff]  }
  0x42   :  { %1142 = vmatpush1.bf16.msra.mxu0 %v1701_v11  ;;  %1037 = vmatprep.subr.bf16.mxu1 %v1702_v12  ;;  %v1731_v31 = vld [vmem:[#allocation2 + $0x270] ss:$8 sps:$4 sm:$0xff]   ;;  %v1734_v33 = vld [vmem:[#allocation2 + $0x284] ss:$8 sps:$4 sm:$0xff]   ;;  %v1736_v34 = vld [vmem:[#allocation2 + $0x80] ss:$8 sps:$4 sm:$0xff]  }
  0x43   :  { %1143 = vmatprep.subr.bf16.mxu0 %v1704_v13  ;;  %v1737_v35 = vld [vmem:[#allocation2 + $0x280] ss:$8 sps:$4 sm:$0xff]   ;;  %v1738_v36 = vld [vmem:[#allocation2 + $0x94] ss:$8 sps:$4 sm:$0xff]   ;;  %v1742_v38 = vld [vmem:[#allocation2 + $0x90] ss:$8 sps:$4 sm:$0xff]  }
  0x44   :  { %v1740_v37 = vld [vmem:[#allocation2 + $0x294] ss:$8 sps:$4 sm:$0xff]   ;;  %v1743_v39 = vld [vmem:[#allocation2 + $0x290] ss:$8 sps:$4 sm:$0xff]   ;;  %v1744_v40 = vld [vmem:[#allocation2 + $0xa4] ss:$8 sps:$4 sm:$0xff]  }
  0x45   :  { %1038 = vmatpush1.bf16.msra.mxu1 %v1706_v14  ;;  %v1746_v41 = vld [vmem:[#allocation2 + $0x2a4] ss:$8 sps:$4 sm:$0xff]   ;;  %v1748_v42 = vld [vmem:[#allocation2 + $0xa0] ss:$8 sps:$4 sm:$0xff]   ;;  %v1750_v44 = vld [vmem:[#allocation2 + $0xb4] ss:$8 sps:$4 sm:$0xff]  }
  0x46   :  { %1144 = vmatpush1.bf16.msra.mxu0 %v1707_v15  ;;  %1039 = vmatprep.subr.bf16.mxu1 %v1708_v16  ;;  %v1749_v43 = vld [vmem:[#allocation2 + $0x2a0] ss:$8 sps:$4 sm:$0xff]   ;;  %v1752_v45 = vld [vmem:[#allocation2 + $0x2b4] ss:$8 sps:$4 sm:$0xff]   ;;  %v1754_v46 = vld [vmem:[#allocation2 + $0xb0] ss:$8 sps:$4 sm:$0xff]  }
  0x47   :  { %1145 = vmatprep.subr.bf16.mxu0 %v1710_v17  ;;  %v1755_v47 = vld [vmem:[#allocation2 + $0x2b0] ss:$8 sps:$4 sm:$0xff]   ;;  %v1782_v48 = vld [vmem:[%s2193_s0 + $0x4] ss:$36 sps:$4 sm:$0xff]   ;;  %v1762_v54 = vld [vmem:[#allocation2 + $0xd4] ss:$8 sps:$4 sm:$0xff]  }
  0x48   :  { %v1756_v49 = vld [vmem:[#allocation2 + $0xc4] ss:$8 sps:$4 sm:$0xff]   ;;  %1063 = vmatprep.mubr.bf16.mxu1 %v1782_v48  ;;  %v1788_v51 = vld [vmem:[%s2193_s0 + $0x14] ss:$36 sps:$4 sm:$0xff]   ;;  %v1760_v52 = vld [vmem:[#allocation2 + $0xc0] ss:$8 sps:$4 sm:$0xff]  }
  0x49   :  { %1040 = vmatpush1.bf16.msra.mxu1 %v1712_v18  ;;  %v1758_v50 = vld [vmem:[#allocation2 + $0x2c4] ss:$8 sps:$4 sm:$0xff]   ;;  %v1761_v53 = vld [vmem:[#allocation2 + $0x2c0] ss:$8 sps:$4 sm:$0xff]   ;;  %v1764_v55 = vld [vmem:[#allocation2 + $0x2d4] ss:$8 sps:$4 sm:$0xff]   ;;  %1169 = vmatprep.mubr.bf16.mxu0 %v1788_v51 }
  0x4a   :  { %1146 = vmatpush1.bf16.msra.mxu0 %v1713_v19  ;;  %1041 = vmatprep.subr.bf16.mxu1 %v1714_v20  ;;  %v1766_v56 = vld [vmem:[#allocation2 + $0xd0] ss:$8 sps:$4 sm:$0xff]   ;;  %v1768_v58 = vld [vmem:[#allocation2 + $0xe4] ss:$8 sps:$4 sm:$0xff]   ;;  %v1772_v60 = vld [vmem:[#allocation2 + $0xe0] ss:$8 sps:$4 sm:$0xff]  }
  0x4b   :  { %1147 = vmatprep.subr.bf16.mxu0 %v1716_v21  ;;  %v1767_v57 = vld [vmem:[#allocation2 + $0x2d0] ss:$8 sps:$4 sm:$0xff]   ;;  %v1770_v59 = vld [vmem:[#allocation2 + $0x2e4] ss:$8 sps:$4 sm:$0xff]   ;;  %v1773_v61 = vld [vmem:[#allocation2 + $0x2e0] ss:$8 sps:$4 sm:$0xff]  }
  0x4c   :  { %v1774_v62 = vld [vmem:[#allocation2 + $0xf4] ss:$8 sps:$4 sm:$0xff]   ;;  %v1778_v0 = vld [vmem:[#allocation2 + $0xf0] ss:$8 sps:$4 sm:$0xff]   ;;  %v1785_v2 = vld [vmem:[#allocation2 + $0x104] ss:$8 sps:$4 sm:$0xff]  }
  0x4d   :  { %1042 = vmatpush1.bf16.msra.mxu1 %v1718_v22  ;;  %v1776_v63 = vld [vmem:[#allocation2 + $0x2f4] ss:$8 sps:$4 sm:$0xff]   ;;  %v1779_v1 = vld [vmem:[#allocation2 + $0x2f0] ss:$8 sps:$4 sm:$0xff]   ;;  %v1791_v3 = vld [vmem:[#allocation2 + $0x304] ss:$8 sps:$4 sm:$0xff]  }
  0x4e   :  { %1148 = vmatpush1.bf16.msra.mxu0 %v1719_v23  ;;  %1043 = vmatprep.subr.bf16.mxu1 %v1720_v24  ;;  %v1780_v4 = vld [vmem:[%s2193_s0] ss:$36 sps:$4 sm:$0xff]   ;;  %v1786_v6 = vld [vmem:[%s2193_s0 + $0x10] ss:$36 sps:$4 sm:$0xff]   ;;  %vm1382_vm0 = vcmask 523264  }
  0x4f   :  { %1149 = vmatprep.subr.bf16.mxu0 %v1722_v25  ;;  %v1783_v5 = vld [vmem:[#allocation2 + $0x100] ss:$8 sps:$4 sm:$0xff]   ;;  %v1794_v8 = vld [vmem:[#allocation2 + $0x114] ss:$8 sps:$4 sm:$0xff]   ;;  %v1792_v10 = vld [vmem:[#allocation2 + $0x110] ss:$8 sps:$4 sm:$0xff]  }
  0x50   :  { %v1789_v7 = vld [vmem:[#allocation2 + $0x300] ss:$8 sps:$4 sm:$0xff]   ;;  %v1797_v9 = vld [vmem:[#allocation2 + $0x314] ss:$8 sps:$4 sm:$0xff]   ;;  %v1795_v11 = vld [vmem:[#allocation2 + $0x310] ss:$8 sps:$4 sm:$0xff]  }
  0x51   :  { %1044 = vmatpush1.bf16.msra.mxu1 %v1724_v26  ;;  %v1800_v12 = vld [vmem:[#allocation2 + $0x124] ss:$8 sps:$4 sm:$0xff]   ;;  %v1798_v14 = vld [vmem:[#allocation2 + $0x120] ss:$8 sps:$4 sm:$0xff]   ;;  %v1806_v16 = vld [vmem:[#allocation2 + $0x134] ss:$8 sps:$4 sm:$0xff]  }
  0x52   :  { %1150 = vmatpush1.bf16.msra.mxu0 %v1725_v27  ;;  %1045 = vmatprep.subr.bf16.mxu1 %v1726_v28  ;;  %v1803_v13 = vld [vmem:[#allocation2 + $0x324] ss:$8 sps:$4 sm:$0xff]   ;;  %v1801_v15 = vld [vmem:[#allocation2 + $0x320] ss:$8 sps:$4 sm:$0xff]   ;;  %v1809_v17 = vld [vmem:[#allocation2 + $0x334] ss:$8 sps:$4 sm:$0xff]  }
  0x53   :  { %1151 = vmatprep.subr.bf16.mxu0 %v1728_v29  ;;  %v1804_v18 = vld [vmem:[#allocation2 + $0x130] ss:$8 sps:$4 sm:$0xff]   ;;  %v1812_v20 = vld [vmem:[#allocation2 + $0x144] ss:$8 sps:$4 sm:$0xff]   ;;  %v1810_v22 = vld [vmem:[#allocation2 + $0x140] ss:$8 sps:$4 sm:$0xff]  }
  0x54   :  { %v1807_v19 = vld [vmem:[#allocation2 + $0x330] ss:$8 sps:$4 sm:$0xff]   ;;  %v1815_v21 = vld [vmem:[#allocation2 + $0x344] ss:$8 sps:$4 sm:$0xff]   ;;  %v1813_v23 = vld [vmem:[#allocation2 + $0x340] ss:$8 sps:$4 sm:$0xff]  }
  0x55   :  { %1046 = vmatpush1.bf16.msra.mxu1 %v1730_v30  ;;  %v1818_v24 = vld [vmem:[#allocation2 + $0x154] ss:$8 sps:$4 sm:$0xff]   ;;  %v1816_v26 = vld [vmem:[#allocation2 + $0x150] ss:$8 sps:$4 sm:$0xff]   ;;  %v1824_v28 = vld [vmem:[#allocation2 + $0x164] ss:$8 sps:$4 sm:$0xff]  }
  0x56   :  { %1152 = vmatpush1.bf16.msra.mxu0 %v1731_v31  ;;  %1047 = vmatprep.subr.bf16.mxu1 %v1732_v32  ;;  %v1821_v25 = vld [vmem:[#allocation2 + $0x354] ss:$8 sps:$4 sm:$0xff]   ;;  %v1819_v27 = vld [vmem:[#allocation2 + $0x350] ss:$8 sps:$4 sm:$0xff]   ;;  %v1874_v31 = vld [vmem:[%s2193_s0 + $0x48] ss:$36 sps:$4 sm:$0xff]  }
  0x57   :  { %1153 = vmatprep.subr.bf16.mxu0 %v1734_v33  ;;  %v1870_v29 = vld [vmem:[%s2193_s0 + $0x4c] ss:$36 sps:$4 sm:$0xff]   ;;  %v1872_v30 = vld [vmem:[%s2193_s0 + $0x5c] ss:$36 sps:$4 sm:$0xff]  }
  0x58   :  { %v1827_v32 = vld [vmem:[#allocation2 + $0x364] ss:$8 sps:$4 sm:$0xff]   ;;  %v1878_v33 = vld [vmem:[%s2193_s0 + $0x58] ss:$36 sps:$4 sm:$0xff]  }
  0x59   :  { %1048 = vmatpush1.bf16.msra.mxu1 %v1736_v34  ;;  %v1822_v34 = vld [vmem:[#allocation2 + $0x160] ss:$8 sps:$4 sm:$0xff]   ;;  %v1840_v48 = vld [vmem:[#allocation2 + $0x190] ss:$8 sps:$4 sm:$0xff]   ;;  %v1851_v51 = vld [vmem:[#allocation2 + $0x3a4] ss:$8 sps:$4 sm:$0xff]  }
  0x5a   :  { %1154 = vmatpush1.bf16.msra.mxu0 %v1737_v35  ;;  %1049 = vmatprep.subr.bf16.mxu1 %v1738_v36  ;;  %v1825_v35 = vld [vmem:[#allocation2 + $0x360] ss:$8 sps:$4 sm:$0xff]   ;;  %v1830_v36 = vld [vmem:[#allocation2 + $0x174] ss:$8 sps:$4 sm:$0xff]  }
  0x5b   :  { %1155 = vmatprep.subr.bf16.mxu0 %v1740_v37  ;;  %v1833_v37 = vld [vmem:[#allocation2 + $0x374] ss:$8 sps:$4 sm:$0xff]  }
  0x5d   :  { %1050 = vmatpush1.bf16.msra.mxu1 %v1742_v38  ;;  %v1828_v38 = vld [vmem:[#allocation2 + $0x170] ss:$8 sps:$4 sm:$0xff]  }
  0x5e   :  { %1156 = vmatpush1.bf16.msra.mxu0 %v1743_v39  ;;  %1051 = vmatprep.subr.bf16.mxu1 %v1744_v40  ;;  %v1831_v39 = vld [vmem:[#allocation2 + $0x370] ss:$8 sps:$4 sm:$0xff]   ;;  %v1836_v40 = vld [vmem:[#allocation2 + $0x184] ss:$8 sps:$4 sm:$0xff]  }
  0x5f   :  { %1157 = vmatprep.subr.bf16.mxu0 %v1746_v41  ;;  %v1890_v41 = vld [vmem:[%s2193_s0 + $0xc] ss:$36 sps:$4 sm:$0xff]  }
  0x61   :  { %1052 = vmatpush1.bf16.msra.mxu1 %v1748_v42  ;;  %v1839_v42 = vld [vmem:[#allocation2 + $0x384] ss:$8 sps:$4 sm:$0xff]  }
  0x62   :  { %1158 = vmatpush1.bf16.msra.mxu0 %v1749_v43  ;;  %1053 = vmatprep.subr.bf16.mxu1 %v1750_v44  ;;  %v1893_v43 = vld [vmem:[%s2193_s0 + $0x1c] ss:$36 sps:$4 sm:$0xff]  }
  0x63   :  { %1159 = vmatprep.subr.bf16.mxu0 %v1752_v45  ;;  %v1834_v44 = vld [vmem:[#allocation2 + $0x180] ss:$8 sps:$4 sm:$0xff]  }
  0x64   :  { %v1837_v45 = vld [vmem:[#allocation2 + $0x380] ss:$8 sps:$4 sm:$0xff]  }
  0x65   :  { %1054 = vmatpush1.bf16.msra.mxu1 %v1754_v46  ;;  %v1842_v46 = vld [vmem:[#allocation2 + $0x194] ss:$8 sps:$4 sm:$0xff]  }
  0x66   :  { %1160 = vmatpush1.bf16.msra.mxu0 %v1755_v47  ;;  %1055 = vmatprep.subr.bf16.mxu1 %v1756_v49  ;;  %v1845_v47 = vld [vmem:[#allocation2 + $0x394] ss:$8 sps:$4 sm:$0xff]   ;;  %v1843_v49 = vld [vmem:[#allocation2 + $0x390] ss:$8 sps:$4 sm:$0xff]  }
  0x67   :  { %1161 = vmatprep.subr.bf16.mxu0 %v1758_v50  ;;  %v1848_v50 = vld [vmem:[#allocation2 + $0x1a4] ss:$8 sps:$4 sm:$0xff]  }
  0x69   :  { %1056 = vmatpush1.bf16.msra.mxu1 %v1760_v52  ;;  %v1846_v52 = vld [vmem:[#allocation2 + $0x1a0] ss:$8 sps:$4 sm:$0xff]  }
  0x6a   :  { %1162 = vmatpush1.bf16.msra.mxu0 %v1761_v53  ;;  %1057 = vmatprep.subr.bf16.mxu1 %v1762_v54  ;;  %v1849_v53 = vld [vmem:[#allocation2 + $0x3a0] ss:$8 sps:$4 sm:$0xff]   ;;  %v1854_v54 = vld [vmem:[#allocation2 + $0x1b4] ss:$8 sps:$4 sm:$0xff]  }
  0x6b   :  { %1163 = vmatprep.subr.bf16.mxu0 %v1764_v55  ;;  %v1857_v55 = vld [vmem:[#allocation2 + $0x3b4] ss:$8 sps:$4 sm:$0xff]  }
  0x6d   :  { %1058 = vmatpush1.bf16.msra.mxu1 %v1766_v56  ;;  %v1852_v56 = vld [vmem:[#allocation2 + $0x1b0] ss:$8 sps:$4 sm:$0xff]  }
  0x6e   :  { %1164 = vmatpush1.bf16.msra.mxu0 %v1767_v57  ;;  %1059 = vmatprep.subr.bf16.mxu1 %v1768_v58  ;;  %v1855_v57 = vld [vmem:[#allocation2 + $0x3b0] ss:$8 sps:$4 sm:$0xff]   ;;  %v1860_v58 = vld [vmem:[#allocation2 + $0x1c4] ss:$8 sps:$4 sm:$0xff]  }
  0x6f   :  { %1165 = vmatprep.subr.bf16.mxu0 %v1770_v59  ;;  %v1863_v59 = vld [vmem:[#allocation2 + $0x3c4] ss:$8 sps:$4 sm:$0xff]  }
  0x71   :  { %1060 = vmatpush1.bf16.msra.mxu1 %v1772_v60  ;;  %v1858_v60 = vld [vmem:[#allocation2 + $0x1c0] ss:$8 sps:$4 sm:$0xff]  }
  0x72   :  { %1166 = vmatpush1.bf16.msra.mxu0 %v1773_v61  ;;  %1061 = vmatprep.subr.bf16.mxu1 %v1774_v62  ;;  %v1861_v61 = vld [vmem:[#allocation2 + $0x3c0] ss:$8 sps:$4 sm:$0xff]   ;;  %v1866_v62 = vld [vmem:[#allocation2 + $0x1d4] ss:$8 sps:$4 sm:$0xff]  }
  0x73   :  { %1167 = vmatprep.subr.bf16.mxu0 %v1776_v63  ;;  %v1869_v63 = vld [vmem:[#allocation2 + $0x3d4] ss:$8 sps:$4 sm:$0xff]  }
  0x75   :  { %1062 = vmatpush1.bf16.msra.mxu1 %v1778_v0  ;;  %v1864_v0 = vld [vmem:[#allocation2 + $0x1d0] ss:$8 sps:$4 sm:$0xff]  }
  0x76   :  { %1168 = vmatpush1.bf16.msra.mxu0 %v1779_v1  ;;  %1084 = vmatprep.subr.bf16.mxu1 %v1785_v2  ;;  %v1867_v1 = vld [vmem:[#allocation2 + $0x3d0] ss:$8 sps:$4 sm:$0xff]   ;;  %v1877_v2 = vld [vmem:[#allocation2 + $0x1e4] ss:$8 sps:$4 sm:$0xff]  }
  0x77   :  { %1190 = vmatprep.subr.bf16.mxu0 %v1791_v3  ;;  %v1881_v3 = vld [vmem:[#allocation2 + $0x3e4] ss:$8 sps:$4 sm:$0xff]  }
  0x78   :  { %1064 = vmatmul.mubr.bf16.vlgmr.msra.gmra.mrb[0].mxu1 %v1780_v4  ;;  %v1875_v4 = vld [vmem:[#allocation2 + $0x1e0] ss:$8 sps:$4 sm:$0xff]  }
  0x79   :  { %1170 = vmatmul.mubr.bf16.vlgmr.msra.gmra.mrb[0].mxu0 %v1786_v6  ;;  %1085 = vmatpush1.bf16.msra.mxu1 %v1783_v5  ;;  %v1879_v5 = vld [vmem:[#allocation2 + $0x3e0] ss:$8 sps:$4 sm:$0xff]   ;;  %v1884_v6 = vld [vmem:[#allocation2 + $0x1f4] ss:$8 sps:$4 sm:$0xff]  }
  0x7a   :  { %1191 = vmatpush1.bf16.msra.mxu0 %v1789_v7  ;;  %1086 = vmatprep.subr.bf16.mxu1 %v1794_v8  ;;  %v1887_v7 = vld [vmem:[#allocation2 + $0x3f4] ss:$8 sps:$4 sm:$0xff]   ;;  %v1882_v8 = vld [vmem:[#allocation2 + $0x1f0] ss:$8 sps:$4 sm:$0xff]  }
  0x7b   :  { %1192 = vmatprep.subr.bf16.mxu0 %v1797_v9  ;;  %1073 = vmatprep.mubr.bf16.mxu1 %v1870_v29  ;;  %v1885_v9 = vld [vmem:[#allocation2 + $0x3f0] ss:$8 sps:$4 sm:$0xff]   ;;  %v1920_v29 = vld [vmem:[#allocation2 + $0x464] ss:$8 sps:$4 sm:$0xff]  }
  0x7c   :  { %1179 = vmatprep.mubr.bf16.mxu0 %v1872_v30  ;;  %v1918_v30 = vld [vmem:[#allocation2 + $0x460] ss:$8 sps:$4 sm:$0xff]  }
  0x7d   :  { %1087 = vmatpush1.bf16.msra.mxu1 %v1792_v10  ;;  %v1896_v10 = vld [vmem:[#allocation2 + $0x404] ss:$8 sps:$4 sm:$0xff]  }
  0x7e   :  { %1193 = vmatpush1.bf16.msra.mxu0 %v1795_v11  ;;  %1088 = vmatprep.subr.bf16.mxu1 %v1800_v12  ;;  %v1888_v11 = vld [vmem:[%s2193_s0 + $0x8] ss:$36 sps:$4 sm:$0xff]   ;;  %v1891_v12 = vld [vmem:[%s2193_s0 + $0x18] ss:$36 sps:$4 sm:$0xff]  }
  0x7f   :  { %1194 = vmatprep.subr.bf16.mxu0 %v1803_v13  ;;  %v1894_v13 = vld [vmem:[#allocation2 + $0x400] ss:$8 sps:$4 sm:$0xff]  }
  0x80   :  { %1074 = vmatmul.mubr.bf16.gmra.mrb[4].mxu1 %v1874_v31  ;;  %v1923_v31 = vld [vmem:[#allocation2 + $0x474] ss:$8 sps:$4 sm:$0xff]  }
  0x81   :  { %1089 = vmatpush1.bf16.msra.mxu1 %v1798_v14  ;;  %1180 = vmatmul.mubr.bf16.gmra.mrb[4].mxu0 %v1878_v33  ;;  %v1899_v14 = vld [vmem:[#allocation2 + $0x414] ss:$8 sps:$4 sm:$0xff]   ;;  %v1924_v33 = vld [vmem:[%s2193_s0 + $0x20] ss:$36 sps:$4 sm:$0xff]  }
  0x82   :  { %1195 = vmatpush1.bf16.msra.mxu0 %v1801_v15  ;;  %1090 = vmatprep.subr.bf16.mxu1 %v1806_v16  ;;  %v1900_v15 = vld [vmem:[%s2193_s0 + $0x54] ss:$36 sps:$4 sm:$0xff]   ;;  %v1902_v16 = vld [vmem:[%s2193_s0 + $0x64] ss:$36 sps:$4 sm:$0xff]  }
  0x83   :  { %1196 = vmatprep.subr.bf16.mxu0 %v1809_v17  ;;  %1116 = vmatprep.mubr.bf16.mxu1 %v1890_v41  ;;  %v1897_v17 = vld [vmem:[#allocation2 + $0x410] ss:$8 sps:$4 sm:$0xff]  }
  0x84   :  { %1222 = vmatprep.mubr.bf16.mxu0 %v1893_v43 }
  0x85   :  { %1091 = vmatpush1.bf16.msra.mxu1 %v1804_v18  ;;  %v1908_v18 = vld [vmem:[#allocation2 + $0x424] ss:$8 sps:$4 sm:$0xff]  }
  0x86   :  { %1197 = vmatpush1.bf16.msra.mxu0 %v1807_v19  ;;  %1092 = vmatprep.subr.bf16.mxu1 %v1812_v20  ;;  %v1904_v19 = vld [vmem:[%s2193_s0 + $0x50] ss:$36 sps:$4 sm:$0xff]   ;;  %v1905_v20 = vld [vmem:[%s2193_s0 + $0x60] ss:$36 sps:$4 sm:$0xff]  }
  0x87   :  { %1198 = vmatprep.subr.bf16.mxu0 %v1815_v21  ;;  %v1906_v21 = vld [vmem:[#allocation2 + $0x420] ss:$8 sps:$4 sm:$0xff]  }
  0x89   :  { %1093 = vmatpush1.bf16.msra.mxu1 %v1810_v22  ;;  %v1911_v22 = vld [vmem:[#allocation2 + $0x434] ss:$8 sps:$4 sm:$0xff]  }
  0x8a   :  { %1199 = vmatpush1.bf16.msra.mxu0 %v1813_v23  ;;  %1094 = vmatprep.subr.bf16.mxu1 %v1818_v24  ;;  %v1909_v23 = vld [vmem:[#allocation2 + $0x430] ss:$8 sps:$4 sm:$0xff]   ;;  %v1914_v24 = vld [vmem:[#allocation2 + $0x444] ss:$8 sps:$4 sm:$0xff]  }
  0x8b   :  { %1200 = vmatprep.subr.bf16.mxu0 %v1821_v25  ;;  %v2003_v25 = vmov 0  }
  0x8d   :  { %1095 = vmatpush1.bf16.msra.mxu1 %v1816_v26  ;;  %v1912_v26 = vld [vmem:[#allocation2 + $0x440] ss:$8 sps:$4 sm:$0xff]  }
  0x8e   :  { %1201 = vmatpush1.bf16.msra.mxu0 %v1819_v27  ;;  %1096 = vmatprep.subr.bf16.mxu1 %v1824_v28  ;;  %v1917_v27 = vld [vmem:[#allocation2 + $0x454] ss:$8 sps:$4 sm:$0xff]   ;;  %v1915_v28 = vld [vmem:[#allocation2 + $0x450] ss:$8 sps:$4 sm:$0xff]  }
  0x8f   :  { %1202 = vmatprep.subr.bf16.mxu0 %v1827_v32  ;;  %v1921_v32 = vld [vmem:[#allocation2 + $0x470] ss:$8 sps:$4 sm:$0xff]  }
  0x91   :  { %1097 = vmatpush1.bf16.msra.mxu1 %v1822_v34  ;;  %v1925_v34 = vld [vmem:[%s2193_s0 + $0x68] ss:$36 sps:$4 sm:$0xff]   ;;  %s2004_s0 = smov 64  }
  0x92   :  { %1203 = vmatpush1.bf16.msra.mxu0 %v1825_v35  ;;  %1098 = vmatprep.subr.bf16.mxu1 %v1830_v36 }
  0x93   :  { %1204 = vmatprep.subr.bf16.mxu0 %v1833_v37 }
  0x95   :  { %1099 = vmatpush1.bf16.msra.mxu1 %v1828_v38 }
  0x96   :  { %1205 = vmatpush1.bf16.msra.mxu0 %v1831_v39  ;;  %1100 = vmatprep.subr.bf16.mxu1 %v1836_v40 }
  0x97   :  { %1206 = vmatprep.subr.bf16.mxu0 %v1839_v42 }
  0x99   :  { %1101 = vmatpush1.bf16.msra.mxu1 %v1834_v44 }
  0x9a   :  { %1207 = vmatpush1.bf16.msra.mxu0 %v1837_v45  ;;  %1102 = vmatprep.subr.bf16.mxu1 %v1842_v46 }
  0x9b   :  { %1208 = vmatprep.subr.bf16.mxu0 %v1845_v47 }
  0x9d   :  { %1103 = vmatpush1.bf16.msra.mxu1 %v1840_v48 }
  0x9e   :  { %1209 = vmatpush1.bf16.msra.mxu0 %v1843_v49  ;;  %1104 = vmatprep.subr.bf16.mxu1 %v1848_v50 }
  0x9f   :  { %1210 = vmatprep.subr.bf16.mxu0 %v1851_v51 }
  0xa1   :  { %1105 = vmatpush1.bf16.msra.mxu1 %v1846_v52 }
  0xa2   :  { %1211 = vmatpush1.bf16.msra.mxu0 %v1849_v53  ;;  %1106 = vmatprep.subr.bf16.mxu1 %v1854_v54 }
  0xa3   :  { %1212 = vmatprep.subr.bf16.mxu0 %v1857_v55 }
  0xa5   :  { %1107 = vmatpush1.bf16.msra.mxu1 %v1852_v56 }
  0xa6   :  { %1213 = vmatpush1.bf16.msra.mxu0 %v1855_v57  ;;  %1108 = vmatprep.subr.bf16.mxu1 %v1860_v58 }
  0xa7   :  { %1214 = vmatprep.subr.bf16.mxu0 %v1863_v59 }
  0xa9   :  { %1109 = vmatpush1.bf16.msra.mxu1 %v1858_v60 }
  0xaa   :  { %1215 = vmatpush1.bf16.msra.mxu0 %v1861_v61  ;;  %1110 = vmatprep.subr.bf16.mxu1 %v1866_v62 }
  0xab   :  { %1216 = vmatprep.subr.bf16.mxu0 %v1869_v63 }
  0xad   :  { %1111 = vmatpush1.bf16.msra.mxu1 %v1864_v0 }
  0xae   :  { %1217 = vmatpush1.bf16.msra.mxu0 %v1867_v1  ;;  %1112 = vmatprep.subr.bf16.mxu1 %v1877_v2 }
  0xaf   :  { %1218 = vmatprep.subr.bf16.mxu0 %v1881_v3 }
  0xb1   :  { %1113 = vmatpush1.bf16.msra.mxu1 %v1875_v4 }
  0xb2   :  { %1219 = vmatpush1.bf16.msra.mxu0 %v1879_v5  ;;  %1114 = vmatprep.subr.bf16.mxu1 %v1884_v6 }
  0xb3   :  { %1220 = vmatprep.subr.bf16.mxu0 %v1887_v7 }
  0xb5   :  { %1115 = vmatpush1.bf16.msra.mxu1 %v1882_v8 }
  0xb6   :  { %1221 = vmatpush1.bf16.msra.mxu0 %v1885_v9  ;;  %1629 = vmatprep.subr.bf16.mxu1 %v1896_v10 }
  0xb7   :  { %1243 = vmatprep.subr.bf16.mxu0 %v1896_v10 }
  0xb8   :  { %1117 = vmatmul.mubr.bf16.vlgmr.msra.gmra.mrb[0].mxu1 %v1888_v11 }
  0xb9   :  { %1223 = vmatmul.mubr.bf16.vlgmr.msra.gmra.mrb[0].mxu0 %v1891_v12  ;;  %1637 = vmatpush1.bf16.msra.mxu1 %v1894_v13 }
  0xba   :  { %1244 = vmatpush1.bf16.msra.mxu0 %v1894_v13  ;;  %1630 = vmatprep.subr.bf16.mxu1 %v1899_v14 }
  0xbb   :  { %1245 = vmatprep.subr.bf16.mxu0 %v1899_v14  ;;  %1126 = vmatprep.mubr.bf16.mxu1 %v1900_v15 }
  0xbc   :  { %1232 = vmatprep.mubr.bf16.mxu0 %v1902_v16 }
  0xbd   :  { %1638 = vmatpush1.bf16.msra.mxu1 %v1897_v17 }
  0xbe   :  { %1246 = vmatpush1.bf16.msra.mxu0 %v1897_v17  ;;  %1631 = vmatprep.subr.bf16.mxu1 %v1908_v18 }
  0xbf   :  { %1247 = vmatprep.subr.bf16.mxu0 %v1908_v18 }
  0xc0   :  { %1127 = vmatmul.mubr.bf16.gmra.mrb[4].mxu1 %v1904_v19 }
  0xc1   :  { %1233 = vmatmul.mubr.bf16.gmra.mrb[4].mxu0 %v1905_v20  ;;  %1639 = vmatpush1.bf16.msra.mxu1 %v1906_v21 }
  0xc2   :  { %1248 = vmatpush1.bf16.msra.mxu0 %v1906_v21  ;;  %1632 = vmatprep.subr.bf16.mxu1 %v1911_v22 }
  0xc3   :  { %1249 = vmatprep.subr.bf16.mxu0 %v1911_v22  ;;  %1275 = vmatprep.mubr.bf16.mxu0 %v2003_v25 }
  0xc4   :  { %1285 = vmatprep.mubr.bf16.mxu1 %v2003_v25 }
  0xc5   :  { %1640 = vmatpush1.bf16.msra.mxu1 %v1909_v23 }
  0xc6   :  { %1250 = vmatpush1.bf16.msra.mxu0 %v1909_v23  ;;  %1633 = vmatprep.subr.bf16.mxu1 %v1914_v24 }
  0xc7   :  { %1251 = vmatprep.subr.bf16.mxu0 %v1914_v24 }
  0xc9   :  { %1641 = vmatpush1.bf16.msra.mxu1 %v1912_v26 }
  0xca   :  { %1252 = vmatpush1.bf16.msra.mxu0 %v1912_v26  ;;  %1634 = vmatprep.subr.bf16.mxu1 %v1917_v27 }
  0xcb   :  { %1253 = vmatprep.subr.bf16.mxu0 %v1917_v27 }
  0xcd   :  { %1642 = vmatpush1.bf16.msra.mxu1 %v1915_v28 }
  0xce   :  { %1254 = vmatpush1.bf16.msra.mxu0 %v1915_v28  ;;  %1635 = vmatprep.subr.bf16.mxu1 %v1920_v29 }
  0xcf   :  { %1255 = vmatprep.subr.bf16.mxu0 %v1920_v29 }
  0xd1   :  { %1643 = vmatpush1.bf16.msra.mxu1 %v1918_v30 }
  0xd2   :  { %1256 = vmatpush1.bf16.msra.mxu0 %v1918_v30  ;;  %1636 = vmatprep.subr.bf16.mxu1 %v1923_v31 }
  0xd3   :  { %1257 = vmatprep.subr.bf16.mxu0 %v1923_v31 }
  0xd5   :  { %1644 = vmatpush1.bf16.msra.mxu1 %v1921_v32 }
  0xd6   :  { %1258 = vmatpush1.bf16.msra.mxu0 %v1921_v32 }
  0xd8   :  { %1286 = vmatmul.mubr.bf16.vlgmr.msra.gmra.mrb[8].mxu1 %v1925_v34 }
  0xd9   :  { %1276 = vmatmul.mubr.bf16.vlgmr.msra.gmra.mrb[0].mxu0 %v1924_v33 }
 0x18b   :  { %v1118_v35 = vpop.f32.mrb[0].mxu1 }
 0x18c   :  { %v1120_v36 = vpop.f32.mrb[1].mxu1 }
 0x18d   :  { %v1122_v37 = vpop.f32.mrb[2].mxu1 }
 0x18e   :  { %v1124_v38 = vpop.f32.mrb[3].mxu1 }
 0x193   :  { %v1128_v39 = vpop.f32.mrb[4].mxu1 }
 0x194   :  { %v1234_v40 = vpop.f32.mrb[4].mxu0  ;;  %v1130_v42 = vpop.f32.mrb[5].mxu1 }
 0x195   :  { %v1649_v41 = vadd.f32 %v1234_v40, %v1128_v39  ;;  %v1236_v43 = vpop.f32.mrb[5].mxu0  ;;  %v1132_v45 = vpop.f32.mrb[6].mxu1 }
 0x196   :  { %v1651_v44 = vadd.f32 %v1236_v43, %v1130_v42  ;;  %v1238_v46 = vpop.f32.mrb[6].mxu0  ;;  %v1134_v48 = vpop.f32.mrb[7].mxu1 }
 0x197   :  { %v1653_v47 = vadd.f32 %v1238_v46, %v1132_v45  ;;  %v1240_v49 = vpop.f32.mrb[7].mxu0 }
 0x198   :  { %v1655_v50 = vadd.f32 %v1240_v49, %v1134_v48 }
 0x1ab   :  { %v1287_v52 = vpop.f32.mrb[8].mxu1 }
 0x1ac   :  { %v1277_v51 = vpop.f32.mrb[0].mxu0  ;;  %v2129_v54 = vadd.f32 %v1649_v41, %v1287_v52  ;;  %v1289_v56 = vpop.f32.mrb[9].mxu1 }
 0x1ad   :  { %v2127_v53 = vadd.f32 %v1277_v51, %v1118_v35  ;;  %v1279_v55 = vpop.f32.mrb[1].mxu0  ;;  %v2133_v58 = vadd.f32 %v1651_v44, %v1289_v56  ;;  %v1291_v60 = vpop.f32.mrb[10].mxu1 }
 0x1ae   :  { %v2131_v57 = vadd.f32 %v1279_v55, %v1120_v36  ;;  %v1281_v59 = vpop.f32.mrb[2].mxu0  ;;  %v2137_v62 = vadd.f32 %v1653_v47, %v1291_v60  ;;  %v1293_v0 = vpop.f32.mrb[11].mxu1  ;;  %v1318_v9 = vmul.f32 %v2129_v54, %v2129_v54 }
 0x1af   :  { %v2135_v61 = vadd.f32 %v1281_v59, %v1122_v37  ;;  %v1283_v63 = vpop.f32.mrb[3].mxu0  ;;  %v2141_v2 = vadd.f32 %v1655_v50, %v1293_v0  ;;  %v1314_v3 = vmul.f32 %v2127_v53, %v2127_v53  ;;  %v1319_v12 = vmul.f32 %v2133_v58, %v2133_v58 }
 0x1b0   :  { %v2139_v1 = vadd.f32 %v1283_v63, %v1124_v38  ;;  %v1315_v6 = vmul.f32 %v2131_v57, %v2131_v57  ;;  %v1320_v16 = vmul.f32 %v2137_v62, %v2137_v62 }
 0x1b1   :  { %v1296_v4 = vadd.f32 %v2135_v61, %v2127_v53  ;;  %v1316_v5 = vmul.f32 %v2135_v61, %v2135_v61  ;;  %v1321_v19 = vmul.f32 %v2141_v2, %v2141_v2 }
 0x1b2   :  { %v1305_v7 = vadd.f32 %v2139_v1, %v2131_v57  ;;  %v1317_v8 = vmul.f32 %v2139_v1, %v2139_v1 }
 0x1b3   :  { %v1322_v10 = vadd.f32 %v1316_v5, %v1314_v3  ;;  %v1297_v11 = vadd.f32 %v2129_v54, %v1296_v4 }
 0x1b4   :  { %v1331_v13 = vadd.f32 %v1317_v8, %v1315_v6  ;;  %v1306_v14 = vadd.f32 %v2133_v58, %v1305_v7  ;;  %v1375_v7 = vlaneseq }
 0x1b5   :  { %v1298_v15 = vadd.f32 %v2137_v62, %v1297_v11  ;;  %v1323_v17 = vadd.f32 %v1322_v10, %v1318_v9  ;;  %v1367_v9 = vld [vmem:[#allocation4] sm:$0x1] }
 0x1b6   :  { %v1307_v18 = vadd.f32 %v2141_v2, %v1306_v14  ;;  %v1332_v20 = vadd.f32 %v1331_v13, %v1319_v12  ;;  %v1376_v8 = vshrl.u32 %v1375_v7, 7  ;;  %v1371_v13 = vld [vmem:[#allocation6] sm:$0x1] }
 0x1b7   :  { %v1299_v21 = vrot.slane %v1298_v15, 4  ;;  %v1324_v22 = vadd.f32 %v1323_v17, %v1320_v16 }
 0x1b8   :  { %v1308_v23 = vrot.slane %v1307_v18, 4  ;;  %v1333_v24 = vadd.f32 %v1332_v20, %v1321_v19  ;;  %v1377_v10 = vsub.s32 0, %v1376_v8 }
 0x1b9   :  { %v1325_v25 = vrot.slane %v1324_v22, 4  ;;  %v1300_v26 = vadd.f32 %v1299_v21, %v1298_v15 }
 0x1ba   :  { %v1334_v27 = vrot.slane %v1333_v24, 4  ;;  %v1309_v28 = vadd.f32 %v1308_v23, %v1307_v18 }
 0x1bb   :  { %v1301_v29 = vrot.slane %v1300_v26, 2  ;;  %v1326_v30 = vadd.f32 %v1325_v25, %v1324_v22 }
 0x1bc   :  { %v1310_v31 = vrot.slane %v1309_v28, 2  ;;  %v1335_v32 = vadd.f32 %v1334_v27, %v1333_v24 }
 0x1bd   :  { %v1302_v33 = vadd.f32 %v1301_v29, %v1300_v26  ;;  %v1327_v34 = vrot.slane %v1326_v30, 2 }
 0x1be   :  { %v1311_v35 = vadd.f32 %v1310_v31, %v1309_v28  ;;  %v1336_v36 = vrot.slane %v1335_v32, 2 }
 0x1bf   :  { %v1303_v37 = vrot.slane %v1302_v33, 1  ;;  %v1328_v38 = vadd.f32 %v1327_v34, %v1326_v30 }
 0x1c0   :  { %v1312_v39 = vrot.slane %v1311_v35, 1  ;;  %v1337_v40 = vadd.f32 %v1336_v36, %v1335_v32 }
 0x1c1   :  { %v1304_v41 = vadd.f32 %v1303_v37, %v1302_v33  ;;  %v1329_v42 = vrot.slane %v1328_v38, 1 }
 0x1c2   :  { %v1313_v43 = vadd.f32 %v1312_v39, %v1311_v35  ;;  %v1338_v44 = vrot.slane %v1337_v40, 1 }
 0x1c3   :  { %1341 = vrot.lane.b32.xlu0 %v1304_v41, %s2004_s0  ;;  %v1330_v45 = vadd.f32 %v1329_v42, %v1328_v38 }
 0x1c4   :  { %1353 = vrot.lane.b32.xlu1 %v1313_v43, %s2004_s0  ;;  %v1339_v46 = vadd.f32 %v1338_v44, %v1337_v40 }
 0x1c7   :  { %1346 = vrot.lane.b32.xlu0 %v1330_v45, %s2004_s0 }
 0x1c8   :  { %1358 = vrot.lane.b32.xlu1 %v1339_v46, %s2004_s0 }
 0x235   :  { %v1342_v47 = vpop.permute.xlu0 %1341 }
 0x236   :  { %v1344_v48 = vadd.f32 %v1342_v47, %v1304_v41  ;;  %v1354_v49 = vpop.permute.xlu1 %1353 }
 0x238   :  { %v1350_v50 = vadd.f32 %v1344_v48, %v1313_v43 }
 0x239   :  { %v1347_v51 = vpop.permute.xlu0 %1346 }
 0x23a   :  { %v1356_v52 = vadd.f32 %v1354_v49, %v1350_v50  ;;  %v1349_v55 = vadd.f32 %v1347_v51, %v1330_v45  ;;  %v1359_v60 = vpop.permute.xlu1 %1358 }
 0x23c   :  { %v1362_v56 = vmul.f32 0.0078125, %v1356_v52  ;;  %v1351_v59 = vadd.f32 %v1349_v55, %v1339_v46 }
 0x23e   :  { %v1361_v63 = vadd.f32 %v1359_v60, %v1351_v59  ;;  %v1364_v0 = vmul.f32 %v1362_v56, %v1362_v56 }
 0x240   :  { %v1363_v3 = vmul.f32 0.0078125, %v1361_v63 }
 0x242   :  { %v1365_v4 = vsub.f32 %v1363_v3, %v1364_v0 }
 0x244   :  { %v1366_v5 = vmax.f32 %v1365_v4, 0.0 }
 0x246   :  { %v1368_v6 = vadd.f32 1e-05, %v1366_v5 }
 0x248   :  { %1926 = vrsqrt.f32 %v1368_v6 }
 0x252   :  { %v1927_v11 = vpop.eup %1926 }
 0x253   :  { %v1370_v12 = vmul.f32 %v1927_v11, %v1367_v9 }
 0x255   :  { %v1378_v14 = vrot.slane %v1370_v12, %v1377_v10  ;;  %v1372_v15 = vmul.f32 %v1370_v12, %v1362_v56 }
 0x257   :  { %1379 = vrot.lane.b32.xlu0 %v1378_v14, %s2004_s0  ;;  %v1373_v16 = vsub.f32 %v1371_v13, %v1372_v15 }
 0x259   :  { %v1388_v17 = vrot.slane %v1373_v16, %v1377_v10 }
 0x25b   :  { %1389 = vrot.lane.b32.xlu1 %v1388_v17, %s2004_s0 }
 0x2c9   :  { %v1380_v18 = vpop.permute.xlu0 %1379 }
 0x2ca   :  { %v1383_v19 = vsel %vm1382_vm0, %v1370_v12, %v1380_v18 }
 0x2cb   :  { %v1396_v20 = vrot.slane %v1383_v19, %v1377_v10 }
 0x2cd   :  { %v1390_v21 = vpop.permute.xlu1 %1389  ;;  %v1397_v22 = vmul.f32 %v2127_v53, %v1396_v20  ;;  %v1398_v24 = vmul.f32 %v2131_v57, %v1396_v20  ;;  %v1399_v25 = vmul.f32 %v2135_v61, %v1396_v20  ;;  %v1400_v26 = vmul.f32 %v2139_v1, %v1396_v20 }
 0x2ce   :  { %v1392_v23 = vsel %vm1382_vm0, %v1373_v16, %v1390_v21  ;;  %v1401_v28 = vmul.f32 %v2129_v54, %v1396_v20  ;;  %v1402_v29 = vmul.f32 %v2133_v58, %v1396_v20  ;;  %v1403_v30 = vmul.f32 %v2137_v62, %v1396_v20 }
 0x2cf   :  { %v1408_v27 = vrot.slane %v1392_v23, %v1377_v10  ;;  %v1404_v31 = vmul.f32 %v2141_v2, %v1396_v20 }
 0x2d1   :  { %v1409_v32 = vadd.f32 %v1408_v27, %v1397_v22  ;;  %v1410_v33 = vadd.f32 %v1408_v27, %v1398_v24  ;;  %v1411_v34 = vadd.f32 %v1408_v27, %v1399_v25  ;;  %v1412_v53 = vadd.f32 %v1408_v27, %v1400_v26 }
 0x2d2   :  { %v1413_v35 = vadd.f32 %v1408_v27, %v1401_v28  ;;  %v1414_v36 = vadd.f32 %v1408_v27, %v1402_v29  ;;  %v1415_v57 = vadd.f32 %v1408_v27, %v1403_v30  ;;  %v1416_v37 = vadd.f32 %v1408_v27, %v1404_v31 }
 0x2d3   :  { %v1417_v61 = vmax.f32 %v1409_v32, 0.0  ;;  %v1418_v38 = vmax.f32 %v1410_v33, 0.0  ;;  %v1419_v1 = vmax.f32 %v1411_v34, 0.0  ;;  %v1420_v39 = vmax.f32 %v1412_v53, 0.0 }
 0x2d4   :  { %v1421_v40 = vmax.f32 %v1413_v35, 0.0  ;;  %v1422_v54 = vmax.f32 %v1414_v36, 0.0  ;;  %v1423_v41 = vmax.f32 %v1415_v57, 0.0  ;;  %v1424_v58 = vmax.f32 %v1416_v37, 0.0 }
 0x2d5   :  { %v1625_v42 = vpack.c.bf16 %v1418_v38, %v1417_v61  ;;  %v1626_v62 = vpack.c.bf16 %v1420_v39, %v1419_v1 }
 0x2d6   :  { %v1627_v43 = vpack.c.bf16 %v1422_v54, %v1421_v40  ;;  %v1628_v2 = vpack.c.bf16 %v1424_v58, %v1423_v41 }
 0x2d7   :  { %1449 = vst [vmem:[%s2197_s4] sm:$0xff] %v1625_v42  ;;  %1450 = vst [vmem:[%s2197_s4 + $0x8] sm:$0xff] %v1626_v62 }
 0x2d8   :  { %1451 = vst [vmem:[%s2197_s4 + $0x10] sm:$0xff] %v1627_v43  ;;  %1452 = vst [vmem:[%s2197_s4 + $0x18] sm:$0xff] %v1628_v2 }
 0x2d9   :  { %1457 = vsyncpa [#allocation3], 1 }
 0x2da   :  { %1458 = vsyncpa [#allocation5], 1 }

// kernel: forward.8
= control target key start
LH: loop header
LB: loop body
LE: loop exit
PB: predicated region body
PF: predicated region fallthrough
CT: control target
= control target key end

     0   :  { %vm554_vm0 = vcmask 523264   ;;  %s1575_s9 = smov 96   ;;  %s1576_s10 = smov 32   ;;  %vm980_vm1 = vcmask 261120   ;;  %vm983_vm2 = vcmask 785408   ;;  %s2004_s1 = inlined_call_operand.vmem [shape: bf16[576,128], index: 1, kind: input, shape index: {}]   ;;  %s2005_s0 = inlined_call_operand.vmem [shape: bf16[128,576], index: 0, kind: input, shape index: {}]   ;;  %s2006_s2 = inlined_call_operand.vmem [shape: f32[1,32], index: 2, kind: input, shape index: {}]   ;;  %s2007_s3 = inlined_call_operand.vmem [shape: f32[1,32], index: 3, kind: input, shape index: {}]   ;;  %s2008_s4 = inlined_call_operand.vmem [shape: bf16[128,128], index: 4, kind: output, shape index: {}]  }
   0x1   :  { %v1480_v0 = vld [vmem:[%s2004_s1 + $0x40] sm:$0xff]   ;;  %v1484_v4 = vld [vmem:[%s2004_s1 + $0x48] sm:$0xff]   ;;  %v1488_v8 = vld [vmem:[%s2004_s1 + $0x50] sm:$0xff]  }
   0x2   :  { %v1481_v1 = vld [vmem:[%s2004_s1 + $0xc0] sm:$0xff]   ;;  %1305 = vmatprep.subr.bf16.mxu0 %v1480_v0  ;;  %v1485_v5 = vld [vmem:[%s2004_s1 + $0xc8] sm:$0xff]   ;;  %v1489_v9 = vld [vmem:[%s2004_s1 + $0xd0] sm:$0xff]  }
   0x3   :  { %v1482_v2 = vld [vmem:[%s2004_s1] sm:$0xff]   ;;  %1369 = vmatprep.subr.bf16.mxu1 %v1481_v1  ;;  %v1486_v6 = vld [vmem:[%s2004_s1 + $0x8] sm:$0xff]   ;;  %v1490_v10 = vld [vmem:[%s2004_s1 + $0x10] sm:$0xff]  }
   0x4   :  { %v1483_v3 = vld [vmem:[%s2004_s1 + $0x80] sm:$0xff]   ;;  %1306 = vmatpush3.bf16.msra.mxu0 %v1482_v2  ;;  %v1487_v7 = vld [vmem:[%s2004_s1 + $0x88] sm:$0xff]   ;;  %v1491_v11 = vld [vmem:[%s2004_s1 + $0x90] sm:$0xff]  }
   0x5   :  { %1370 = vmatpush3.bf16.msra.mxu1 %v1483_v3  ;;  %1307 = vmatprep.subr.bf16.mxu0 %v1484_v4  ;;  %v1492_v12 = vld [vmem:[%s2004_s1 + $0x58] sm:$0xff]   ;;  %v1496_v16 = vld [vmem:[%s2004_s1 + $0x60] sm:$0xff]   ;;  %v1500_v20 = vld [vmem:[%s2004_s1 + $0x68] sm:$0xff]  }
   0x6   :  { %1371 = vmatprep.subr.bf16.mxu1 %v1485_v5  ;;  %v1493_v13 = vld [vmem:[%s2004_s1 + $0xd8] sm:$0xff]   ;;  %v1497_v17 = vld [vmem:[%s2004_s1 + $0xe0] sm:$0xff]   ;;  %v1501_v21 = vld [vmem:[%s2004_s1 + $0xe8] sm:$0xff]  }
   0x7   :  { %v1494_v14 = vld [vmem:[%s2004_s1 + $0x18] sm:$0xff]   ;;  %v1498_v18 = vld [vmem:[%s2004_s1 + $0x20] sm:$0xff]   ;;  %v1502_v22 = vld [vmem:[%s2004_s1 + $0x28] sm:$0xff]  }
   0x8   :  { %1308 = vmatpush3.bf16.msra.mxu0 %v1486_v6  ;;  %v1495_v15 = vld [vmem:[%s2004_s1 + $0x98] sm:$0xff]   ;;  %v1499_v19 = vld [vmem:[%s2004_s1 + $0xa0] sm:$0xff]   ;;  %v1503_v23 = vld [vmem:[%s2004_s1 + $0xa8] sm:$0xff]  }
   0x9   :  { %1372 = vmatpush3.bf16.msra.mxu1 %v1487_v7  ;;  %1309 = vmatprep.subr.bf16.mxu0 %v1488_v8  ;;  %v1504_v24 = vld [vmem:[%s2004_s1 + $0x70] sm:$0xff]   ;;  %v1508_v28 = vld [vmem:[%s2004_s1 + $0x78] sm:$0xff]   ;;  %v1517_v35 = vld [vmem:[%s2005_s0 + $0xc] ss:$20 sps:$4 sm:$0xff]  }
   0xa   :  { %1373 = vmatprep.subr.bf16.mxu1 %v1489_v9  ;;  %v1505_v25 = vld [vmem:[%s2004_s1 + $0xf0] sm:$0xff]   ;;  %v1509_v29 = vld [vmem:[%s2004_s1 + $0xf8] sm:$0xff]   ;;  %v1518_v36 = vld [vmem:[%s2004_s1 + $0x100] sm:$0xff]   ;;  %708 = vmatprep.mubr.bf16.mxu1 %v1517_v35 }
   0xb   :  { %v1506_v26 = vld [vmem:[%s2004_s1 + $0x30] sm:$0xff]   ;;  %v1510_v30 = vld [vmem:[%s2004_s1 + $0x38] sm:$0xff]   ;;  %v1519_v37 = vld [vmem:[%s2005_s0 + $0x2c] ss:$20 sps:$4 sm:$0xff]  }
   0xc   :  { %1310 = vmatpush3.bf16.msra.mxu0 %v1490_v10  ;;  %v1507_v27 = vld [vmem:[%s2004_s1 + $0xb0] sm:$0xff]   ;;  %v1511_v31 = vld [vmem:[%s2004_s1 + $0xb8] sm:$0xff]   ;;  %v1531_v42 = vld [vmem:[%s2004_s1 + $0x108] sm:$0xff]  }
   0xd   :  { %1374 = vmatpush3.bf16.msra.mxu1 %v1491_v11  ;;  %1311 = vmatprep.subr.bf16.mxu0 %v1492_v12  ;;  %v1512_v32 = vld [vmem:[%s2005_s0] ss:$20 sps:$4 sm:$0xff]   ;;  %v1514_v33 = vld [vmem:[%s2005_s0 + $0x4] ss:$20 sps:$4 sm:$0xff]   ;;  %v1515_v34 = vld [vmem:[%s2005_s0 + $0x8] ss:$20 sps:$4 sm:$0xff]  }
   0xe   :  { %1375 = vmatprep.subr.bf16.mxu1 %v1493_v13  ;;  %611 = vmatprep.mubr.bf16.mxu0 %v1514_v33  ;;  %v1521_v38 = vld [vmem:[%s2005_s0 + $0x34] ss:$20 sps:$4 sm:$0xff]   ;;  %v1524_v40 = vld [vmem:[%s2005_s0 + $0x30] ss:$20 sps:$4 sm:$0xff]   ;;  %v1530_v45 = vld [vmem:[%s2005_s0 + $0x58] ss:$20 sps:$4 sm:$0xff]  }
   0xf   :  { %v1523_v39 = vld [vmem:[%s2005_s0 + $0x28] ss:$20 sps:$4 sm:$0xff]   ;;  %v1529_v44 = vld [vmem:[%s2005_s0 + $0x50] ss:$20 sps:$4 sm:$0xff]   ;;  %v1536_v50 = vld [vmem:[%s2005_s0 + $0x78] ss:$20 sps:$4 sm:$0xff]  }
  0x10   :  { %1312 = vmatpush3.bf16.msra.mxu0 %v1494_v14  ;;  %v1525_v41 = vld [vmem:[%s2005_s0 + $0x54] ss:$20 sps:$4 sm:$0xff]   ;;  %v1527_v43 = vld [vmem:[%s2005_s0 + $0x5c] ss:$20 sps:$4 sm:$0xff]   ;;  %v1534_v48 = vld [vmem:[%s2005_s0 + $0x84] ss:$20 sps:$4 sm:$0xff]  }
  0x11   :  { %1376 = vmatpush3.bf16.msra.mxu1 %v1495_v15  ;;  %1313 = vmatprep.subr.bf16.mxu0 %v1496_v16  ;;  %v1544_v46 = vld [vmem:[%s2004_s1 + $0x110] sm:$0xff]   ;;  %v1557_v49 = vld [vmem:[%s2004_s1 + $0x118] sm:$0xff]   ;;  %v1540_v53 = vld [vmem:[%s2005_s0 + $0xac] ss:$20 sps:$4 sm:$0xff]  }
  0x12   :  { %1377 = vmatprep.subr.bf16.mxu1 %v1497_v17  ;;  %v1532_v47 = vld [vmem:[%s2005_s0 + $0x7c] ss:$20 sps:$4 sm:$0xff]   ;;  %v1537_v51 = vld [vmem:[%s2005_s0 + $0x80] ss:$20 sps:$4 sm:$0xff]   ;;  %v1538_v52 = vld [vmem:[%s2005_s0 + $0xa4] ss:$20 sps:$4 sm:$0xff]  }
  0x13   :  { %v1542_v54 = vld [vmem:[%s2005_s0 + $0xa0] ss:$20 sps:$4 sm:$0xff]   ;;  %v1543_v55 = vld [vmem:[%s2005_s0 + $0xa8] ss:$20 sps:$4 sm:$0xff]   ;;  %v1550_v59 = vld [vmem:[%s2005_s0 + $0xd0] ss:$20 sps:$4 sm:$0xff]  }
  0x14   :  { %1314 = vmatpush3.bf16.msra.mxu0 %v1498_v18  ;;  %v1545_v56 = vld [vmem:[%s2005_s0 + $0xcc] ss:$20 sps:$4 sm:$0xff]   ;;  %v1547_v57 = vld [vmem:[%s2005_s0 + $0xd4] ss:$20 sps:$4 sm:$0xff]   ;;  %v1553_v61 = vld [vmem:[%s2005_s0 + $0xfc] ss:$20 sps:$4 sm:$0xff]  }
  0x15   :  { %1378 = vmatpush3.bf16.msra.mxu1 %v1499_v19  ;;  %1315 = vmatprep.subr.bf16.mxu0 %v1500_v20  ;;  %v1549_v58 = vld [vmem:[%s2005_s0 + $0xc8] ss:$20 sps:$4 sm:$0xff]   ;;  %v1555_v62 = vld [vmem:[%s2005_s0 + $0xf0] ss:$20 sps:$4 sm:$0xff]   ;;  %v1556_v63 = vld [vmem:[%s2005_s0 + $0xf8] ss:$20 sps:$4 sm:$0xff]  }
  0x16   :  { %1379 = vmatprep.subr.bf16.mxu1 %v1501_v21  ;;  %v1551_v60 = vld [vmem:[%s2005_s0 + $0xf4] ss:$20 sps:$4 sm:$0xff]   ;;  %v1558_v0 = vld [vmem:[%s2005_s0 + $0x11c] ss:$20 sps:$4 sm:$0xff]   ;;  %v1560_v1 = vld [vmem:[%s2005_s0 + $0x124] ss:$20 sps:$4 sm:$0xff]  }
  0x17   :  { %v1562_v2 = vld [vmem:[%s2005_s0 + $0x118] ss:$20 sps:$4 sm:$0xff]   ;;  %v1563_v3 = vld [vmem:[%s2005_s0 + $0x120] ss:$20 sps:$4 sm:$0xff]   ;;  %v1564_v4 = vld [vmem:[%s2005_s0 + $0x10] ss:$20 sps:$4 sm:$0xff]  }
  0x18   :  { %1316 = vmatpush3.bf16.msra.mxu0 %v1502_v22  ;;  %v1565_v5 = vld [vmem:[%s2005_s0 + $0xb0] ss:$20 sps:$4 sm:$0xff]   ;;  %v1566_v6 = vld [vmem:[%s2005_s0 + $0x38] ss:$20 sps:$4 sm:$0xff]   ;;  %v1568_v8 = vld [vmem:[%s2005_s0 + $0x60] ss:$20 sps:$4 sm:$0xff]  }
  0x19   :  { %1380 = vmatpush3.bf16.msra.mxu1 %v1503_v23  ;;  %1317 = vmatprep.subr.bf16.mxu0 %v1504_v24  ;;  %v1567_v7 = vld [vmem:[%s2005_s0 + $0xd8] ss:$20 sps:$4 sm:$0xff]   ;;  %v1569_v9 = vld [vmem:[%s2005_s0 + $0x100] ss:$20 sps:$4 sm:$0xff]   ;;  %v1570_v10 = vld [vmem:[%s2005_s0 + $0x88] ss:$20 sps:$4 sm:$0xff]  }
  0x1a   :  { %1381 = vmatprep.subr.bf16.mxu1 %v1505_v25  ;;  %v1571_v11 = vld [vmem:[%s2005_s0 + $0x128] ss:$20 sps:$4 sm:$0xff]   ;;  %s1574_s0 = smov 64  }
  0x1c   :  { %1318 = vmatpush3.bf16.msra.mxu0 %v1506_v26 }
  0x1d   :  { %1382 = vmatpush3.bf16.msra.mxu1 %v1507_v27  ;;  %1319 = vmatprep.subr.bf16.mxu0 %v1508_v28 }
  0x1e   :  { %1383 = vmatprep.subr.bf16.mxu1 %v1509_v29 }
  0x20   :  { %1320 = vmatpush3.bf16.msra.mxu0 %v1510_v30 }
  0x21   :  { %1384 = vmatpush3.bf16.msra.mxu1 %v1511_v31  ;;  %1445 = vmatprep.subr.bf16.mxu0 %v1518_v36 }
  0x22   :  { %1469 = vmatprep.subr.bf16.mxu1 %v1518_v36 }
  0x23   :  { %612 = vmatmul.mubr.bf16.vlgmr.msra.gmra.mrb[0].mxu0 %v1512_v32 }
  0x24   :  { %709 = vmatmul.mubr.bf16.vlgmr.msra.gmra.mrb[0].mxu1 %v1515_v34  ;;  %1446 = vmatpush3.bf16.msra.mxu0 %v1518_v36 }
  0x25   :  { %619 = vmatprep.mubr.bf16.mxu0 %v1519_v37  ;;  %716 = vmatprep.mubr.bf16.mxu1 %v1521_v38 }
  0x26   :  { %1473 = vmatpush3.bf16.msra.mxu1 %v1518_v36  ;;  %1447 = vmatprep.subr.bf16.mxu0 %v1531_v42 }
  0x27   :  { %1470 = vmatprep.subr.bf16.mxu1 %v1531_v42 }
  0x28   :  { %1448 = vmatpush3.bf16.msra.mxu0 %v1531_v42 }
  0x29   :  { %1449 = vmatprep.subr.bf16.mxu0 %v1544_v46 }
  0x2a   :  { %1474 = vmatpush3.bf16.msra.mxu1 %v1531_v42 }
  0x2b   :  { %620 = vmatmul.mubr.bf16.gmra.mrb[4].mxu0 %v1523_v39  ;;  %1471 = vmatprep.subr.bf16.mxu1 %v1544_v46 }
  0x2c   :  { %717 = vmatmul.mubr.bf16.gmra.mrb[4].mxu1 %v1524_v40  ;;  %627 = vmatprep.mubr.bf16.mxu0 %v1525_v41 }
  0x2d   :  { %724 = vmatprep.mubr.bf16.mxu1 %v1527_v43  ;;  %1450 = vmatpush3.bf16.msra.mxu0 %v1544_v46 }
  0x2e   :  { %1475 = vmatpush3.bf16.msra.mxu1 %v1544_v46  ;;  %1451 = vmatprep.subr.bf16.mxu0 %v1557_v49 }
  0x2f   :  { %1472 = vmatprep.subr.bf16.mxu1 %v1557_v49 }
  0x31   :  { %1452 = vmatpush3.bf16.msra.mxu0 %v1557_v49 }
  0x32   :  { %1476 = vmatpush3.bf16.msra.mxu1 %v1557_v49 }
  0x33   :  { %628 = vmatmul.mubr.bf16.gmra.mrb[8].mxu0 %v1529_v44 }
  0x34   :  { %725 = vmatmul.mubr.bf16.gmra.mrb[8].mxu1 %v1530_v45  ;;  %635 = vmatprep.mubr.bf16.mxu0 %v1532_v47 }
  0x35   :  { %732 = vmatprep.mubr.bf16.mxu1 %v1534_v48 }
  0x3b   :  { %636 = vmatmul.mubr.bf16.gmra.mrb[12].mxu0 %v1536_v50 }
  0x3c   :  { %733 = vmatmul.mubr.bf16.gmra.mrb[12].mxu1 %v1537_v51  ;;  %643 = vmatprep.mubr.bf16.mxu0 %v1538_v52 }
  0x3d   :  { %740 = vmatprep.mubr.bf16.mxu1 %v1540_v53 }
  0x43   :  { %644 = vmatmul.mubr.bf16.gmra.mrb[16].mxu0 %v1542_v54 }
  0x44   :  { %741 = vmatmul.mubr.bf16.gmra.mrb[16].mxu1 %v1543_v55  ;;  %651 = vmatprep.mubr.bf16.mxu0 %v1545_v56 }
  0x45   :  { %748 = vmatprep.mubr.bf16.mxu1 %v1547_v57 }
  0x4b   :  { %652 = vmatmul.mubr.bf16.gmra.mrb[20].mxu0 %v1549_v58 }
  0x4c   :  { %749 = vmatmul.mubr.bf16.gmra.mrb[20].mxu1 %v1550_v59  ;;  %659 = vmatprep.mubr.bf16.mxu0 %v1551_v60 }
  0x4d   :  { %756 = vmatprep.mubr.bf16.mxu1 %v1553_v61 }
  0x53   :  { %660 = vmatmul.mubr.bf16.gmra.mrb[24].mxu0 %v1555_v62 }
  0x54   :  { %757 = vmatmul.mubr.bf16.gmra.mrb[24].mxu1 %v1556_v63  ;;  %667 = vmatprep.mubr.bf16.mxu0 %v1558_v0 }
  0x55   :  { %764 = vmatprep.mubr.bf16.mxu1 %v1560_v1 }
  0x5b   :  { %668 = vmatmul.mubr.bf16.gmra.mrb[28].mxu0 %v1562_v2 }
  0x5c   :  { %765 = vmatmul.mubr.bf16.gmra.mrb[28].mxu1 %v1563_v3  ;;  %1453 = vmatprep.mubr.msk.bf16.mxu0 %vm554_vm0, %v1564_v4 }
  0x5d   :  { %1461 = vmatprep.mubr.msk.bf16.mxu1 %vm554_vm0, %v1565_v5 }
  0x63   :  { %1454 = vmatmul.mubr.msk.bf16.vlgmr.msra.gmra.mrb[32].mxu0 %vm554_vm0, %v1566_v6 }
  0x64   :  { %1462 = vmatmul.mubr.msk.bf16.vlgmr.msra.gmra.mrb[32].mxu1 %vm554_vm0, %v1567_v7  ;;  %1457 = vmatprep.mubr.msk.bf16.mxu0 %vm554_vm0, %v1568_v8 }
  0x65   :  { %1465 = vmatprep.mubr.msk.bf16.mxu1 %vm554_vm0, %v1569_v9 }
  0x6b   :  { %1458 = vmatmul.mubr.msk.bf16.gmra.mrb[36].mxu0 %vm554_vm0, %v1570_v10 }
  0x6c   :  { %1466 = vmatmul.mubr.msk.bf16.gmra.mrb[36].mxu1 %vm554_vm0, %v1571_v11 }
  0xf6   :  { %v1321_v12 = vpop.f32.mrb[0].mxu0 }
  0xf7   :  { %v1385_v13 = vpop.f32.mrb[0].mxu1  ;;  %v1322_v14 = vpop.f32.mrb[1].mxu0 }
  0xf8   :  { %v1323_v15 = vadd.f32 %v1322_v14, %v1321_v12  ;;  %v1386_v16 = vpop.f32.mrb[1].mxu1  ;;  %v1324_v17 = vpop.f32.mrb[2].mxu0 }
  0xf9   :  { %v1387_v18 = vadd.f32 %v1386_v16, %v1385_v13  ;;  %v1388_v19 = vpop.f32.mrb[2].mxu1  ;;  %v1325_v20 = vpop.f32.mrb[3].mxu0 }
  0xfa   :  { %v1326_v21 = vadd.f32 %v1325_v20, %v1324_v17  ;;  %v1389_v22 = vpop.f32.mrb[3].mxu1 }
  0xfb   :  { %v1390_v23 = vadd.f32 %v1389_v22, %v1388_v19  ;;  %v1838_v24 = vadd.f32 %v1387_v18, %v1323_v15 }
  0xfd   :  { %v1840_v25 = vadd.f32 %v1390_v23, %v1326_v21 }
  0xfe   :  { %v1327_v26 = vpop.f32.mrb[4].mxu0 }
  0xff   :  { %v1391_v27 = vpop.f32.mrb[4].mxu1  ;;  %v1328_v28 = vpop.f32.mrb[5].mxu0 }
 0x100   :  { %v1329_v29 = vadd.f32 %v1328_v28, %v1327_v26  ;;  %v1392_v30 = vpop.f32.mrb[5].mxu1  ;;  %v1330_v31 = vpop.f32.mrb[6].mxu0 }
 0x101   :  { %v1393_v32 = vadd.f32 %v1392_v30, %v1391_v27  ;;  %v1394_v33 = vpop.f32.mrb[6].mxu1  ;;  %v1331_v34 = vpop.f32.mrb[7].mxu0 }
 0x102   :  { %v1332_v35 = vadd.f32 %v1331_v34, %v1330_v31  ;;  %v1395_v36 = vpop.f32.mrb[7].mxu1 }
 0x103   :  { %v1396_v37 = vadd.f32 %v1395_v36, %v1394_v33  ;;  %v1842_v38 = vadd.f32 %v1393_v32, %v1329_v29 }
 0x105   :  { %v1844_v39 = vadd.f32 %v1396_v37, %v1332_v35 }
 0x106   :  { %v1333_v40 = vpop.f32.mrb[8].mxu0 }
 0x107   :  { %v1397_v41 = vpop.f32.mrb[8].mxu1  ;;  %v1334_v42 = vpop.f32.mrb[9].mxu0 }
 0x108   :  { %v1335_v43 = vadd.f32 %v1334_v42, %v1333_v40  ;;  %v1398_v44 = vpop.f32.mrb[9].mxu1  ;;  %v1336_v45 = vpop.f32.mrb[10].mxu0 }
 0x109   :  { %v1399_v46 = vadd.f32 %v1398_v44, %v1397_v41  ;;  %v1400_v47 = vpop.f32.mrb[10].mxu1  ;;  %v1337_v48 = vpop.f32.mrb[11].mxu0 }
 0x10a   :  { %v1338_v49 = vadd.f32 %v1337_v48, %v1336_v45  ;;  %v1401_v50 = vpop.f32.mrb[11].mxu1 }
 0x10b   :  { %v1402_v51 = vadd.f32 %v1401_v50, %v1400_v47  ;;  %v1846_v52 = vadd.f32 %v1399_v46, %v1335_v43 }
 0x10d   :  { %v1848_v53 = vadd.f32 %v1402_v51, %v1338_v49 }
 0x10e   :  { %v1339_v54 = vpop.f32.mrb[12].mxu0 }
 0x10f   :  { %v1403_v55 = vpop.f32.mrb[12].mxu1  ;;  %v1340_v56 = vpop.f32.mrb[13].mxu0 }
 0x110   :  { %v1341_v57 = vadd.f32 %v1340_v56, %v1339_v54  ;;  %v1404_v58 = vpop.f32.mrb[13].mxu1  ;;  %v1342_v59 = vpop.f32.mrb[14].mxu0 }
 0x111   :  { %v1405_v60 = vadd.f32 %v1404_v58, %v1403_v55  ;;  %v1406_v61 = vpop.f32.mrb[14].mxu1  ;;  %v1343_v62 = vpop.f32.mrb[15].mxu0 }
 0x112   :  { %v1344_v63 = vadd.f32 %v1343_v62, %v1342_v59  ;;  %v1407_v0 = vpop.f32.mrb[15].mxu1 }
 0x113   :  { %v1408_v1 = vadd.f32 %v1407_v0, %v1406_v61  ;;  %v1850_v2 = vadd.f32 %v1405_v60, %v1341_v57 }
 0x115   :  { %v1852_v3 = vadd.f32 %v1408_v1, %v1344_v63 }
 0x116   :  { %v1345_v4 = vpop.f32.mrb[16].mxu0 }
 0x117   :  { %v1409_v5 = vpop.f32.mrb[16].mxu1  ;;  %v1346_v6 = vpop.f32.mrb[17].mxu0 }
 0x118   :  { %v1347_v7 = vadd.f32 %v1346_v6, %v1345_v4  ;;  %v1410_v8 = vpop.f32.mrb[17].mxu1  ;;  %v1348_v9 = vpop.f32.mrb[18].mxu0 }
 0x119   :  { %v1411_v10 = vadd.f32 %v1410_v8, %v1409_v5  ;;  %v1412_v11 = vpop.f32.mrb[18].mxu1  ;;  %v1349_v12 = vpop.f32.mrb[19].mxu0 }
 0x11a   :  { %v1350_v13 = vadd.f32 %v1349_v12, %v1348_v9  ;;  %v1413_v14 = vpop.f32.mrb[19].mxu1 }
 0x11b   :  { %v1414_v15 = vadd.f32 %v1413_v14, %v1412_v11  ;;  %v743_v16 = vadd.f32 %v1411_v10, %v1347_v7 }
 0x11d   :  { %v746_v17 = vadd.f32 %v1414_v15, %v1350_v13 }
 0x11e   :  { %v1351_v18 = vpop.f32.mrb[20].mxu0 }
 0x11f   :  { %v1415_v19 = vpop.f32.mrb[20].mxu1  ;;  %v1352_v20 = vpop.f32.mrb[21].mxu0 }
 0x120   :  { %v1353_v21 = vadd.f32 %v1352_v20, %v1351_v18  ;;  %v1416_v22 = vpop.f32.mrb[21].mxu1  ;;  %v1354_v23 = vpop.f32.mrb[22].mxu0 }
 0x121   :  { %v1417_v26 = vadd.f32 %v1416_v22, %v1415_v19  ;;  %v1418_v27 = vpop.f32.mrb[22].mxu1  ;;  %v1355_v28 = vpop.f32.mrb[23].mxu0 }
 0x122   :  { %v1356_v29 = vadd.f32 %v1355_v28, %v1354_v23  ;;  %v1419_v30 = vpop.f32.mrb[23].mxu1 }
 0x123   :  { %v1420_v31 = vadd.f32 %v1419_v30, %v1418_v27  ;;  %v751_v32 = vadd.f32 %v1417_v26, %v1353_v21 }
 0x125   :  { %v754_v33 = vadd.f32 %v1420_v31, %v1356_v29 }
 0x126   :  { %v1357_v34 = vpop.f32.mrb[24].mxu0 }
 0x127   :  { %v1421_v35 = vpop.f32.mrb[24].mxu1  ;;  %v1358_v36 = vpop.f32.mrb[25].mxu0 }
 0x128   :  { %v1359_v37 = vadd.f32 %v1358_v36, %v1357_v34  ;;  %v1422_v40 = vpop.f32.mrb[25].mxu1  ;;  %v1360_v41 = vpop.f32.mrb[26].mxu0 }
 0x129   :  { %v1423_v42 = vadd.f32 %v1422_v40, %v1421_v35  ;;  %v1424_v43 = vpop.f32.mrb[26].mxu1  ;;  %v1361_v44 = vpop.f32.mrb[27].mxu0 }
 0x12a   :  { %v1362_v45 = vadd.f32 %v1361_v44, %v1360_v41  ;;  %v1425_v46 = vpop.f32.mrb[27].mxu1 }
 0x12b   :  { %v1426_v47 = vadd.f32 %v1425_v46, %v1424_v43  ;;  %v759_v48 = vadd.f32 %v1423_v42, %v1359_v37 }
 0x12d   :  { %v762_v49 = vadd.f32 %v1426_v47, %v1362_v45 }
 0x12e   :  { %v1363_v50 = vpop.f32.mrb[28].mxu0 }
 0x12f   :  { %v1427_v51 = vpop.f32.mrb[28].mxu1  ;;  %v1364_v54 = vpop.f32.mrb[29].mxu0 }
 0x130   :  { %v1365_v55 = vadd.f32 %v1364_v54, %v1363_v50  ;;  %v1428_v56 = vpop.f32.mrb[29].mxu1  ;;  %v1366_v57 = vpop.f32.mrb[30].mxu0 }
 0x131   :  { %v1429_v58 = vadd.f32 %v1428_v56, %v1427_v51  ;;  %v1430_v59 = vpop.f32.mrb[30].mxu1  ;;  %v1367_v60 = vpop.f32.mrb[31].mxu0 }
 0x132   :  { %v1368_v61 = vadd.f32 %v1367_v60, %v1366_v57  ;;  %v1431_v62 = vpop.f32.mrb[31].mxu1 }
 0x133   :  { %v1432_v63 = vadd.f32 %v1431_v62, %v1430_v59  ;;  %v767_v0 = vadd.f32 %v1429_v58, %v1365_v55 }
 0x135   :  { %v770_v1 = vadd.f32 %v1432_v63, %v1368_v61 }
 0x136   :  { %v1455_v4 = vpop.f32.mrb[32].mxu0 }
 0x137   :  { %v1855_v5 = vadd.f32 %v1455_v4, %v1842_v38  ;;  %v1463_v6 = vpop.f32.mrb[32].mxu1  ;;  %v807_v7 = vpop.f32.mrb[33].mxu0 }
 0x138   :  { %v1857_v8 = vadd.f32 %v1463_v6, %v751_v32  ;;  %v1860_v9 = vadd.f32 %v807_v7, %v1838_v24  ;;  %v839_v10 = vpop.f32.mrb[33].mxu1  ;;  %v1456_v11 = vpop.f32.mrb[34].mxu0 }
 0x139   :  { %v1862_v12 = vadd.f32 %v839_v10, %v743_v16  ;;  %v1865_v13 = vadd.f32 %v1456_v11, %v1844_v39  ;;  %v1464_v14 = vpop.f32.mrb[34].mxu1  ;;  %v810_v15 = vpop.f32.mrb[35].mxu0  ;;  %v893_v21 = vmul.f32 %v1855_v5, %v1855_v5 }
 0x13a   :  { %v1867_v18 = vadd.f32 %v1464_v14, %v754_v33  ;;  %v1870_v38 = vadd.f32 %v810_v15, %v1840_v25  ;;  %v842_v19 = vpop.f32.mrb[35].mxu1  ;;  %v891_v24 = vmul.f32 %v1860_v9, %v1860_v9  ;;  %v901_v61 = vmul.f32 %v1857_v8, %v1857_v8 }
 0x13b   :  { %v1872_v20 = vadd.f32 %v842_v19, %v746_v17  ;;  %v894_v17 = vmul.f32 %v1865_v13, %v1865_v13 }
 0x13c   :  { %v870_v16 = vadd.f32 %v1870_v38, %v1860_v9  ;;  %v892_v39 = vmul.f32 %v1870_v38, %v1870_v38 }
 0x13d   :  { %v900_v58 = vmul.f32 %v1872_v20, %v1872_v20 }
 0x13e   :  { %v871_v22 = vadd.f32 %v870_v16, %v1855_v5  ;;  %v907_v23 = vadd.f32 %v892_v39, %v891_v24  ;;  %v1459_v25 = vpop.f32.mrb[36].mxu0 }
 0x13f   :  { %v1886_v26 = vadd.f32 %v1459_v25, %v1850_v2  ;;  %v1467_v27 = vpop.f32.mrb[36].mxu1  ;;  %v823_v28 = vpop.f32.mrb[37].mxu0 }
 0x140   :  { %v908_v29 = vadd.f32 %v907_v23, %v893_v21  ;;  %v1888_v30 = vadd.f32 %v1467_v27, %v767_v0  ;;  %v1891_v31 = vadd.f32 %v823_v28, %v1846_v52  ;;  %v872_v32 = vadd.f32 %v871_v22, %v1865_v13  ;;  %v855_v33 = vpop.f32.mrb[37].mxu1  ;;  %v1460_v34 = vpop.f32.mrb[38].mxu0 }
 0x141   :  { %v1894_v35 = vadd.f32 %v855_v33, %v759_v48  ;;  %v1897_v36 = vadd.f32 %v1460_v34, %v1852_v3  ;;  %v1468_v37 = vpop.f32.mrb[38].mxu1  ;;  %v826_v2 = vpop.f32.mrb[39].mxu0  ;;  %v897_v48 = vmul.f32 %v1886_v26, %v1886_v26  ;;  %v902_v0 = vmul.f32 %v1867_v18, %v1867_v18 }
 0x142   :  { %v873_v40 = vadd.f32 %v872_v32, %v1891_v31  ;;  %v895_v41 = vmul.f32 %v1891_v31, %v1891_v31  ;;  %v909_v42 = vadd.f32 %v908_v29, %v894_v17  ;;  %v858_v43 = vpop.f32.mrb[39].mxu1  ;;  %v1902_v52 = vadd.f32 %v1468_v37, %v770_v1 }
 0x143   :  { %v1905_v44 = vadd.f32 %v826_v2, %v1848_v53  ;;  %v1907_v46 = vadd.f32 %v858_v43, %v762_v49  ;;  %v898_v54 = vmul.f32 %v1897_v36, %v1897_v36  ;;  %v899_v49 = vmul.f32 %v1862_v12, %v1862_v12 }
 0x144   :  { %v910_v45 = vadd.f32 %v909_v42, %v895_v41  ;;  %v903_v6 = vmul.f32 %v1894_v35, %v1894_v35  ;;  %v905_v19 = vmul.f32 %v1888_v30, %v1888_v30  ;;  %v906_v39 = vmul.f32 %v1902_v52, %v1902_v52 }
 0x145   :  { %v874_v3 = vadd.f32 %v873_v40, %v1905_v44  ;;  %v896_v47 = vmul.f32 %v1905_v44, %v1905_v44  ;;  %v904_v14 = vmul.f32 %v1907_v46, %v1907_v46 }
 0x147   :  { %v875_v50 = vadd.f32 %v874_v3, %v1886_v26  ;;  %v911_v51 = vadd.f32 %v910_v45, %v896_v47 }
 0x149   :  { %v876_v53 = vadd.f32 %v875_v50, %v1897_v36  ;;  %v912_v55 = vadd.f32 %v911_v51, %v897_v48 }
 0x14b   :  { %v877_v56 = vadd.f32 %v876_v53, %v1862_v12  ;;  %v913_v57 = vadd.f32 %v912_v55, %v898_v54 }
 0x14d   :  { %v914_v59 = vadd.f32 %v913_v57, %v899_v49  ;;  %v878_v60 = vadd.f32 %v877_v56, %v1872_v20 }
 0x14f   :  { %v879_v62 = vadd.f32 %v878_v60, %v1857_v8  ;;  %v915_v63 = vadd.f32 %v914_v59, %v900_v58 }
 0x151   :  { %v880_v1 = vadd.f32 %v879_v62, %v1867_v18  ;;  %v916_v4 = vadd.f32 %v915_v63, %v901_v61  ;;  %v967_v62 = vlaneseq }
 0x153   :  { %v881_v7 = vadd.f32 %v880_v1, %v1894_v35  ;;  %v917_v10 = vadd.f32 %v916_v4, %v902_v0  ;;  %v968_v63 = vshrl.u32 %v967_v62, 7  ;;  %v959_v0 = vld [vmem:[%s2006_s2] sm:$0x1] }
 0x155   :  { %v882_v11 = vadd.f32 %v881_v7, %v1907_v46  ;;  %v918_v15 = vadd.f32 %v917_v10, %v903_v6  ;;  %v969_v1 = vsub.s32 0, %v968_v63  ;;  %v963_v7 = vld [vmem:[%s2007_s3] sm:$0x1] }
 0x157   :  { %v883_v24 = vadd.f32 %v882_v11, %v1888_v30  ;;  %v919_v16 = vadd.f32 %v918_v15, %v904_v14 }
 0x159   :  { %v884_v21 = vadd.f32 %v883_v24, %v1902_v52  ;;  %v920_v22 = vadd.f32 %v919_v16, %v905_v19 }
 0x15b   :  { %v885_v23 = vrot.slane %v884_v21, 4  ;;  %v921_v25 = vadd.f32 %v920_v22, %v906_v39 }
 0x15d   :  { %v886_v17 = vadd.f32 %v885_v23, %v884_v21  ;;  %v922_v27 = vrot.slane %v921_v25, 4 }
 0x15f   :  { %v887_v28 = vrot.slane %v886_v17, 2  ;;  %v923_v29 = vadd.f32 %v922_v27, %v921_v25 }
 0x161   :  { %v888_v32 = vadd.f32 %v887_v28, %v886_v17  ;;  %v924_v33 = vrot.slane %v923_v29, 2 }
 0x163   :  { %v889_v34 = vrot.slane %v888_v32, 1  ;;  %v925_v37 = vadd.f32 %v924_v33, %v923_v29 }
 0x165   :  { %v890_v2 = vadd.f32 %v889_v34, %v888_v32  ;;  %v926_v40 = vrot.slane %v925_v37, 1 }
 0x167   :  { %938 = vrot.lane.b32.xlu1 %v890_v2, %s1574_s0  ;;  %929 = vrot.lane.b32.xlu0 %v890_v2, %s1575_s9  ;;  %v927_v41 = vadd.f32 %v926_v40, %v925_v37 }
 0x16b   :  { %942 = vrot.lane.b32.xlu1 %v927_v41, %s1574_s0  ;;  %934 = vrot.lane.b32.xlu0 %v927_v41, %s1575_s9 }
 0x16f   :  { %950 = vrot.lane.b32.xlu1 %v927_v41, %s1576_s10  ;;  %946 = vrot.lane.b32.xlu0 %v890_v2, %s1576_s10 }
 0x1d9   :  { %v939_v42 = vpop.permute.xlu1 %938  ;;  %v930_v43 = vpop.permute.xlu0 %929 }
 0x1da   :  { %v932_v45 = vadd.f32 %v930_v43, %v890_v2 }
 0x1dc   :  { %v941_v51 = vadd.f32 %v939_v42, %v932_v45 }
 0x1dd   :  { %v943_v3 = vpop.permute.xlu1 %942  ;;  %v935_v47 = vpop.permute.xlu0 %934 }
 0x1de   :  { %v937_v48 = vadd.f32 %v935_v47, %v927_v41 }
 0x1e0   :  { %v945_v50 = vadd.f32 %v943_v3, %v937_v48 }
 0x1e1   :  { %v951_v54 = vpop.permute.xlu1 %950  ;;  %v947_v53 = vpop.permute.xlu0 %946 }
 0x1e2   :  { %v953_v55 = vadd.f32 %v951_v54, %v945_v50  ;;  %v949_v49 = vadd.f32 %v947_v53, %v941_v51 }
 0x1e4   :  { %v954_v56 = vmul.f32 0.001953125, %v949_v49  ;;  %v955_v57 = vmul.f32 0.001953125, %v953_v55 }
 0x1e6   :  { %v956_v58 = vmul.f32 %v954_v56, %v954_v56 }
 0x1e8   :  { %v957_v59 = vsub.f32 %v955_v57, %v956_v58 }
 0x1ea   :  { %v958_v60 = vmax.f32 %v957_v59, 0.0 }
 0x1ec   :  { %v960_v61 = vadd.f32 1e-05, %v958_v60 }
 0x1ee   :  { %1572 = vrsqrt.f32 %v960_v61 }
 0x1f8   :  { %v1573_v4 = vpop.eup %1572 }
 0x1f9   :  { %v962_v6 = vmul.f32 %v1573_v4, %v959_v0 }
 0x1fb   :  { %v964_v10 = vmul.f32 %v962_v6, %v954_v56  ;;  %v970_v11 = vrot.slane %v962_v6, %v969_v1 }
 0x1fd   :  { %v965_v14 = vsub.f32 %v963_v7, %v964_v10  ;;  %974 = vrot.lane.b32.xlu1 %v970_v11, %s1574_s0  ;;  %971 = vrot.lane.b32.xlu0 %v970_v11, %s1576_s10 }
 0x1ff   :  { %v989_v15 = vrot.slane %v965_v14, %v969_v1 }
 0x201   :  { %977 = vrot.lane.b32.xlu0 %v970_v11, %s1575_s9  ;;  %990 = vrot.lane.b32.xlu1 %v989_v15, %s1576_s10 }
 0x205   :  { %993 = vrot.lane.b32.xlu0 %v989_v15, %s1574_s0  ;;  %996 = vrot.lane.b32.xlu1 %v989_v15, %s1575_s9 }
 0x26f   :  { %v975_v19 = vpop.permute.xlu1 %974  ;;  %v972_v24 = vpop.permute.xlu0 %971 }
 0x270   :  { %v981_v16 = vsel %vm980_vm1, %v962_v6, %v972_v24 }
 0x271   :  { %v982_v39 = vsel %vm554_vm0, %v981_v16, %v975_v19 }
 0x273   :  { %v978_v21 = vpop.permute.xlu0 %977  ;;  %v991_v22 = vpop.permute.xlu1 %990 }
 0x274   :  { %v984_v23 = vsel %vm983_vm2, %v982_v39, %v978_v21  ;;  %v999_v33 = vsel %vm980_vm1, %v965_v14, %v991_v22 }
 0x275   :  { %v1005_v25 = vrot.slane %v984_v23, %v969_v1 }
 0x277   :  { %v994_v17 = vpop.permute.xlu0 %993  ;;  %v997_v27 = vpop.permute.xlu1 %996  ;;  %v1006_v28 = vmul.f32 %v1005_v25, %v1860_v9  ;;  %v1007_v29 = vmul.f32 %v1005_v25, %v1870_v38  ;;  %v1008_v32 = vmul.f32 %v1005_v25, %v1855_v5  ;;  %v1009_v34 = vmul.f32 %v1005_v25, %v1865_v13 }
 0x278   :  { %v1010_v37 = vmul.f32 %v1005_v25, %v1891_v31  ;;  %v1011_v2 = vmul.f32 %v1005_v25, %v1905_v44  ;;  %v1000_v40 = vsel %vm554_vm0, %v999_v33, %v994_v17  ;;  %v1012_v41 = vmul.f32 %v1005_v25, %v1886_v26 }
 0x279   :  { %v1013_v42 = vmul.f32 %v1005_v25, %v1897_v36  ;;  %v1014_v43 = vmul.f32 %v1005_v25, %v1862_v12  ;;  %v1001_v9 = vsel %vm983_vm2, %v1000_v40, %v997_v27  ;;  %v1015_v38 = vmul.f32 %v1005_v25, %v1872_v20 }
 0x27a   :  { %v1016_v5 = vmul.f32 %v1005_v25, %v1857_v8  ;;  %v1017_v13 = vmul.f32 %v1005_v25, %v1867_v18  ;;  %v1025_v45 = vrot.slane %v1001_v9, %v969_v1  ;;  %v1018_v31 = vmul.f32 %v1005_v25, %v1894_v35 }
 0x27b   :  { %v1019_v44 = vmul.f32 %v1005_v25, %v1907_v46  ;;  %v1020_v3 = vmul.f32 %v1005_v25, %v1888_v30  ;;  %v1021_v26 = vmul.f32 %v1005_v25, %v1902_v52 }
 0x27c   :  { %v1026_v36 = vadd.f32 %v1025_v45, %v1006_v28  ;;  %v1027_v47 = vadd.f32 %v1025_v45, %v1007_v29  ;;  %v1028_v12 = vadd.f32 %v1025_v45, %v1008_v32  ;;  %v1029_v48 = vadd.f32 %v1025_v45, %v1009_v34 }
 0x27d   :  { %v1030_v50 = vadd.f32 %v1025_v45, %v1010_v37  ;;  %v1031_v51 = vadd.f32 %v1025_v45, %v1011_v2  ;;  %v1032_v20 = vadd.f32 %v1025_v45, %v1012_v41  ;;  %v1033_v54 = vadd.f32 %v1025_v45, %v1013_v42 }
 0x27e   :  { %v1034_v8 = vadd.f32 %v1025_v45, %v1014_v43  ;;  %v1035_v53 = vadd.f32 %v1025_v45, %v1015_v38  ;;  %v1036_v18 = vadd.f32 %v1025_v45, %v1016_v5  ;;  %v1037_v55 = vadd.f32 %v1025_v45, %v1017_v13 }
 0x27f   :  { %v1038_v49 = vadd.f32 %v1025_v45, %v1018_v31  ;;  %v1039_v35 = vadd.f32 %v1025_v45, %v1019_v44  ;;  %v1040_v56 = vadd.f32 %v1025_v45, %v1020_v3  ;;  %v1041_v46 = vadd.f32 %v1025_v45, %v1021_v26 }
 0x280   :  { %v1042_v57 = vmax.f32 %v1026_v36, 0.0  ;;  %v1043_v30 = vmax.f32 %v1027_v47, 0.0  ;;  %v1044_v58 = vmax.f32 %v1028_v12, 0.0  ;;  %v1045_v52 = vmax.f32 %v1029_v48, 0.0 }
 0x281   :  { %v1046_v59 = vmax.f32 %v1030_v50, 0.0  ;;  %v1047_v60 = vmax.f32 %v1031_v51, 0.0  ;;  %v1048_v61 = vmax.f32 %v1032_v20, 0.0  ;;  %v1049_v62 = vmax.f32 %v1033_v54, 0.0 }
 0x282   :  { %v1050_v63 = vmax.f32 %v1034_v8, 0.0  ;;  %v1051_v0 = vmax.f32 %v1035_v53, 0.0  ;;  %v1052_v1 = vmax.f32 %v1036_v18, 0.0  ;;  %v1053_v4 = vmax.f32 %v1037_v55, 0.0 }
 0x283   :  { %v1054_v6 = vmax.f32 %v1038_v49, 0.0  ;;  %v1055_v7 = vmax.f32 %v1039_v35, 0.0  ;;  %v1056_v10 = vmax.f32 %v1040_v56, 0.0  ;;  %v1057_v11 = vmax.f32 %v1041_v46, 0.0 }
 0x284   :  { %v1261_v14 = vpack.c.bf16 %v1043_v30, %v1042_v57  ;;  %v1266_v15 = vpack.c.bf16 %v1045_v52, %v1044_v58  ;;  %v1271_v19 = vpack.c.bf16 %v1047_v60, %v1046_v59  ;;  %v1276_v24 = vpack.c.bf16 %v1049_v62, %v1048_v61 }
 0x285   :  { %v1281_v16 = vpack.c.bf16 %v1051_v0, %v1050_v63  ;;  %v1286_v39 = vpack.c.bf16 %v1053_v4, %v1052_v1  ;;  %v1291_v21 = vpack.c.bf16 %v1055_v7, %v1054_v6  ;;  %v1296_v22 = vpack.c.bf16 %v1057_v11, %v1056_v10 }
 0x286   :  { %1262 = vst [vmem:[%s2008_s4] sm:$0xff] %v1261_v14   ;;  %1298 = vst [vmem:[%s2008_s4 + $0x8] sm:$0xff] %v1266_v15  }
 0x287   :  { %1299 = vst [vmem:[%s2008_s4 + $0x10] sm:$0xff] %v1271_v19   ;;  %1300 = vst [vmem:[%s2008_s4 + $0x18] sm:$0xff] %v1276_v24  }
 0x288   :  { %1301 = vst [vmem:[%s2008_s4 + $0x20] sm:$0xff] %v1281_v16   ;;  %1302 = vst [vmem:[%s2008_s4 + $0x28] sm:$0xff] %v1286_v39  }
 0x289   :  { %1303 = vst [vmem:[%s2008_s4 + $0x30] sm:$0xff] %v1291_v21   ;;  %1304 = vst [vmem:[%s2008_s4 + $0x38] sm:$0xff] %v1296_v22  }

// kernel: tile.18
= control target key start
LH: loop header
LB: loop body
LE: loop exit
PB: predicated region body
PF: predicated region fallthrough
CT: control target
= control target key end

     0   :  { %s22_s0 = inlined_call_operand.vmem [shape: f32[32], index: 0, kind: input, shape index: {}]   ;;  %s23_s1 = inlined_call_operand.vmem [shape: f32[4,32], index: 1, kind: output, shape index: {}]  }
   0x1   :  { %v4_v0 = vld [vmem:[%s22_s0] ss:$0 sm:$0xff] }
   0x2   :  { %5 = vst [vmem:[%s23_s1] sm:$0xf] %v4_v0 }

// kernel: tile.19
= control target key start
LH: loop header
LB: loop body
LE: loop exit
PB: predicated region body
PF: predicated region fallthrough
CT: control target
= control target key end

     0   :  { %vm7_vm0 = vcmask 261120   ;;  %s37_s8 = smov 32   ;;  %s38_s9 = smov 64   ;;  %vm13_vm1 = vcmask 1048320   ;;  %vm19_vm2 = vcmask 785920   ;;  %vm25_vm3 = vcmask 523520   ;;  %s55_s0 = inlined_call_operand.vmem [shape: f32[4,32], index: 0, kind: input, shape index: {}]   ;;  %s56_s1 = inlined_call_operand.vmem [shape: f32[1,128], index: 1, kind: output, shape index: {}]  }
   0x1   :  { %v4_v0 = vld [vmem:[%s55_s0] sm:$0xf]  ;;  %s36_s0 = smov 96  }
   0x2   :  { %5 = vst [vmem:[#allocation1] sm:$0xf] %v4_v0 }
   0x9   :  { %v10_v1 = vld [vmem:[#allocation1 + $0x3] sm:$0x1]   ;;  %v22_v2 = vld [vmem:[#allocation1 + $0x1] sm:$0x1]   ;;  %v6_v3 = vld [vmem:[#allocation1] sm:$0x1]  }
   0xa   :  { %11 = vrot.lane.b32.xlu0 %v10_v1, %s36_s0  ;;  %23 = vrot.lane.b32.xlu1 %v22_v2, %s37_s8  ;;  %v16_v4 = vld [vmem:[#allocation1 + $0x2] sm:$0x1]   ;;  %8 = vst.msk [vmem:[#allocation0] sm:$0x1] %vm7_vm0, %v6_v3  }
   0xe   :  { %17 = vrot.lane.b32.xlu0 %v16_v4, %s38_s9 }
  0x7c   :  { %v12_v5 = vpop.permute.xlu0 %11   ;;  %v24_v6 = vpop.permute.xlu1 %23  }
  0x7d   :  { %14 = vst.msk [vmem:[#allocation0] sm:$0x1] %vm13_vm1, %v12_v5  }
  0x80   :  { %v18_v7 = vpop.permute.xlu0 %17  }
  0x81   :  { %20 = vst.msk [vmem:[#allocation0] sm:$0x1] %vm19_vm2, %v18_v7  }
  0x82   :  { %26 = vst.msk [vmem:[#allocation0] sm:$0x1] %vm25_vm3, %v24_v6  }
  0x89   :  { %v30_v8 = vld [vmem:[#allocation0] sm:$0x1] }
  0x8a   :  { %32 = vst [vmem:[%s56_s1] sm:$0x1] %v30_v8 }

// kernel: forward.10
= control target key start
LH: loop header
LB: loop body
LE: loop exit
PB: predicated region body
PF: predicated region fallthrough
CT: control target
= control target key end

     0   :  { %s851_s12 = smov 0   ;;  %s985_s0 = inlined_call_operand.vmem [shape: bf16[512,128], index: 0, kind: input, shape index: {}]   ;;  %s986_s1 = inlined_call_operand.vmem [shape: f32[1,128], index: 1, kind: input, shape index: {}]   ;;  %s987_s2 = inlined_call_operand.vmem [shape: f32[1,128], index: 2, kind: input, shape index: {}]   ;;  %s988_s3 = inlined_call_operand.vmem [shape: bf16[512,128], index: 3, kind: output, shape index: {}]  }
   0x1 LB: > { %s564_s13 = sadd.s32 4294967295, %s829_s12   ;;  %p568_p0 = scmp.ge.s32.totalorder %s829_s12, 1  ;;  %s829_s12 = sphi %s851_s12, %s13_s12  }
   0x2   : > { %p138_p1 = scmp.lt.s32.totalorder %s829_s12, 3 }
   0x4   : > { %p139_p2 = pnand %p568_p0, %p138_p1 }
   0x5   : > { %s569_s14 = sshll.u32 (!%p139_p2), %s564_s13, 5  ;;  %v872_v0 = vld [vmem:[%s986_s1] ss:$0 sm:$0xff] (!%p139_p2) }
   0x6   : > { %142 = sbr.rel (%p139_p2) target bundleno = 59 (0x3b), region = 32  ;;  %p163_p3 = scmp.lt.s32.totalorder (!%p139_p2), %s569_s14, 63  ;;  %v881_v9 = vld [vmem:[%s987_s2] ss:$0 sm:$0xff] (!%p139_p2) }
   0xd   : > { %s990_s14 = smov (!%p163_p3, %s569_s14), 63 }
   0xe   : > { %s570_s15 = sshll.u32 %s990_s14, 2 }
   0xf   : > { %s867_s18 = scalar_lea.vmem %s985_s0, %s570_s15  ;;  %s906_s25 = scalar_lea.vmem %s988_s3, %s570_s15 }
  0x10   : > { %v642_v1 = vld [vmem:[%s867_s18] sm:$0xff]   ;;  %v785_v2 = vld [vmem:[%s867_s18 + $0x8] sm:$0xff]   ;;  %v786_v3 = vld [vmem:[%s867_s18 + $0x10] sm:$0xff]  }
  0x11   : > { %v643_v4 = vunpack.c.l.bf16 %v642_v1  ;;  %v644_v5 = vunpack.c.h.bf16 %v642_v1  ;;  %v647_v6 = vunpack.c.l.bf16 %v785_v2  ;;  %v648_v7 = vunpack.c.h.bf16 %v785_v2  ;;  %v787_v8 = vld [vmem:[%s867_s18 + $0x18] sm:$0xff]   ;;  %v788_v30 = vld [vmem:[%s867_s18 + $0x20] sm:$0xff]   ;;  %v789_v35 = vld [vmem:[%s867_s18 + $0x28] sm:$0xff]  }
  0x12   : > { %v651_v10 = vunpack.c.l.bf16 %v786_v3  ;;  %v652_v11 = vunpack.c.h.bf16 %v786_v3  ;;  %v655_v12 = vunpack.c.l.bf16 %v787_v8  ;;  %v656_v13 = vunpack.c.h.bf16 %v787_v8  ;;  %v790_v40 = vld [vmem:[%s867_s18 + $0x30] sm:$0xff]   ;;  %v791_v45 = vld [vmem:[%s867_s18 + $0x38] sm:$0xff]   ;;  %v792_v3 = vld [vmem:[%s867_s18 + $0x40] sm:$0xff]  }
  0x13   : > { %v245_v14 = vmul.f32 %v643_v4, %v872_v0  ;;  %v246_v15 = vmul.f32 %v644_v5, %v872_v0  ;;  %v247_v16 = vmul.f32 %v647_v6, %v872_v0  ;;  %v248_v17 = vmul.f32 %v648_v7, %v872_v0 }
  0x14   : > { %v249_v18 = vmul.f32 %v651_v10, %v872_v0  ;;  %v250_v19 = vmul.f32 %v652_v11, %v872_v0  ;;  %v251_v20 = vmul.f32 %v655_v12, %v872_v0  ;;  %v252_v21 = vmul.f32 %v656_v13, %v872_v0  ;;  %v793_v13 = vld [vmem:[%s867_s18 + $0x48] sm:$0xff]  }
  0x15   : > { %v284_v22 = vadd.f32 %v881_v9, %v245_v14  ;;  %v285_v23 = vadd.f32 %v881_v9, %v246_v15  ;;  %v286_v24 = vadd.f32 %v881_v9, %v247_v16  ;;  %v287_v25 = vadd.f32 %v881_v9, %v248_v17 }
  0x16   : > { %v288_v26 = vadd.f32 %v881_v9, %v249_v18  ;;  %v289_v27 = vadd.f32 %v881_v9, %v250_v19  ;;  %v290_v28 = vadd.f32 %v881_v9, %v251_v20  ;;  %v291_v29 = vadd.f32 %v881_v9, %v252_v21  ;;  %v794_v18 = vld [vmem:[%s867_s18 + $0x50] sm:$0xff]  }
  0x17   : > { %v316_v31 = vmax.f32 %v284_v22, 0.0  ;;  %v317_v32 = vmax.f32 %v285_v23, 0.0  ;;  %v318_v33 = vmax.f32 %v286_v24, 0.0  ;;  %v319_v34 = vmax.f32 %v287_v25, 0.0  ;;  %v795_v23 = vld [vmem:[%s867_s18 + $0x58] sm:$0xff]  }
  0x18   : > { %v320_v36 = vmax.f32 %v288_v26, 0.0  ;;  %v321_v37 = vmax.f32 %v289_v27, 0.0  ;;  %v322_v38 = vmax.f32 %v290_v28, 0.0  ;;  %v323_v39 = vmax.f32 %v291_v29, 0.0 }
  0x19   : > { %v708_v41 = vpack.c.bf16 %v317_v32, %v316_v31  ;;  %v713_v42 = vpack.c.bf16 %v319_v34, %v318_v33  ;;  %v659_v43 = vunpack.c.l.bf16 %v788_v30  ;;  %v660_v44 = vunpack.c.h.bf16 %v788_v30 }
  0x1a   : > { %v718_v46 = vpack.c.bf16 %v321_v37, %v320_v36  ;;  %v723_v47 = vpack.c.bf16 %v323_v39, %v322_v38  ;;  %v663_v48 = vunpack.c.l.bf16 %v789_v35  ;;  %v664_v49 = vunpack.c.h.bf16 %v789_v35 }
  0x1b   : > { %709 = vst [vmem:[%s906_s25] sm:$0xff] %v708_v41   ;;  %800 = vst [vmem:[%s906_s25 + $0x8] sm:$0xff] %v713_v42   ;;  %v253_v50 = vmul.f32 %v659_v43, %v872_v0  ;;  %v254_v51 = vmul.f32 %v660_v44, %v872_v0  ;;  %v667_v52 = vunpack.c.l.bf16 %v790_v40  ;;  %v668_v53 = vunpack.c.h.bf16 %v790_v40  ;;  %v796_v40 = vld [vmem:[%s867_s18 + $0x60] sm:$0xff]  }
  0x1c   : > { %801 = vst [vmem:[%s906_s25 + $0x10] sm:$0xff] %v718_v46   ;;  %802 = vst [vmem:[%s906_s25 + $0x18] sm:$0xff] %v723_v47   ;;  %v255_v54 = vmul.f32 %v663_v48, %v872_v0  ;;  %v256_v55 = vmul.f32 %v664_v49, %v872_v0  ;;  %v671_v56 = vunpack.c.l.bf16 %v791_v45  ;;  %v672_v57 = vunpack.c.h.bf16 %v791_v45 }
  0x1d   : > { %v292_v58 = vadd.f32 %v881_v9, %v253_v50  ;;  %v293_v59 = vadd.f32 %v881_v9, %v254_v51  ;;  %v257_v60 = vmul.f32 %v667_v52, %v872_v0  ;;  %v258_v61 = vmul.f32 %v668_v53, %v872_v0  ;;  %v797_v53 = vld [vmem:[%s867_s18 + $0x68] sm:$0xff]  }
  0x1e   : > { %v294_v62 = vadd.f32 %v881_v9, %v255_v54  ;;  %v295_v63 = vadd.f32 %v881_v9, %v256_v55  ;;  %v259_v1 = vmul.f32 %v671_v56, %v872_v0  ;;  %v260_v2 = vmul.f32 %v672_v57, %v872_v0 }
  0x1f   : > { %v324_v4 = vmax.f32 %v292_v58, 0.0  ;;  %v325_v5 = vmax.f32 %v293_v59, 0.0  ;;  %v296_v6 = vadd.f32 %v881_v9, %v257_v60  ;;  %v297_v7 = vadd.f32 %v881_v9, %v258_v61  ;;  %v798_v58 = vld [vmem:[%s867_s18 + $0x70] sm:$0xff]  }
  0x20   : > { %v326_v8 = vmax.f32 %v294_v62, 0.0  ;;  %v327_v10 = vmax.f32 %v295_v63, 0.0  ;;  %v298_v11 = vadd.f32 %v881_v9, %v259_v1  ;;  %v299_v12 = vadd.f32 %v881_v9, %v260_v2  ;;  %v799_v63 = vld [vmem:[%s867_s18 + $0x78] sm:$0xff]  }
  0x21   : > { %v728_v14 = vpack.c.bf16 %v325_v5, %v324_v4  ;;  %v328_v15 = vmax.f32 %v296_v6, 0.0  ;;  %v329_v16 = vmax.f32 %v297_v7, 0.0  ;;  %v675_v17 = vunpack.c.l.bf16 %v792_v3 }
  0x22   : > { %v733_v19 = vpack.c.bf16 %v327_v10, %v326_v8  ;;  %v330_v20 = vmax.f32 %v298_v11, 0.0  ;;  %v331_v21 = vmax.f32 %v299_v12, 0.0  ;;  %v676_v22 = vunpack.c.h.bf16 %v792_v3 }
  0x23   : > { %803 = vst [vmem:[%s906_s25 + $0x20] sm:$0xff] %v728_v14   ;;  %v738_v24 = vpack.c.bf16 %v329_v16, %v328_v15  ;;  %v261_v25 = vmul.f32 %v675_v17, %v872_v0  ;;  %v679_v26 = vunpack.c.l.bf16 %v793_v13  ;;  %v680_v27 = vunpack.c.h.bf16 %v793_v13 }
  0x24   : > { %804 = vst [vmem:[%s906_s25 + $0x28] sm:$0xff] %v733_v19   ;;  %v743_v28 = vpack.c.bf16 %v331_v21, %v330_v20  ;;  %v262_v29 = vmul.f32 %v676_v22, %v872_v0  ;;  %v683_v30 = vunpack.c.l.bf16 %v794_v18  ;;  %v684_v31 = vunpack.c.h.bf16 %v794_v18 }
  0x25   : > { %805 = vst [vmem:[%s906_s25 + $0x30] sm:$0xff] %v738_v24   ;;  %v300_v32 = vadd.f32 %v881_v9, %v261_v25  ;;  %v263_v33 = vmul.f32 %v679_v26, %v872_v0  ;;  %v264_v34 = vmul.f32 %v680_v27, %v872_v0  ;;  %v687_v35 = vunpack.c.l.bf16 %v795_v23 }
  0x26   : > { %806 = vst [vmem:[%s906_s25 + $0x38] sm:$0xff] %v743_v28   ;;  %v301_v36 = vadd.f32 %v881_v9, %v262_v29  ;;  %v265_v37 = vmul.f32 %v683_v30, %v872_v0  ;;  %v266_v38 = vmul.f32 %v684_v31, %v872_v0  ;;  %v688_v39 = vunpack.c.h.bf16 %v795_v23 }
  0x27   : > { %v332_v41 = vmax.f32 %v300_v32, 0.0  ;;  %v302_v42 = vadd.f32 %v881_v9, %v263_v33  ;;  %v303_v43 = vadd.f32 %v881_v9, %v264_v34  ;;  %v267_v44 = vmul.f32 %v687_v35, %v872_v0 }
  0x28   : > { %v333_v45 = vmax.f32 %v301_v36, 0.0  ;;  %v304_v46 = vadd.f32 %v881_v9, %v265_v37  ;;  %v305_v47 = vadd.f32 %v881_v9, %v266_v38  ;;  %v268_v48 = vmul.f32 %v688_v39, %v872_v0 }
  0x29   : > { %v334_v49 = vmax.f32 %v302_v42, 0.0  ;;  %v335_v50 = vmax.f32 %v303_v43, 0.0  ;;  %v306_v51 = vadd.f32 %v881_v9, %v267_v44  ;;  %v691_v52 = vunpack.c.l.bf16 %v796_v40 }
  0x2a   : > { %v748_v54 = vpack.c.bf16 %v333_v45, %v332_v41  ;;  %v336_v55 = vmax.f32 %v304_v46, 0.0  ;;  %v337_v56 = vmax.f32 %v305_v47, 0.0  ;;  %v307_v57 = vadd.f32 %v881_v9, %v268_v48 }
  0x2b   : > { %v753_v59 = vpack.c.bf16 %v335_v50, %v334_v49  ;;  %v338_v60 = vmax.f32 %v306_v51, 0.0  ;;  %v692_v61 = vunpack.c.h.bf16 %v796_v40  ;;  %v269_v62 = vmul.f32 %v691_v52, %v872_v0 }
  0x2c   : > { %807 = vst [vmem:[%s906_s25 + $0x40] sm:$0xff] %v748_v54   ;;  %v758_v1 = vpack.c.bf16 %v337_v56, %v336_v55  ;;  %v339_v2 = vmax.f32 %v307_v57, 0.0  ;;  %v695_v3 = vunpack.c.l.bf16 %v797_v53  ;;  %v696_v4 = vunpack.c.h.bf16 %v797_v53 }
  0x2d   : > { %808 = vst [vmem:[%s906_s25 + $0x48] sm:$0xff] %v753_v59   ;;  %v270_v5 = vmul.f32 %v692_v61, %v872_v0  ;;  %v308_v6 = vadd.f32 %v881_v9, %v269_v62  ;;  %v699_v7 = vunpack.c.l.bf16 %v798_v58  ;;  %v700_v8 = vunpack.c.h.bf16 %v798_v58 }
  0x2e   : > { %809 = vst [vmem:[%s906_s25 + $0x50] sm:$0xff] %v758_v1   ;;  %v763_v10 = vpack.c.bf16 %v339_v2, %v338_v60  ;;  %v271_v11 = vmul.f32 %v695_v3, %v872_v0  ;;  %v272_v12 = vmul.f32 %v696_v4, %v872_v0  ;;  %v703_v13 = vunpack.c.l.bf16 %v799_v63 }
  0x2f   : > { %v309_v14 = vadd.f32 %v881_v9, %v270_v5  ;;  %v340_v15 = vmax.f32 %v308_v6, 0.0  ;;  %v273_v16 = vmul.f32 %v699_v7, %v872_v0  ;;  %v274_v17 = vmul.f32 %v700_v8, %v872_v0 }
  0x30   : > { %810 = vst [vmem:[%s906_s25 + $0x58] sm:$0xff] %v763_v10   ;;  %v310_v18 = vadd.f32 %v881_v9, %v271_v11  ;;  %v311_v19 = vadd.f32 %v881_v9, %v272_v12  ;;  %v704_v20 = vunpack.c.h.bf16 %v799_v63  ;;  %v275_v21 = vmul.f32 %v703_v13, %v872_v0 }
  0x31   : > { %v341_v22 = vmax.f32 %v309_v14, 0.0  ;;  %v312_v23 = vadd.f32 %v881_v9, %v273_v16  ;;  %v313_v24 = vadd.f32 %v881_v9, %v274_v17 }
  0x32   : > { %v342_v25 = vmax.f32 %v310_v18, 0.0  ;;  %v343_v26 = vmax.f32 %v311_v19, 0.0  ;;  %v276_v27 = vmul.f32 %v704_v20, %v872_v0  ;;  %v314_v28 = vadd.f32 %v881_v9, %v275_v21 }
  0x33   : > { %v768_v29 = vpack.c.bf16 %v341_v22, %v340_v15  ;;  %v344_v30 = vmax.f32 %v312_v23, 0.0  ;;  %v345_v31 = vmax.f32 %v313_v24, 0.0 }
  0x34   : > { %v773_v32 = vpack.c.bf16 %v343_v26, %v342_v25  ;;  %v315_v33 = vadd.f32 %v881_v9, %v276_v27  ;;  %v346_v34 = vmax.f32 %v314_v28, 0.0 }
  0x35   : > { %811 = vst [vmem:[%s906_s25 + $0x60] sm:$0xff] %v768_v29   ;;  %v778_v35 = vpack.c.bf16 %v345_v31, %v344_v30 }
  0x36   : > { %812 = vst [vmem:[%s906_s25 + $0x68] sm:$0xff] %v773_v32   ;;  %v347_v36 = vmax.f32 %v315_v33, 0.0 }
  0x37   : > { %813 = vst [vmem:[%s906_s25 + $0x70] sm:$0xff] %v778_v35  }
  0x38   : > { %v783_v37 = vpack.c.bf16 %v347_v36, %v346_v34 }
  0x3a   : > { %814 = vst [vmem:[%s906_s25 + $0x78] sm:$0xff] %v783_v37  }
  0x3b PF: > { %s13_s12 = sadd.s32 1, %s829_s12  }
  0x3c   : > { %p10_p4 = scmp.ge.s32.totalorder %s13_s12, 4  }
  0x3e   :  { %12 = sbr.rel (!%p10_p4) target bundleno = 1 (0x1), region = 62 }

// kernel: forward.9
= control target key start
LH: loop header
LB: loop body
LE: loop exit
PB: predicated region body
PF: predicated region fallthrough
CT: control target
= control target key end

     0   :  { %s1918_s12 = smov 0   ;;  %s2115_s0 = inlined_call_operand.vmem [shape: bf16[512,288], index: 0, kind: input, shape index: {}]   ;;  %s2116_s1 = inlined_call_operand.vmem [shape: bf16[288,128], index: 1, kind: input, shape index: {}]   ;;  %s2117_s2 = inlined_call_operand.vmem [shape: bf16[512,128], index: 2, kind: output, shape index: {0}]   ;;  %s2118_s3 = inlined_call_operand.vmem [shape: f32[2,2,128], index: 3, kind: output, shape index: {1}]  }
   0x1 LB: > { %s1924_s13 = sadd.s32 4294967295, %s1896_s12   ;;  %p1368_p0 = scmp.ge.s32.totalorder %s1896_s12, 1  ;;  %s1896_s12 = sphi %s1918_s12, %s14_s12  }
   0x2   : > { %p142_p1 = scmp.lt.s32.totalorder %s1896_s12, 3 }
   0x4   : > { %p143_p2 = pnand %p1368_p0, %p142_p1 }
   0x5   : > { %v1808_v0 = vld [vmem:[%s2116_s1 + $0x40] sm:$0xff] (!%p143_p2)   ;;  %s1369_s16 = sshll.u32 (!%p143_p2), %s1924_s13, 5  ;;  %v1810_v2 = vld [vmem:[%s2116_s1 + $0x48] sm:$0xff] (!%p143_p2)   ;;  %v1812_v4 = vld [vmem:[%s2116_s1 + $0x50] sm:$0xff] (!%p143_p2)   ;;  %vm637_vm0 = vcmask (!%p143_p2), 261120   ;;  %p184_p4 = scmp.lt.s32.totalorder (!%p143_p2), %s1924_s13, 1 }
   0x6   : > { %146 = sbr.rel (%p143_p2) target bundleno = 379 (0x17b), region = 28  ;;  %v1809_v1 = vld [vmem:[%s2116_s1] sm:$0xff] (!%p143_p2)   ;;  %1617 = vmatprep.subr.bf16.mxu0 (!%p143_p2), %v1808_v0  ;;  %1783 = vmatprep.subr.bf16.mxu1 (!%p143_p2), %v1808_v0  ;;  %p172_p3 = scmp.lt.s32.totalorder (!%p143_p2), %s1369_s16, 63  ;;  %v1811_v3 = vld [vmem:[%s2116_s1 + $0x8] sm:$0xff] (!%p143_p2)   ;;  %v1813_v5 = vld [vmem:[%s2116_s1 + $0x10] sm:$0xff] (!%p143_p2)   ;;  %vm1114_vm1 = vcmask (!%p143_p2), 1040384  }
   0x7   : > { %1618 = vmatpush3.bf16.msra.mxu0 (!%p143_p2), %v1809_v1  ;;  %1791 = vmatpush3.bf16.msra.mxu1 (!%p143_p2), %v1809_v1  ;;  %v1814_v6 = vld [vmem:[%s2116_s1 + $0x58] sm:$0xff] (!%p143_p2)   ;;  %v1816_v8 = vld [vmem:[%s2116_s1 + $0x60] sm:$0xff] (!%p143_p2)   ;;  %v1818_v10 = vld [vmem:[%s2116_s1 + $0x68] sm:$0xff] (!%p143_p2)  }
   0x8   : > { %1619 = vmatprep.subr.bf16.mxu0 (!%p143_p2), %v1810_v2  ;;  %1784 = vmatprep.subr.bf16.mxu1 (!%p143_p2), %v1810_v2  ;;  %v1815_v7 = vld [vmem:[%s2116_s1 + $0x18] sm:$0xff] (!%p143_p2)   ;;  %v1817_v9 = vld [vmem:[%s2116_s1 + $0x20] sm:$0xff] (!%p143_p2)   ;;  %v1819_v13 = vld [vmem:[%s2116_s1 + $0x28] sm:$0xff] (!%p143_p2)  }
   0x9   : > { %v1820_v14 = vld [vmem:[%s2116_s1 + $0x70] sm:$0xff] (!%p143_p2)   ;;  %v1822_v16 = vld [vmem:[%s2116_s1 + $0x78] sm:$0xff] (!%p143_p2)   ;;  %v1836_v18 = vld [vmem:[%s2116_s1 + $0x80] sm:$0xff] (!%p143_p2)  }
   0xa   : > { %v1821_v15 = vld [vmem:[%s2116_s1 + $0x30] sm:$0xff] (!%p143_p2)   ;;  %v1823_v17 = vld [vmem:[%s2116_s1 + $0x38] sm:$0xff] (!%p143_p2)   ;;  %v1849_v23 = vld [vmem:[%s2116_s1 + $0x88] sm:$0xff] (!%p143_p2)  }
   0xb   : > { %1620 = vmatpush3.bf16.msra.mxu0 (!%p143_p2), %v1811_v3  ;;  %1792 = vmatpush3.bf16.msra.mxu1 (!%p143_p2), %v1811_v3 }
   0xc   : > { %1621 = vmatprep.subr.bf16.mxu0 (!%p143_p2), %v1812_v4  ;;  %1785 = vmatprep.subr.bf16.mxu1 (!%p143_p2), %v1812_v4 }
   0xd   : > { %s2120_s16 = smov (!%p172_p3, %s1369_s16), 63  ;;  %s2122_s13 = smov (!%p184_p4, %s1924_s13), 1 }
   0xe   : > { %s1799_s29 = smul.u32 12, %s2120_s16  ;;  %s1372_s4 = sshll.u32 %s2120_s16, 2 }
   0xf   : > { %1622 = vmatpush3.bf16.msra.mxu0 %v1813_v5  ;;  %1793 = vmatpush3.bf16.msra.mxu1 %v1813_v5  ;;  %s2075_s7 = scalar_lea.vmem %s2117_s2, %s1372_s4  ;;  %s1373_s16 = sshll.u32 %s2122_s13, 1 }
  0x10   : > { %1623 = vmatprep.subr.bf16.mxu0 %v1814_v6  ;;  %1786 = vmatprep.subr.bf16.mxu1 %v1814_v6  ;;  %s1962_s9 = scalar_lea.vmem %s2115_s0, %s1799_s29  ;;  %s187_s10 = scalar_lea.vmem %s2118_s3, %s1373_s16 }
  0x11   : > { %v1826_v11 = vld [vmem:[%s1962_s9 + $0x4] ss:$12 sps:$4 sm:$0xff]   ;;  %v1824_v19 = vld [vmem:[%s1962_s9] ss:$12 sps:$4 sm:$0xff]   ;;  %v1830_v21 = vld [vmem:[%s1962_s9 + $0x1c] ss:$12 sps:$4 sm:$0xff]  }
  0x12   : > { %v1829_v12 = vld [vmem:[%s1962_s9 + $0x124] ss:$12 sps:$4 sm:$0xff]   ;;  %718 = vmatprep.mubr.bf16.mxu0 %v1826_v11  ;;  %v1827_v20 = vld [vmem:[%s1962_s9 + $0x120] ss:$12 sps:$4 sm:$0xff]   ;;  %v1832_v22 = vld [vmem:[%s1962_s9 + $0x13c] ss:$12 sps:$4 sm:$0xff]  }
  0x13   : > { %1624 = vmatpush3.bf16.msra.mxu0 %v1815_v7  ;;  %1794 = vmatpush3.bf16.msra.mxu1 %v1815_v7  ;;  %v1834_v24 = vld [vmem:[%s1962_s9 + $0x18] ss:$12 sps:$4 sm:$0xff]   ;;  %v1837_v26 = vld [vmem:[%s1962_s9 + $0x34] ss:$12 sps:$4 sm:$0xff]   ;;  %v1841_v28 = vld [vmem:[%s1962_s9 + $0x30] ss:$12 sps:$4 sm:$0xff]  }
  0x14   : > { %1625 = vmatprep.subr.bf16.mxu0 %v1816_v8  ;;  %1787 = vmatprep.subr.bf16.mxu1 %v1816_v8  ;;  %v1835_v25 = vld [vmem:[%s1962_s9 + $0x138] ss:$12 sps:$4 sm:$0xff]   ;;  %v1839_v27 = vld [vmem:[%s1962_s9 + $0x154] ss:$12 sps:$4 sm:$0xff]   ;;  %v1842_v29 = vld [vmem:[%s1962_s9 + $0x150] ss:$12 sps:$4 sm:$0xff]  }
  0x15   : > { %814 = vmatprep.mubr.bf16.mxu1 %v1829_v12  ;;  %v1843_v30 = vld [vmem:[%s1962_s9 + $0x4c] ss:$12 sps:$4 sm:$0xff]   ;;  %v1847_v32 = vld [vmem:[%s1962_s9 + $0x48] ss:$12 sps:$4 sm:$0xff]   ;;  %v1850_v34 = vld [vmem:[%s1962_s9 + $0x64] ss:$12 sps:$4 sm:$0xff]  }
  0x16   : > { %v1845_v31 = vld [vmem:[%s1962_s9 + $0x16c] ss:$12 sps:$4 sm:$0xff]   ;;  %v1848_v33 = vld [vmem:[%s1962_s9 + $0x168] ss:$12 sps:$4 sm:$0xff]   ;;  %v1859_v41 = vld [vmem:[%s1962_s9 + $0x50] ss:$12 sps:$4 sm:$0xff]  }
  0x17   : > { %1626 = vmatpush3.bf16.msra.mxu0 %v1817_v9  ;;  %1795 = vmatpush3.bf16.msra.mxu1 %v1817_v9  ;;  %v1852_v35 = vld [vmem:[%s1962_s9 + $0x8] ss:$12 sps:$4 sm:$0xff]   ;;  %v1853_v36 = vld [vmem:[%s1962_s9 + $0x60] ss:$12 sps:$4 sm:$0xff]   ;;  %v1857_v39 = vld [vmem:[%s1962_s9 + $0x38] ss:$12 sps:$4 sm:$0xff]  }
  0x18   : > { %1627 = vmatprep.subr.bf16.mxu0 %v1818_v10  ;;  %1788 = vmatprep.subr.bf16.mxu1 %v1818_v10  ;;  %v1854_v37 = vld [vmem:[%s1962_s9 + $0x20] ss:$12 sps:$4 sm:$0xff]   ;;  %v1855_v38 = vld [vmem:[%s1962_s9 + $0x7c] ss:$12 sps:$4 sm:$0xff]   ;;  %v1858_v40 = vld [vmem:[%s1962_s9 + $0x78] ss:$12 sps:$4 sm:$0xff]  }
  0x19   : > { %v1860_v42 = vld [vmem:[%s1962_s9 + $0x94] ss:$12 sps:$4 sm:$0xff]   ;;  %v1863_v44 = vld [vmem:[%s1962_s9 + $0x90] ss:$12 sps:$4 sm:$0xff]   ;;  %v1865_v46 = vld [vmem:[%s1962_s9 + $0xac] ss:$12 sps:$4 sm:$0xff]  }
  0x1a   : > { %v1862_v43 = vld [vmem:[%s1962_s9 + $0x68] ss:$12 sps:$4 sm:$0xff]   ;;  %v1864_v45 = vld [vmem:[%s1962_s9 + $0x80] ss:$12 sps:$4 sm:$0xff]   ;;  %v1867_v47 = vld [vmem:[%s1962_s9 + $0x98] ss:$12 sps:$4 sm:$0xff]  }
  0x1b   : > { %1628 = vmatpush3.bf16.msra.mxu0 %v1819_v13  ;;  %1796 = vmatpush3.bf16.msra.mxu1 %v1819_v13  ;;  %v1868_v48 = vld [vmem:[%s1962_s9 + $0xa8] ss:$12 sps:$4 sm:$0xff]   ;;  %v1869_v49 = vld [vmem:[%s1962_s9 + $0xb0] ss:$12 sps:$4 sm:$0xff]   ;;  %v1873_v52 = vld [vmem:[%s1962_s9 + $0xc0] ss:$12 sps:$4 sm:$0xff]  }
  0x1c   : > { %1629 = vmatprep.subr.bf16.mxu0 %v1820_v14  ;;  %1789 = vmatprep.subr.bf16.mxu1 %v1820_v14  ;;  %v1870_v50 = vld [vmem:[%s1962_s9 + $0xc4] ss:$12 sps:$4 sm:$0xff]   ;;  %v1872_v51 = vld [vmem:[%s1962_s9 + $0xc8] ss:$12 sps:$4 sm:$0xff]   ;;  %v1874_v53 = vld [vmem:[%s1962_s9 + $0xe0] ss:$12 sps:$4 sm:$0xff]  }
  0x1d   : > { %v1875_v54 = vld [vmem:[%s1962_s9 + $0xdc] ss:$12 sps:$4 sm:$0xff]   ;;  %v1877_v55 = vld [vmem:[%s1962_s9 + $0xf8] ss:$12 sps:$4 sm:$0xff]   ;;  %v1880_v58 = vld [vmem:[%s1962_s9 + $0xf4] ss:$12 sps:$4 sm:$0xff]  }
  0x1e   : > { %v1878_v56 = vld [vmem:[%s1962_s9 + $0xd8] ss:$12 sps:$4 sm:$0xff]   ;;  %v1879_v57 = vld [vmem:[%s1962_s9 + $0x110] ss:$12 sps:$4 sm:$0xff]   ;;  %v1882_v59 = vld [vmem:[%s1962_s9 + $0x128] ss:$12 sps:$4 sm:$0xff]  }
  0x1f   : > { %1630 = vmatpush3.bf16.msra.mxu0 %v1821_v15  ;;  %1797 = vmatpush3.bf16.msra.mxu1 %v1821_v15  ;;  %v1883_v60 = vld [vmem:[%s1962_s9 + $0xf0] ss:$12 sps:$4 sm:$0xff]   ;;  %v1884_v61 = vld [vmem:[%s1962_s9 + $0x140] ss:$12 sps:$4 sm:$0xff]   ;;  %v1887_v63 = vld [vmem:[%s1962_s9 + $0x158] ss:$12 sps:$4 sm:$0xff]  }
  0x20   : > { %1631 = vmatprep.subr.bf16.mxu0 %v1822_v16  ;;  %1790 = vmatprep.subr.bf16.mxu1 %v1822_v16  ;;  %v1885_v62 = vld [vmem:[%s1962_s9 + $0x10c] ss:$12 sps:$4 sm:$0xff]   ;;  %v1888_v0 = vld [vmem:[%s1962_s9 + $0x108] ss:$12 sps:$4 sm:$0xff]   ;;  %v1889_v1 = vld [vmem:[%s1962_s9 + $0x170] ss:$12 sps:$4 sm:$0xff]  }
  0x23   : > { %1632 = vmatpush3.bf16.msra.mxu0 %v1823_v17  ;;  %1798 = vmatpush3.bf16.msra.mxu1 %v1823_v17 }
  0x24   : > { %1747 = vmatprep.subr.bf16.mxu1 %v1836_v18 }
  0x26   : > { %719 = vmatmul.mubr.bf16.vlgmr.msra.gmra.mrb[0].mxu0 %v1824_v19  ;;  %815 = vmatmul.mubr.bf16.vlgmr.msra.gmra.mrb[0].mxu1 %v1827_v20 }
  0x27   : > { %726 = vmatprep.mubr.bf16.mxu0 %v1830_v21  ;;  %822 = vmatprep.mubr.bf16.mxu1 %v1832_v22 }
  0x28   : > { %1748 = vmatpush3.bf16.msra.mxu1 %v1836_v18 }
  0x29   : > { %1749 = vmatprep.subr.bf16.mxu1 %v1849_v23 }
  0x2c   : > { %1750 = vmatpush3.bf16.msra.mxu1 %v1849_v23 }
  0x2e   : > { %727 = vmatmul.mubr.bf16.gmra.mrb[4].mxu0 %v1834_v24  ;;  %823 = vmatmul.mubr.bf16.gmra.mrb[4].mxu1 %v1835_v25 }
  0x2f   : > { %734 = vmatprep.mubr.bf16.mxu0 %v1837_v26  ;;  %830 = vmatprep.mubr.bf16.mxu1 %v1839_v27 }
  0x36   : > { %735 = vmatmul.mubr.bf16.gmra.mrb[8].mxu0 %v1841_v28  ;;  %831 = vmatmul.mubr.bf16.gmra.mrb[8].mxu1 %v1842_v29 }
  0x37   : > { %742 = vmatprep.mubr.bf16.mxu0 %v1843_v30  ;;  %838 = vmatprep.mubr.bf16.mxu1 %v1845_v31 }
  0x3e   : > { %743 = vmatmul.mubr.bf16.gmra.mrb[12].mxu0 %v1847_v32  ;;  %839 = vmatmul.mubr.bf16.gmra.mrb[12].mxu1 %v1848_v33 }
  0x3f   : > { %750 = vmatprep.mubr.bf16.mxu0 %v1850_v34  ;;  %1751 = vmatprep.mubr.msk.bf16.mxu1 %vm637_vm0, %v1852_v35 }
  0x46   : > { %751 = vmatmul.mubr.bf16.gmra.mrb[16].mxu0 %v1853_v36  ;;  %1752 = vmatmul.mubr.msk.bf16.vlgmr.msra.gmra.mrb[16].mxu1 %vm637_vm0, %v1854_v37 }
  0x47   : > { %758 = vmatprep.mubr.bf16.mxu0 %v1855_v38  ;;  %1755 = vmatprep.mubr.msk.bf16.mxu1 %vm637_vm0, %v1857_v39 }
  0x4e   : > { %759 = vmatmul.mubr.bf16.gmra.mrb[20].mxu0 %v1858_v40  ;;  %1756 = vmatmul.mubr.msk.bf16.gmra.mrb[20].mxu1 %vm637_vm0, %v1859_v41 }
  0x4f   : > { %766 = vmatprep.mubr.bf16.mxu0 %v1860_v42  ;;  %1759 = vmatprep.mubr.msk.bf16.mxu1 %vm637_vm0, %v1862_v43 }
  0x56   : > { %767 = vmatmul.mubr.bf16.gmra.mrb[24].mxu0 %v1863_v44  ;;  %1760 = vmatmul.mubr.msk.bf16.gmra.mrb[24].mxu1 %vm637_vm0, %v1864_v45 }
  0x57   : > { %774 = vmatprep.mubr.bf16.mxu0 %v1865_v46  ;;  %1763 = vmatprep.mubr.msk.bf16.mxu1 %vm637_vm0, %v1867_v47 }
  0x5e   : > { %775 = vmatmul.mubr.bf16.gmra.mrb[28].mxu0 %v1868_v48  ;;  %1764 = vmatmul.mubr.msk.bf16.gmra.mrb[28].mxu1 %vm637_vm0, %v1869_v49 }
  0x5f   : > { %782 = vmatprep.mubr.bf16.mxu0 %v1870_v50  ;;  %1767 = vmatprep.mubr.msk.bf16.mxu1 %vm637_vm0, %v1872_v51 }
  0x66   : > { %783 = vmatmul.mubr.bf16.gmra.mrb[32].mxu0 %v1873_v52  ;;  %1768 = vmatmul.mubr.msk.bf16.gmra.mrb[32].mxu1 %vm637_vm0, %v1874_v53 }
  0x67   : > { %790 = vmatprep.mubr.bf16.mxu0 %v1875_v54  ;;  %1771 = vmatprep.mubr.msk.bf16.mxu1 %vm637_vm0, %v1877_v55 }
  0x6e   : > { %791 = vmatmul.mubr.bf16.gmra.mrb[36].mxu0 %v1878_v56  ;;  %1772 = vmatmul.mubr.msk.bf16.gmra.mrb[36].mxu1 %vm637_vm0, %v1879_v57 }
  0x6f   : > { %798 = vmatprep.mubr.bf16.mxu0 %v1880_v58  ;;  %1775 = vmatprep.mubr.msk.bf16.mxu1 %vm637_vm0, %v1882_v59 }
  0x76   : > { %799 = vmatmul.mubr.bf16.gmra.mrb[40].mxu0 %v1883_v60  ;;  %1776 = vmatmul.mubr.msk.bf16.gmra.mrb[40].mxu1 %vm637_vm0, %v1884_v61 }
  0x77   : > { %806 = vmatprep.mubr.bf16.mxu0 %v1885_v62  ;;  %1779 = vmatprep.mubr.msk.bf16.mxu1 %vm637_vm0, %v1887_v63 }
  0x7e   : > { %807 = vmatmul.mubr.bf16.gmra.mrb[44].mxu0 %v1888_v0  ;;  %1780 = vmatmul.mubr.msk.bf16.gmra.mrb[44].mxu1 %vm637_vm0, %v1889_v1 }
  0xf9   : > { %v1633_v2 = vpop.f32.mrb[0].mxu0  ;;  %v1705_v3 = vpop.f32.mrb[0].mxu1 }
  0xfa   : > { %v1634_v4 = vpop.f32.mrb[1].mxu0  ;;  %v1706_v5 = vpop.f32.mrb[1].mxu1 }
  0xfb   : > { %v1635_v6 = vadd.f32 %v1634_v4, %v1633_v2  ;;  %v1636_v7 = vpop.f32.mrb[2].mxu0  ;;  %v2055_v8 = vadd.f32 %v1706_v5, %v1705_v3  ;;  %v1708_v9 = vpop.f32.mrb[2].mxu1 }
  0xfc   : > { %v1637_v10 = vpop.f32.mrb[3].mxu0  ;;  %v1709_v11 = vpop.f32.mrb[3].mxu1 }
  0xfd   : > { %v1638_v12 = vadd.f32 %v1637_v10, %v1636_v7  ;;  %v2057_v13 = vadd.f32 %v1709_v11, %v1708_v9 }
 0x101   : > { %v1639_v14 = vpop.f32.mrb[4].mxu0  ;;  %v1711_v15 = vpop.f32.mrb[4].mxu1 }
 0x102   : > { %v1640_v16 = vpop.f32.mrb[5].mxu0  ;;  %v1712_v17 = vpop.f32.mrb[5].mxu1 }
 0x103   : > { %v1641_v18 = vadd.f32 %v1640_v16, %v1639_v14  ;;  %v1642_v19 = vpop.f32.mrb[6].mxu0  ;;  %v2059_v20 = vadd.f32 %v1712_v17, %v1711_v15  ;;  %v1714_v21 = vpop.f32.mrb[6].mxu1 }
 0x104   : > { %v1643_v22 = vpop.f32.mrb[7].mxu0  ;;  %v1715_v23 = vpop.f32.mrb[7].mxu1 }
 0x105   : > { %v1644_v24 = vadd.f32 %v1643_v22, %v1642_v19  ;;  %v2061_v25 = vadd.f32 %v1715_v23, %v1714_v21 }
 0x109   : > { %v1645_v26 = vpop.f32.mrb[8].mxu0  ;;  %v1717_v27 = vpop.f32.mrb[8].mxu1 }
 0x10a   : > { %v1646_v28 = vpop.f32.mrb[9].mxu0  ;;  %v1718_v29 = vpop.f32.mrb[9].mxu1 }
 0x10b   : > { %v1647_v30 = vadd.f32 %v1646_v28, %v1645_v26  ;;  %v1648_v31 = vpop.f32.mrb[10].mxu0  ;;  %v2063_v32 = vadd.f32 %v1718_v29, %v1717_v27  ;;  %v1720_v33 = vpop.f32.mrb[10].mxu1 }
 0x10c   : > { %v1649_v34 = vpop.f32.mrb[11].mxu0  ;;  %v1721_v35 = vpop.f32.mrb[11].mxu1 }
 0x10d   : > { %v1650_v36 = vadd.f32 %v1649_v34, %v1648_v31  ;;  %v2065_v37 = vadd.f32 %v1721_v35, %v1720_v33 }
 0x111   : > { %v1651_v38 = vpop.f32.mrb[12].mxu0  ;;  %v1723_v39 = vpop.f32.mrb[12].mxu1 }
 0x112   : > { %v1652_v40 = vpop.f32.mrb[13].mxu0  ;;  %v1724_v41 = vpop.f32.mrb[13].mxu1 }
 0x113   : > { %v1653_v42 = vadd.f32 %v1652_v40, %v1651_v38  ;;  %v1654_v43 = vpop.f32.mrb[14].mxu0  ;;  %v2067_v44 = vadd.f32 %v1724_v41, %v1723_v39  ;;  %v1726_v45 = vpop.f32.mrb[14].mxu1 }
 0x114   : > { %v1655_v46 = vpop.f32.mrb[15].mxu0  ;;  %v1727_v47 = vpop.f32.mrb[15].mxu1 }
 0x115   : > { %v1656_v48 = vadd.f32 %v1655_v46, %v1654_v43  ;;  %v2069_v49 = vadd.f32 %v1727_v47, %v1726_v45 }
 0x119   : > { %v1657_v50 = vpop.f32.mrb[16].mxu0  ;;  %v1753_v51 = vpop.f32.mrb[16].mxu1 }
 0x11a   : > { %v890_v52 = vadd.f32 %v1753_v51, %v1641_v18  ;;  %v1658_v53 = vpop.f32.mrb[17].mxu0  ;;  %v881_v54 = vpop.f32.mrb[17].mxu1 }
 0x11b   : > { %v1659_v55 = vadd.f32 %v1658_v53, %v1657_v50  ;;  %v882_v56 = vadd.f32 %v1635_v6, %v881_v54  ;;  %v1660_v57 = vpop.f32.mrb[18].mxu0  ;;  %v1754_v58 = vpop.f32.mrb[18].mxu1 }
 0x11c   : > { %v893_v59 = vadd.f32 %v1754_v58, %v1644_v24  ;;  %v1661_v60 = vpop.f32.mrb[19].mxu0  ;;  %v884_v61 = vpop.f32.mrb[19].mxu1  ;;  %v1047_v5 = vmul.f32 %v890_v52, %v890_v52 }
 0x11d   : > { %v1662_v62 = vadd.f32 %v1661_v60, %v1660_v57  ;;  %v885_v63 = vadd.f32 %v1638_v12, %v884_v61  ;;  %v1045_v1 = vmul.f32 %v882_v56, %v882_v56 }
 0x11e   : > { %v1530_v0 = vpack.c.bf16 %v893_v59, %v890_v52  ;;  %v1048_v11 = vmul.f32 %v893_v59, %v893_v59 }
 0x11f   : > { %v1008_v2 = vadd.f32 %v885_v63, %v882_v56  ;;  %v1046_v3 = vmul.f32 %v885_v63, %v885_v63  ;;  %v1525_v4 = vpack.c.bf16 %v885_v63, %v882_v56 }
 0x120   : > { %1602 = vst [vmem:[%s2075_s7 + $0x8] sm:$0xff] %v1530_v0  }
 0x121   : > { %v1009_v6 = vadd.f32 %v1008_v2, %v890_v52  ;;  %v1077_v7 = vadd.f32 %v1046_v3, %v1045_v1  ;;  %1526 = vst [vmem:[%s2075_s7] sm:$0xff] %v1525_v4   ;;  %v1663_v9 = vpop.f32.mrb[20].mxu0  ;;  %v1757_v10 = vpop.f32.mrb[20].mxu1 }
 0x122   : > { %v906_v14 = vadd.f32 %v1757_v10, %v1653_v42  ;;  %v1664_v15 = vpop.f32.mrb[21].mxu0  ;;  %v897_v16 = vpop.f32.mrb[21].mxu1 }
 0x123   : > { %v1078_v17 = vadd.f32 %v1077_v7, %v1047_v5  ;;  %v1665_v18 = vadd.f32 %v1664_v15, %v1663_v9  ;;  %v898_v12 = vadd.f32 %v1647_v30, %v897_v16  ;;  %v1010_v19 = vadd.f32 %v1009_v6, %v893_v59  ;;  %v1666_v21 = vpop.f32.mrb[22].mxu0  ;;  %v1758_v22 = vpop.f32.mrb[22].mxu1 }
 0x124   : > { %v909_v23 = vadd.f32 %v1758_v22, %v1656_v48  ;;  %v1667_v24 = vpop.f32.mrb[23].mxu0  ;;  %v900_v26 = vpop.f32.mrb[23].mxu1  ;;  %v1051_v42 = vmul.f32 %v906_v14, %v906_v14 }
 0x125   : > { %v1011_v27 = vadd.f32 %v1010_v19, %v898_v12  ;;  %v1049_v28 = vmul.f32 %v898_v12, %v898_v12  ;;  %v1079_v29 = vadd.f32 %v1078_v17, %v1048_v11  ;;  %v1668_v31 = vadd.f32 %v1667_v24, %v1666_v21 }
 0x126   : > { %v1540_v33 = vpack.c.bf16 %v909_v23, %v906_v14  ;;  %v901_v34 = vadd.f32 %v1650_v36, %v900_v26  ;;  %v1052_v36 = vmul.f32 %v909_v23, %v909_v23 }
 0x127   : > { %v1080_v35 = vadd.f32 %v1079_v29, %v1049_v28 }
 0x128   : > { %1604 = vst [vmem:[%s2075_s7 + $0x18] sm:$0xff] %v1540_v33   ;;  %v1012_v38 = vadd.f32 %v1011_v27, %v901_v34  ;;  %v1050_v39 = vmul.f32 %v901_v34, %v901_v34  ;;  %v1535_v40 = vpack.c.bf16 %v901_v34, %v898_v12 }
 0x129   : > { %v1669_v41 = vpop.f32.mrb[24].mxu0  ;;  %v1761_v30 = vpop.f32.mrb[24].mxu1 }
 0x12a   : > { %v1013_v43 = vadd.f32 %v1012_v38, %v906_v14  ;;  %v1081_v45 = vadd.f32 %v1080_v35, %v1050_v39  ;;  %1603 = vst [vmem:[%s2075_s7 + $0x10] sm:$0xff] %v1535_v40   ;;  %v922_v46 = vadd.f32 %v1761_v30, %v1665_v18  ;;  %v1670_v47 = vpop.f32.mrb[25].mxu0  ;;  %v913_v48 = vpop.f32.mrb[25].mxu1 }
 0x12b   : > { %v1671_v50 = vadd.f32 %v1670_v47, %v1669_v41  ;;  %v914_v51 = vadd.f32 %v1659_v55, %v913_v48  ;;  %v1672_v52 = vpop.f32.mrb[26].mxu0  ;;  %v1762_v53 = vpop.f32.mrb[26].mxu1 }
 0x12c   : > { %v1082_v54 = vadd.f32 %v1081_v45, %v1051_v42  ;;  %v1014_v56 = vadd.f32 %v1013_v43, %v909_v23  ;;  %v925_v57 = vadd.f32 %v1762_v53, %v1668_v31  ;;  %v1673_v58 = vpop.f32.mrb[27].mxu0  ;;  %v916_v59 = vpop.f32.mrb[27].mxu1  ;;  %v1055_v9 = vmul.f32 %v922_v46, %v922_v46 }
 0x12d   : > { %v1053_v60 = vmul.f32 %v914_v51, %v914_v51  ;;  %v1674_v61 = vadd.f32 %v1673_v58, %v1672_v52  ;;  %v917_v63 = vadd.f32 %v1662_v62, %v916_v59 }
 0x12e   : > { %v1015_v0 = vadd.f32 %v1014_v56, %v914_v51  ;;  %v1083_v1 = vadd.f32 %v1082_v54, %v1052_v36  ;;  %v1550_v2 = vpack.c.bf16 %v925_v57, %v922_v46  ;;  %v1056_v12 = vmul.f32 %v925_v57, %v925_v57 }
 0x12f   : > { %v1054_v3 = vmul.f32 %v917_v63, %v917_v63  ;;  %v1545_v4 = vpack.c.bf16 %v917_v63, %v914_v51 }
 0x130   : > { %v1084_v5 = vadd.f32 %v1083_v1, %v1053_v60  ;;  %1606 = vst [vmem:[%s2075_s7 + $0x28] sm:$0xff] %v1550_v2   ;;  %v1016_v55 = vadd.f32 %v1015_v0, %v917_v63 }
 0x131   : > { %1605 = vst [vmem:[%s2075_s7 + $0x20] sm:$0xff] %v1545_v4   ;;  %v1675_v6 = vpop.f32.mrb[28].mxu0  ;;  %v1765_v7 = vpop.f32.mrb[28].mxu1 }
 0x132   : > { %v1017_v10 = vadd.f32 %v1016_v55, %v922_v46  ;;  %v1085_v11 = vadd.f32 %v1084_v5, %v1054_v3  ;;  %v1676_v14 = vpop.f32.mrb[29].mxu0  ;;  %v929_v15 = vpop.f32.mrb[29].mxu1 }
 0x133   : > { %v1677_v16 = vadd.f32 %v1676_v14, %v1675_v6  ;;  %v930_v17 = vadd.f32 %v1671_v50, %v929_v15  ;;  %v1678_v18 = vpop.f32.mrb[30].mxu0  ;;  %v1766_v62 = vpop.f32.mrb[30].mxu1 }
 0x134   : > { %v1086_v19 = vadd.f32 %v1085_v11, %v1055_v9  ;;  %v1018_v21 = vadd.f32 %v1017_v10, %v925_v57  ;;  %v1679_v22 = vpop.f32.mrb[31].mxu0  ;;  %v932_v23 = vpop.f32.mrb[31].mxu1 }
 0x135   : > { %v938_v24 = vadd.f32 %v1765_v7, %v1677_v16  ;;  %v1057_v26 = vmul.f32 %v930_v17, %v930_v17  ;;  %v1680_v27 = vadd.f32 %v1679_v22, %v1678_v18  ;;  %v933_v28 = vadd.f32 %v1674_v61, %v932_v23 }
 0x136   : > { %v1019_v29 = vadd.f32 %v1018_v21, %v930_v17  ;;  %v1087_v31 = vadd.f32 %v1086_v19, %v1056_v12 }
 0x137   : > { %v941_v33 = vadd.f32 %v1766_v62, %v1680_v27  ;;  %v1058_v34 = vmul.f32 %v933_v28, %v933_v28  ;;  %v1555_v35 = vpack.c.bf16 %v933_v28, %v930_v17  ;;  %v1059_v42 = vmul.f32 %v938_v24, %v938_v24 }
 0x138   : > { %v1088_v38 = vadd.f32 %v1087_v31, %v1057_v26  ;;  %v1020_v39 = vadd.f32 %v1019_v29, %v933_v28 }
 0x139   : > { %v1560_v40 = vpack.c.bf16 %v941_v33, %v938_v24  ;;  %1607 = vst [vmem:[%s2075_s7 + $0x30] sm:$0xff] %v1555_v35   ;;  %v1681_v41 = vpop.f32.mrb[32].mxu0  ;;  %v1769_v30 = vpop.f32.mrb[32].mxu1  ;;  %v1060_v52 = vmul.f32 %v941_v33, %v941_v33 }
 0x13a   : > { %v1021_v43 = vadd.f32 %v1020_v39, %v938_v24  ;;  %v1089_v45 = vadd.f32 %v1088_v38, %v1058_v34  ;;  %v1682_v46 = vpop.f32.mrb[33].mxu0  ;;  %v945_v47 = vpop.f32.mrb[33].mxu1 }
 0x13b   : > { %1608 = vst [vmem:[%s2075_s7 + $0x38] sm:$0xff] %v1560_v40   ;;  %v1683_v48 = vadd.f32 %v1682_v46, %v1681_v41  ;;  %v1684_v50 = vpop.f32.mrb[34].mxu0  ;;  %v1770_v51 = vpop.f32.mrb[34].mxu1 }
 0x13c   : > { %v1090_v53 = vadd.f32 %v1089_v45, %v1059_v42  ;;  %v1685_v36 = vpop.f32.mrb[35].mxu0  ;;  %v1022_v54 = vadd.f32 %v1021_v43, %v941_v33  ;;  %v948_v56 = vpop.f32.mrb[35].mxu1 }
 0x13d   : > { %v1686_v57 = vadd.f32 %v1685_v36, %v1684_v50  ;;  %v946_v58 = vadd.f32 %v1683_v48, %v945_v47 }
 0x13e   : > { %v1091_v59 = vadd.f32 %v1090_v53, %v1060_v52 }
 0x13f   : > { %v1023_v60 = vadd.f32 %v1022_v54, %v946_v58  ;;  %v1061_v61 = vmul.f32 %v946_v58, %v946_v58  ;;  %v949_v63 = vadd.f32 %v1686_v57, %v948_v56 }
 0x141   : > { %v1092_v0 = vadd.f32 %v1091_v59, %v1061_v61  ;;  %v1024_v1 = vadd.f32 %v1023_v60, %v949_v63  ;;  %v1062_v2 = vmul.f32 %v949_v63, %v949_v63  ;;  %v1565_v3 = vpack.c.bf16 %v949_v63, %v946_v58  ;;  %v1687_v4 = vpop.f32.mrb[36].mxu0  ;;  %v1773_v5 = vpop.f32.mrb[36].mxu1 }
 0x142   : > { %v1688_v55 = vpop.f32.mrb[37].mxu0  ;;  %v961_v6 = vpop.f32.mrb[37].mxu1 }
 0x143   : > { %v1093_v7 = vadd.f32 %v1092_v0, %v1062_v2  ;;  %1609 = vst [vmem:[%s2075_s7 + $0x40] sm:$0xff] %v1565_v3   ;;  %v1689_v9 = vadd.f32 %v1688_v55, %v1687_v4  ;;  %v1690_v10 = vpop.f32.mrb[38].mxu0  ;;  %v1774_v11 = vpop.f32.mrb[38].mxu1 }
 0x144   : > { %v1691_v14 = vpop.f32.mrb[39].mxu0  ;;  %v964_v15 = vpop.f32.mrb[39].mxu1 }
 0x145   : > { %v954_v16 = vadd.f32 %v1769_v30, %v1689_v9  ;;  %v1692_v17 = vadd.f32 %v1691_v14, %v1690_v10 }
 0x147   : > { %v1025_v18 = vadd.f32 %v1024_v1, %v954_v16  ;;  %v1063_v62 = vmul.f32 %v954_v16, %v954_v16  ;;  %v957_v12 = vadd.f32 %v1770_v51, %v1692_v17 }
 0x149   : > { %v1094_v19 = vadd.f32 %v1093_v7, %v1063_v62  ;;  %v1026_v21 = vadd.f32 %v1025_v18, %v957_v12  ;;  %v1064_v22 = vmul.f32 %v957_v12, %v957_v12  ;;  %v1570_v23 = vpack.c.bf16 %v957_v12, %v954_v16  ;;  %v1693_v24 = vpop.f32.mrb[40].mxu0  ;;  %v1777_v26 = vpop.f32.mrb[40].mxu1 }
 0x14a   : > { %v2087_v27 = vadd.f32 %v1777_v26, %v2059_v20  ;;  %v1694_v28 = vpop.f32.mrb[41].mxu0  ;;  %v977_v29 = vpop.f32.mrb[41].mxu1 }
 0x14b   : > { %v1095_v31 = vadd.f32 %v1094_v19, %v1064_v22  ;;  %1610 = vst [vmem:[%s2075_s7 + $0x48] sm:$0xff] %v1570_v23   ;;  %v1695_v33 = vadd.f32 %v1694_v28, %v1693_v24  ;;  %v978_v34 = vadd.f32 %v2055_v8, %v977_v29  ;;  %v1696_v35 = vpop.f32.mrb[42].mxu0  ;;  %v1778_v38 = vpop.f32.mrb[42].mxu1 }
 0x14c   : > { %v989_v39 = vadd.f32 %v1778_v38, %v2061_v25  ;;  %v1697_v40 = vpop.f32.mrb[43].mxu0  ;;  %v980_v41 = vpop.f32.mrb[43].mxu1 }
 0x14d   : > { %v962_v30 = vadd.f32 %v1695_v33, %v961_v6  ;;  %v1698_v42 = vadd.f32 %v1697_v40, %v1696_v35  ;;  %v981_v20 = vadd.f32 %v2057_v13, %v980_v41 }
 0x14e   : > { %v1590_v43 = vpack.c.bf16 %v989_v39, %v2087_v27  ;;  %v1072_v12 = vmul.f32 %v989_v39, %v989_v39 }
 0x14f   : > { %v1027_v45 = vadd.f32 %v1026_v21, %v962_v30  ;;  %v1065_v46 = vmul.f32 %v962_v30, %v962_v30  ;;  %v965_v47 = vadd.f32 %v1698_v42, %v964_v15  ;;  %v1585_v48 = vpack.c.bf16 %v981_v20, %v978_v34 }
 0x150   : > { %1614 = vst [vmem:[%s2075_s7 + $0x68] sm:$0xff] %v1590_v43  }
 0x151   : > { %v1096_v8 = vadd.f32 %v1095_v31, %v1065_v46  ;;  %v1028_v50 = vadd.f32 %v1027_v45, %v965_v47  ;;  %v1066_v51 = vmul.f32 %v965_v47, %v965_v47  ;;  %v1575_v52 = vpack.c.bf16 %v965_v47, %v962_v30  ;;  %v1699_v25 = vpop.f32.mrb[44].mxu0  ;;  %v1781_v53 = vpop.f32.mrb[44].mxu1  ;;  %1613 = vst [vmem:[%s2075_s7 + $0x60] sm:$0xff] %v1585_v48  }
 0x152   : > { %v1002_v36 = vadd.f32 %v1781_v53, %v2067_v44  ;;  %v1700_v54 = vpop.f32.mrb[45].mxu0  ;;  %v993_v56 = vpop.f32.mrb[45].mxu1 }
 0x153   : > { %v1097_v13 = vadd.f32 %v1096_v8, %v1066_v51  ;;  %1611 = vst [vmem:[%s2075_s7 + $0x50] sm:$0xff] %v1575_v52   ;;  %v1701_v57 = vadd.f32 %v1700_v54, %v1699_v25  ;;  %v994_v58 = vadd.f32 %v2063_v32, %v993_v56  ;;  %v1702_v59 = vpop.f32.mrb[46].mxu0  ;;  %v1782_v60 = vpop.f32.mrb[46].mxu1 }
 0x154   : > { %v1005_v61 = vadd.f32 %v1782_v60, %v2069_v49  ;;  %v1703_v63 = vpop.f32.mrb[47].mxu0  ;;  %v996_v0 = vpop.f32.mrb[47].mxu1  ;;  %v1069_v49 = vmul.f32 %v978_v34, %v978_v34  ;;  %v1075_v31 = vmul.f32 %v1002_v36, %v1002_v36 }
 0x155   : > { %v970_v1 = vadd.f32 %v1773_v5, %v1701_v57  ;;  %v1704_v2 = vadd.f32 %v1703_v63, %v1702_v59  ;;  %v997_v44 = vadd.f32 %v2065_v37, %v996_v0  ;;  %v1070_v5 = vmul.f32 %v981_v20, %v981_v20 }
 0x156   : > { %v1600_v3 = vpack.c.bf16 %v1005_v61, %v1002_v36  ;;  %v1071_v37 = vmul.f32 %v2087_v27, %v2087_v27  ;;  %v1073_v22 = vmul.f32 %v994_v58, %v994_v58  ;;  %v1076_v35 = vmul.f32 %v1005_v61, %v1005_v61 }
 0x157   : > { %v1029_v4 = vadd.f32 %v1028_v50, %v970_v1  ;;  %v1067_v55 = vmul.f32 %v970_v1, %v970_v1  ;;  %v973_v6 = vadd.f32 %v1774_v11, %v1704_v2  ;;  %v1595_v7 = vpack.c.bf16 %v997_v44, %v994_v58 }
 0x158   : > { %1616 = vst [vmem:[%s2075_s7 + $0x78] sm:$0xff] %v1600_v3   ;;  %v1074_v28 = vmul.f32 %v997_v44, %v997_v44 }
 0x159   : > { %v1098_v9 = vadd.f32 %v1097_v13, %v1067_v55  ;;  %v1030_v32 = vadd.f32 %v1029_v4, %v973_v6  ;;  %v1068_v10 = vmul.f32 %v973_v6, %v973_v6  ;;  %v1580_v14 = vpack.c.bf16 %v973_v6, %v970_v1  ;;  %1615 = vst [vmem:[%s2075_s7 + $0x70] sm:$0xff] %v1595_v7  }
 0x15b   : > { %v1031_v15 = vadd.f32 %v1030_v32, %v978_v34  ;;  %v1099_v16 = vadd.f32 %v1098_v9, %v1068_v10  ;;  %1612 = vst [vmem:[%s2075_s7 + $0x58] sm:$0xff] %v1580_v14  }
 0x15d   : > { %v1032_v17 = vadd.f32 %v1031_v15, %v981_v20  ;;  %v1100_v18 = vadd.f32 %v1099_v16, %v1069_v49 }
 0x15f   : > { %v1101_v62 = vadd.f32 %v1100_v18, %v1070_v5  ;;  %v1033_v11 = vadd.f32 %v1032_v17, %v2087_v27 }
 0x161   : > { %v1034_v19 = vadd.f32 %v1033_v11, %v989_v39  ;;  %v1102_v21 = vadd.f32 %v1101_v62, %v1071_v37 }
 0x163   : > { %v1035_v23 = vadd.f32 %v1034_v19, %v994_v58  ;;  %v1103_v24 = vadd.f32 %v1102_v21, %v1072_v12 }
 0x165   : > { %v1036_v26 = vadd.f32 %v1035_v23, %v997_v44  ;;  %v1104_v29 = vadd.f32 %v1103_v24, %v1073_v22 }
 0x167   : > { %v1037_v33 = vadd.f32 %v1036_v26, %v1002_v36  ;;  %v1105_v34 = vadd.f32 %v1104_v29, %v1074_v28 }
 0x169   : > { %v1038_v38 = vadd.f32 %v1037_v33, %v1005_v61  ;;  %v1106_v40 = vadd.f32 %v1105_v34, %v1075_v31 }
 0x16b   : > { %v1039_v41 = vrot.slane %v1038_v38, 4  ;;  %v1107_v30 = vadd.f32 %v1106_v40, %v1076_v35 }
 0x16d   : > { %v1040_v27 = vadd.f32 %v1039_v41, %v1038_v38  ;;  %v1108_v39 = vrot.slane %v1107_v30, 4 }
 0x16f   : > { %v1041_v42 = vrot.slane %v1040_v27, 2  ;;  %v1109_v20 = vadd.f32 %v1108_v39, %v1107_v30 }
 0x171   : > { %v1042_v43 = vadd.f32 %v1041_v42, %v1040_v27  ;;  %v1110_v45 = vrot.slane %v1109_v20, 2 }
 0x173   : > { %v1043_v46 = vrot.slane %v1042_v43, 1  ;;  %v1111_v47 = vadd.f32 %v1110_v45, %v1109_v20 }
 0x175   : > { %v1112_v48 = vrot.slane %v1111_v47, 1  ;;  %v1044_v8 = vadd.f32 %v1043_v46, %v1042_v43 }
 0x177   : > { %v1113_v50 = vadd.f32 %v1112_v48, %v1111_v47 }
 0x179   : > { %v1115_v51 = vsel %vm1114_vm1, %v1044_v8, %v1113_v50 }
 0x17a   : > { %1116 = vst [vmem:[%s187_s10] sm:$0x3] %v1115_v51 }
 0x17b PF: > { %s14_s12 = sadd.s32 1, %s1896_s12  }
 0x17c   : > { %p11_p5 = scmp.ge.s32.totalorder %s14_s12, 4  }
 0x17e   :  { %13 = sbr.rel (!%p11_p5) target bundleno = 1 (0x1), region = 70 }

// kernel: forward.11
= control target key start
LH: loop header
LB: loop body
LE: loop exit
PB: predicated region body
PF: predicated region fallthrough
CT: control target
= control target key end

     0   :  { %s2162_s12 = smov 0   ;;  %s2411_s0 = inlined_call_operand.vmem [shape: bf16[2048,144], index: 0, kind: input, shape index: {}]   ;;  %s2412_s1 = inlined_call_operand.vmem [shape: bf16[144,128], index: 1, kind: input, shape index: {}]   ;;  %s2413_s2 = inlined_call_operand.vmem [shape: f32[1,128], index: 2, kind: input, shape index: {}]   ;;  %s2414_s3 = inlined_call_operand.vmem [shape: bf16[2048,128], index: 3, kind: output, shape index: {}]  }
   0x1 LB: > { %s1435_s13 = sadd.s32 4294967295, %s2139_s12   ;;  %p1439_p0 = scmp.ge.s32.totalorder %s2139_s12, 1  ;;  %s2139_s12 = sphi %s2162_s12, %s13_s12  }
   0x2   : > { %p139_p1 = scmp.lt.s32.totalorder %s2139_s12, 5 }
   0x4   : > { %p140_p2 = pnand %p1439_p0, %p139_p1 }
   0x5   : > { %v1900_v0 = vld [vmem:[%s2412_s1] sm:$0xff] (!%p140_p2)   ;;  %v2141_v1 = vmov (!%p140_p2), 0   ;;  %s1440_s16 = sshll.u32 (!%p140_p2), %s1435_s13, 6  ;;  %v1901_v2 = vld [vmem:[%s2412_s1 + $0x8] sm:$0xff] (!%p140_p2)   ;;  %v1902_v3 = vld [vmem:[%s2412_s1 + $0x10] sm:$0xff] (!%p140_p2)   ;;  %vm609_vm0 = vcmask (!%p140_p2), 130048  }
   0x6   : > { %143 = sbr.rel (%p140_p2) target bundleno = 393 (0x189), region = 32  ;;  %706 = vmatprep.subr.bf16.mxu0 (!%p140_p2), %v2141_v1  ;;  %1873 = vmatprep.subr.bf16.mxu1 (!%p140_p2), %v2141_v1  ;;  %p165_p3 = scmp.lt.s32.totalorder (!%p140_p2), %s1440_s16, 255  ;;  %v1903_v4 = vld [vmem:[%s2412_s1 + $0x18] sm:$0xff] (!%p140_p2)   ;;  %v1904_v7 = vld [vmem:[%s2412_s1 + $0x20] sm:$0xff] (!%p140_p2)   ;;  %v1905_v8 = vld [vmem:[%s2412_s1 + $0x28] sm:$0xff] (!%p140_p2)  }
   0x7   : > { %707 = vmatpush1.bf16.msra.mxu0 (!%p140_p2), %v1900_v0  ;;  %1882 = vmatpush1.bf16.msra.mxu1 (!%p140_p2), %v1900_v0  ;;  %v1906_v9 = vld [vmem:[%s2412_s1 + $0x30] sm:$0xff] (!%p140_p2)   ;;  %v1907_v10 = vld [vmem:[%s2412_s1 + $0x38] sm:$0xff] (!%p140_p2)   ;;  %v1908_v11 = vld [vmem:[%s2412_s1 + $0x40] sm:$0xff] (!%p140_p2)  }
   0x8   : > { %708 = vmatprep.subr.bf16.mxu0 (!%p140_p2), %v2141_v1  ;;  %1874 = vmatprep.subr.bf16.mxu1 (!%p140_p2), %v2141_v1 }
   0xb   : > { %709 = vmatpush1.bf16.msra.mxu0 (!%p140_p2), %v1901_v2  ;;  %1883 = vmatpush1.bf16.msra.mxu1 (!%p140_p2), %v1901_v2 }
   0xc   : > { %710 = vmatprep.subr.bf16.mxu0 (!%p140_p2), %v2141_v1  ;;  %1875 = vmatprep.subr.bf16.mxu1 (!%p140_p2), %v2141_v1 }
   0xd   : > { %s2416_s16 = smov (!%p165_p3, %s1440_s16), 255 }
   0xe   : > { %s1617_s21 = sshll.u32 %s2416_s16, 3  ;;  %s1444_s13 = sshll.u32 %s2416_s16, 2 }
   0xf   : > { %s2185_s24 = scalar_lea.vmem %s2411_s0, %s1617_s21  ;;  %711 = vmatpush1.bf16.msra.mxu0 %v1902_v3  ;;  %1884 = vmatpush1.bf16.msra.mxu1 %v1902_v3  ;;  %s2318_s17 = scalar_lea.vmem %s2414_s3, %s1444_s13 }
  0x10   : > { %v1911_v5 = vld [vmem:[%s2185_s24 + $0x4] ss:$8 sps:$4 sm:$0xff]   ;;  %712 = vmatprep.subr.bf16.mxu0 %v2141_v1  ;;  %1876 = vmatprep.subr.bf16.mxu1 %v2141_v1  ;;  %v1909_v12 = vld [vmem:[%s2185_s24] ss:$8 sps:$4 sm:$0xff]   ;;  %v1915_v14 = vld [vmem:[%s2185_s24 + $0x14] ss:$8 sps:$4 sm:$0xff]  }
  0x11   : > { %v1914_v6 = vld [vmem:[%s2185_s24 + $0x104] ss:$8 sps:$4 sm:$0xff]   ;;  %1519 = vmatprep.mubr.msk.bf16.mxu0 %vm609_vm0, %v1911_v5  ;;  %v1912_v13 = vld [vmem:[%s2185_s24 + $0x100] ss:$8 sps:$4 sm:$0xff]   ;;  %v1917_v15 = vld [vmem:[%s2185_s24 + $0x114] ss:$8 sps:$4 sm:$0xff]  }
  0x12   : > { %1535 = vmatprep.mubr.msk.bf16.mxu1 %vm609_vm0, %v1914_v6  ;;  %v1919_v16 = vld [vmem:[%s2185_s24 + $0x10] ss:$8 sps:$4 sm:$0xff]   ;;  %v1921_v18 = vld [vmem:[%s2185_s24 + $0x24] ss:$8 sps:$4 sm:$0xff]   ;;  %v1925_v20 = vld [vmem:[%s2185_s24 + $0x20] ss:$8 sps:$4 sm:$0xff]  }
  0x13   : > { %713 = vmatpush1.bf16.msra.mxu0 %v1903_v4  ;;  %1885 = vmatpush1.bf16.msra.mxu1 %v1903_v4  ;;  %v1920_v17 = vld [vmem:[%s2185_s24 + $0x110] ss:$8 sps:$4 sm:$0xff]   ;;  %v1923_v19 = vld [vmem:[%s2185_s24 + $0x124] ss:$8 sps:$4 sm:$0xff]   ;;  %v1926_v21 = vld [vmem:[%s2185_s24 + $0x120] ss:$8 sps:$4 sm:$0xff]  }
  0x14   : > { %714 = vmatprep.subr.bf16.mxu0 %v2141_v1  ;;  %1877 = vmatprep.subr.bf16.mxu1 %v2141_v1  ;;  %v1927_v22 = vld [vmem:[%s2185_s24 + $0x34] ss:$8 sps:$4 sm:$0xff]   ;;  %v1931_v24 = vld [vmem:[%s2185_s24 + $0x30] ss:$8 sps:$4 sm:$0xff]   ;;  %v1933_v26 = vld [vmem:[%s2185_s24 + $0x44] ss:$8 sps:$4 sm:$0xff]  }
  0x15   : > { %v1929_v23 = vld [vmem:[%s2185_s24 + $0x134] ss:$8 sps:$4 sm:$0xff]   ;;  %v1932_v25 = vld [vmem:[%s2185_s24 + $0x130] ss:$8 sps:$4 sm:$0xff]   ;;  %v1935_v27 = vld [vmem:[%s2185_s24 + $0x144] ss:$8 sps:$4 sm:$0xff]  }
  0x16   : > { %v1937_v28 = vld [vmem:[%s2185_s24 + $0x40] ss:$8 sps:$4 sm:$0xff]   ;;  %v1939_v30 = vld [vmem:[%s2185_s24 + $0x54] ss:$8 sps:$4 sm:$0xff]   ;;  %v1943_v32 = vld [vmem:[%s2185_s24 + $0x50] ss:$8 sps:$4 sm:$0xff]  }
  0x17   : > { %715 = vmatpush1.bf16.msra.mxu0 %v1904_v7  ;;  %1886 = vmatpush1.bf16.msra.mxu1 %v1904_v7  ;;  %v1938_v29 = vld [vmem:[%s2185_s24 + $0x140] ss:$8 sps:$4 sm:$0xff]   ;;  %v1941_v31 = vld [vmem:[%s2185_s24 + $0x154] ss:$8 sps:$4 sm:$0xff]   ;;  %v1944_v33 = vld [vmem:[%s2185_s24 + $0x150] ss:$8 sps:$4 sm:$0xff]  }
  0x18   : > { %716 = vmatprep.subr.bf16.mxu0 %v2141_v1  ;;  %1878 = vmatprep.subr.bf16.mxu1 %v2141_v1  ;;  %v1945_v34 = vld [vmem:[%s2185_s24 + $0x64] ss:$8 sps:$4 sm:$0xff]   ;;  %v1949_v36 = vld [vmem:[%s2185_s24 + $0x60] ss:$8 sps:$4 sm:$0xff]   ;;  %v1951_v38 = vld [vmem:[%s2185_s24 + $0x74] ss:$8 sps:$4 sm:$0xff]  }
  0x19   : > { %v1947_v35 = vld [vmem:[%s2185_s24 + $0x164] ss:$8 sps:$4 sm:$0xff]   ;;  %v1950_v37 = vld [vmem:[%s2185_s24 + $0x160] ss:$8 sps:$4 sm:$0xff]   ;;  %v1953_v39 = vld [vmem:[%s2185_s24 + $0x174] ss:$8 sps:$4 sm:$0xff]  }
  0x1a   : > { %v1955_v40 = vld [vmem:[%s2185_s24 + $0x70] ss:$8 sps:$4 sm:$0xff]   ;;  %v1957_v42 = vld [vmem:[%s2185_s24 + $0x84] ss:$8 sps:$4 sm:$0xff]   ;;  %v1961_v44 = vld [vmem:[%s2185_s24 + $0x80] ss:$8 sps:$4 sm:$0xff]  }
  0x1b   : > { %717 = vmatpush1.bf16.msra.mxu0 %v1905_v8  ;;  %1887 = vmatpush1.bf16.msra.mxu1 %v1905_v8  ;;  %v1956_v41 = vld [vmem:[%s2185_s24 + $0x170] ss:$8 sps:$4 sm:$0xff]   ;;  %v1959_v43 = vld [vmem:[%s2185_s24 + $0x184] ss:$8 sps:$4 sm:$0xff]   ;;  %v1962_v45 = vld [vmem:[%s2185_s24 + $0x180] ss:$8 sps:$4 sm:$0xff]  }
  0x1c   : > { %718 = vmatprep.subr.bf16.mxu0 %v2141_v1  ;;  %1879 = vmatprep.subr.bf16.mxu1 %v2141_v1  ;;  %v1963_v46 = vld [vmem:[%s2185_s24 + $0x94] ss:$8 sps:$4 sm:$0xff]   ;;  %v1967_v48 = vld [vmem:[%s2185_s24 + $0x90] ss:$8 sps:$4 sm:$0xff]   ;;  %v1969_v50 = vld [vmem:[%s2185_s24 + $0xa4] ss:$8 sps:$4 sm:$0xff]  }
  0x1d   : > { %v1965_v47 = vld [vmem:[%s2185_s24 + $0x194] ss:$8 sps:$4 sm:$0xff]   ;;  %v1968_v49 = vld [vmem:[%s2185_s24 + $0x190] ss:$8 sps:$4 sm:$0xff]   ;;  %v1971_v51 = vld [vmem:[%s2185_s24 + $0x1a4] ss:$8 sps:$4 sm:$0xff]  }
  0x1e   : > { %v1973_v52 = vld [vmem:[%s2185_s24 + $0xa0] ss:$8 sps:$4 sm:$0xff]   ;;  %v1975_v54 = vld [vmem:[%s2185_s24 + $0xb4] ss:$8 sps:$4 sm:$0xff]   ;;  %v1979_v56 = vld [vmem:[%s2185_s24 + $0xb0] ss:$8 sps:$4 sm:$0xff]  }
  0x1f   : > { %719 = vmatpush1.bf16.msra.mxu0 %v1906_v9  ;;  %1888 = vmatpush1.bf16.msra.mxu1 %v1906_v9  ;;  %v1974_v53 = vld [vmem:[%s2185_s24 + $0x1a0] ss:$8 sps:$4 sm:$0xff]   ;;  %v1977_v55 = vld [vmem:[%s2185_s24 + $0x1b4] ss:$8 sps:$4 sm:$0xff]   ;;  %v1980_v57 = vld [vmem:[%s2185_s24 + $0x1b0] ss:$8 sps:$4 sm:$0xff]  }
  0x20   : > { %720 = vmatprep.subr.bf16.mxu0 %v2141_v1  ;;  %1880 = vmatprep.subr.bf16.mxu1 %v2141_v1  ;;  %v1981_v58 = vld [vmem:[%s2185_s24 + $0xc4] ss:$8 sps:$4 sm:$0xff]   ;;  %v1985_v60 = vld [vmem:[%s2185_s24 + $0xc0] ss:$8 sps:$4 sm:$0xff]   ;;  %v1987_v62 = vld [vmem:[%s2185_s24 + $0xd4] ss:$8 sps:$4 sm:$0xff]  }
  0x21   : > { %v1983_v59 = vld [vmem:[%s2185_s24 + $0x1c4] ss:$8 sps:$4 sm:$0xff]   ;;  %v1986_v61 = vld [vmem:[%s2185_s24 + $0x1c0] ss:$8 sps:$4 sm:$0xff]   ;;  %v1989_v63 = vld [vmem:[%s2185_s24 + $0x1d4] ss:$8 sps:$4 sm:$0xff]  }
  0x22   : > { %v1991_v0 = vld [vmem:[%s2185_s24 + $0xd0] ss:$8 sps:$4 sm:$0xff]   ;;  %v1993_v2 = vld [vmem:[%s2185_s24 + $0xe4] ss:$8 sps:$4 sm:$0xff]   ;;  %v1997_v4 = vld [vmem:[%s2185_s24 + $0xe0] ss:$8 sps:$4 sm:$0xff]  }
  0x23   : > { %721 = vmatpush1.bf16.msra.mxu0 %v1907_v10  ;;  %1889 = vmatpush1.bf16.msra.mxu1 %v1907_v10  ;;  %v1995_v3 = vld [vmem:[%s2185_s24 + $0x1e4] ss:$8 sps:$4 sm:$0xff]   ;;  %v1998_v5 = vld [vmem:[%s2185_s24 + $0x1e0] ss:$8 sps:$4 sm:$0xff]   ;;  %v1999_v6 = vld [vmem:[%s2185_s24 + $0xf4] ss:$8 sps:$4 sm:$0xff]  }
  0x24   : > { %722 = vmatprep.subr.bf16.mxu0 %v2141_v1  ;;  %1881 = vmatprep.subr.bf16.mxu1 %v2141_v1  ;;  %v1992_v1 = vld [vmem:[%s2185_s24 + $0x1d0] ss:$8 sps:$4 sm:$0xff]   ;;  %v2001_v7 = vld [vmem:[%s2185_s24 + $0x1f4] ss:$8 sps:$4 sm:$0xff]   ;;  %v2304_v10 = vld [vmem:[%s2413_s2] ss:$0 sm:$0xff] }
  0x25   : > { %v2003_v8 = vld [vmem:[%s2185_s24 + $0xf0] ss:$8 sps:$4 sm:$0xff]  }
  0x26   : > { %v2004_v9 = vld [vmem:[%s2185_s24 + $0x1f0] ss:$8 sps:$4 sm:$0xff]  }
  0x27   : > { %723 = vmatpush1.bf16.msra.mxu0 %v1908_v11  ;;  %1890 = vmatpush1.bf16.msra.mxu1 %v1908_v11 }
  0x2a   : > { %739 = vmatmul.mubr.bf16.vlgmr.msra.gmra.mrb[0].mxu0 %v1909_v12  ;;  %867 = vmatmul.mubr.bf16.vlgmr.msra.gmra.mrb[0].mxu1 %v1912_v13 }
  0x2b   : > { %1520 = vmatprep.mubr.msk.bf16.mxu0 %vm609_vm0, %v1915_v14  ;;  %1536 = vmatprep.mubr.msk.bf16.mxu1 %vm609_vm0, %v1917_v15 }
  0x32   : > { %747 = vmatmul.mubr.bf16.gmra.mrb[4].mxu0 %v1919_v16  ;;  %875 = vmatmul.mubr.bf16.gmra.mrb[4].mxu1 %v1920_v17 }
  0x33   : > { %1521 = vmatprep.mubr.msk.bf16.mxu0 %vm609_vm0, %v1921_v18  ;;  %1537 = vmatprep.mubr.msk.bf16.mxu1 %vm609_vm0, %v1923_v19 }
  0x3a   : > { %755 = vmatmul.mubr.bf16.gmra.mrb[8].mxu0 %v1925_v20  ;;  %883 = vmatmul.mubr.bf16.gmra.mrb[8].mxu1 %v1926_v21 }
  0x3b   : > { %1522 = vmatprep.mubr.msk.bf16.mxu0 %vm609_vm0, %v1927_v22  ;;  %1538 = vmatprep.mubr.msk.bf16.mxu1 %vm609_vm0, %v1929_v23 }
  0x42   : > { %763 = vmatmul.mubr.bf16.gmra.mrb[12].mxu0 %v1931_v24  ;;  %891 = vmatmul.mubr.bf16.gmra.mrb[12].mxu1 %v1932_v25 }
  0x43   : > { %1523 = vmatprep.mubr.msk.bf16.mxu0 %vm609_vm0, %v1933_v26  ;;  %1539 = vmatprep.mubr.msk.bf16.mxu1 %vm609_vm0, %v1935_v27 }
  0x4a   : > { %771 = vmatmul.mubr.bf16.gmra.mrb[16].mxu0 %v1937_v28  ;;  %899 = vmatmul.mubr.bf16.gmra.mrb[16].mxu1 %v1938_v29 }
  0x4b   : > { %1524 = vmatprep.mubr.msk.bf16.mxu0 %vm609_vm0, %v1939_v30  ;;  %1540 = vmatprep.mubr.msk.bf16.mxu1 %vm609_vm0, %v1941_v31 }
  0x52   : > { %779 = vmatmul.mubr.bf16.gmra.mrb[20].mxu0 %v1943_v32  ;;  %907 = vmatmul.mubr.bf16.gmra.mrb[20].mxu1 %v1944_v33 }
  0x53   : > { %1525 = vmatprep.mubr.msk.bf16.mxu0 %vm609_vm0, %v1945_v34  ;;  %1541 = vmatprep.mubr.msk.bf16.mxu1 %vm609_vm0, %v1947_v35 }
  0x5a   : > { %787 = vmatmul.mubr.bf16.gmra.mrb[24].mxu0 %v1949_v36  ;;  %915 = vmatmul.mubr.bf16.gmra.mrb[24].mxu1 %v1950_v37 }
  0x5b   : > { %1526 = vmatprep.mubr.msk.bf16.mxu0 %vm609_vm0, %v1951_v38  ;;  %1542 = vmatprep.mubr.msk.bf16.mxu1 %vm609_vm0, %v1953_v39 }
  0x62   : > { %795 = vmatmul.mubr.bf16.gmra.mrb[28].mxu0 %v1955_v40  ;;  %923 = vmatmul.mubr.bf16.gmra.mrb[28].mxu1 %v1956_v41 }
  0x63   : > { %1527 = vmatprep.mubr.msk.bf16.mxu0 %vm609_vm0, %v1957_v42  ;;  %1543 = vmatprep.mubr.msk.bf16.mxu1 %vm609_vm0, %v1959_v43 }
  0x6a   : > { %803 = vmatmul.mubr.bf16.gmra.mrb[32].mxu0 %v1961_v44  ;;  %931 = vmatmul.mubr.bf16.gmra.mrb[32].mxu1 %v1962_v45 }
  0x6b   : > { %1528 = vmatprep.mubr.msk.bf16.mxu0 %vm609_vm0, %v1963_v46  ;;  %1544 = vmatprep.mubr.msk.bf16.mxu1 %vm609_vm0, %v1965_v47 }
  0x72   : > { %811 = vmatmul.mubr.bf16.gmra.mrb[36].mxu0 %v1967_v48  ;;  %939 = vmatmul.mubr.bf16.gmra.mrb[36].mxu1 %v1968_v49 }
  0x73   : > { %1529 = vmatprep.mubr.msk.bf16.mxu0 %vm609_vm0, %v1969_v50  ;;  %1545 = vmatprep.mubr.msk.bf16.mxu1 %vm609_vm0, %v1971_v51 }
  0x7a   : > { %819 = vmatmul.mubr.bf16.gmra.mrb[40].mxu0 %v1973_v52  ;;  %947 = vmatmul.mubr.bf16.gmra.mrb[40].mxu1 %v1974_v53 }
  0x7b   : > { %1530 = vmatprep.mubr.msk.bf16.mxu0 %vm609_vm0, %v1975_v54  ;;  %1546 = vmatprep.mubr.msk.bf16.mxu1 %vm609_vm0, %v1977_v55 }
  0x82   : > { %827 = vmatmul.mubr.bf16.gmra.mrb[44].mxu0 %v1979_v56  ;;  %955 = vmatmul.mubr.bf16.gmra.mrb[44].mxu1 %v1980_v57 }
  0x83   : > { %1531 = vmatprep.mubr.msk.bf16.mxu0 %vm609_vm0, %v1981_v58  ;;  %1547 = vmatprep.mubr.msk.bf16.mxu1 %vm609_vm0, %v1983_v59 }
  0x8a   : > { %835 = vmatmul.mubr.bf16.gmra.mrb[48].mxu0 %v1985_v60  ;;  %963 = vmatmul.mubr.bf16.gmra.mrb[48].mxu1 %v1986_v61 }
  0x8b   : > { %1532 = vmatprep.mubr.msk.bf16.mxu0 %vm609_vm0, %v1987_v62  ;;  %1548 = vmatprep.mubr.msk.bf16.mxu1 %vm609_vm0, %v1989_v63 }
  0x92   : > { %843 = vmatmul.mubr.bf16.gmra.mrb[52].mxu0 %v1991_v0  ;;  %971 = vmatmul.mubr.bf16.gmra.mrb[52].mxu1 %v1992_v1 }
  0x93   : > { %1533 = vmatprep.mubr.msk.bf16.mxu0 %vm609_vm0, %v1993_v2  ;;  %1549 = vmatprep.mubr.msk.bf16.mxu1 %vm609_vm0, %v1995_v3 }
  0x9a   : > { %851 = vmatmul.mubr.bf16.gmra.mrb[56].mxu0 %v1997_v4  ;;  %979 = vmatmul.mubr.bf16.gmra.mrb[56].mxu1 %v1998_v5 }
  0x9b   : > { %1534 = vmatprep.mubr.msk.bf16.mxu0 %vm609_vm0, %v1999_v6  ;;  %1550 = vmatprep.mubr.msk.bf16.mxu1 %vm609_vm0, %v2001_v7 }
  0xa2   : > { %859 = vmatmul.mubr.bf16.gmra.mrb[60].mxu0 %v2003_v8  ;;  %987 = vmatmul.mubr.bf16.gmra.mrb[60].mxu1 %v2004_v9 }
  0xfd   : > { %v740_v11 = vpop.f32.mrb[0].mxu0  ;;  %v868_v12 = vpop.f32.mrb[0].mxu1 }
  0xfe   : > { %v741_v13 = vadd.f32 %v2304_v10, %v740_v11  ;;  %v869_v14 = vadd.f32 %v2304_v10, %v868_v12  ;;  %v742_v15 = vpop.f32.mrb[1].mxu0  ;;  %v870_v16 = vpop.f32.mrb[1].mxu1 }
  0xff   : > { %v743_v17 = vpop.f32.mrb[2].mxu0  ;;  %v871_v18 = vpop.f32.mrb[2].mxu1 }
 0x100   : > { %2005 = vtanh.f32 %v741_v13  ;;  %v744_v19 = vadd.f32 %v2304_v10, %v743_v17  ;;  %v872_v20 = vadd.f32 %v2304_v10, %v871_v18  ;;  %v745_v21 = vpop.f32.mrb[3].mxu0  ;;  %v873_v22 = vpop.f32.mrb[3].mxu1 }
 0x101   : > { %2007 = vtanh.f32 %v869_v14 }
 0x102   : > { %2009 = vtanh.f32 %v744_v19 }
 0x103   : > { %2011 = vtanh.f32 %v872_v20 }
 0x105   : > { %v748_v23 = vpop.f32.mrb[4].mxu0  ;;  %v876_v24 = vpop.f32.mrb[4].mxu1 }
 0x106   : > { %v749_v25 = vadd.f32 %v2304_v10, %v748_v23  ;;  %v877_v26 = vadd.f32 %v2304_v10, %v876_v24  ;;  %v750_v27 = vpop.f32.mrb[5].mxu0  ;;  %v878_v28 = vpop.f32.mrb[5].mxu1 }
 0x107   : > { %v751_v29 = vpop.f32.mrb[6].mxu0  ;;  %v879_v30 = vpop.f32.mrb[6].mxu1 }
 0x108   : > { %2013 = vtanh.f32 %v749_v25  ;;  %v752_v31 = vadd.f32 %v2304_v10, %v751_v29  ;;  %v880_v32 = vadd.f32 %v2304_v10, %v879_v30  ;;  %v753_v33 = vpop.f32.mrb[7].mxu0  ;;  %v881_v34 = vpop.f32.mrb[7].mxu1 }
 0x109   : > { %2015 = vtanh.f32 %v877_v26 }
 0x10a   : > { %v2006_v35 = vpop.eup %2005  ;;  %2017 = vtanh.f32 %v752_v31 }
 0x10b   : > { %v2008_v36 = vpop.eup %2007  ;;  %2019 = vtanh.f32 %v880_v32 }
 0x10c   : > { %v2010_v37 = vpop.eup %2009 }
 0x10d   : > { %v2012_v38 = vpop.eup %2011  ;;  %v1685_v39 = vpack.c.bf16 %v2010_v37, %v2006_v35  ;;  %v756_v40 = vpop.f32.mrb[8].mxu0 }
 0x10e   : > { %v884_v41 = vpop.f32.mrb[8].mxu1  ;;  %v1765_v42 = vpack.c.bf16 %v2012_v38, %v2008_v36  ;;  %v757_v43 = vadd.f32 %v2304_v10, %v756_v40  ;;  %v758_v45 = vpop.f32.mrb[9].mxu0 }
 0x10f   : > { %v885_v44 = vadd.f32 %v2304_v10, %v884_v41  ;;  %v886_v46 = vpop.f32.mrb[9].mxu1  ;;  %1686 = vst [vmem:[%s2318_s17] sm:$0xff] %v1685_v39   ;;  %v759_v47 = vpop.f32.mrb[10].mxu0 }
 0x110   : > { %v887_v48 = vpop.f32.mrb[10].mxu1  ;;  %1857 = vst [vmem:[%s2318_s17 + $0x80] sm:$0xff] %v1765_v42   ;;  %2021 = vtanh.f32 %v757_v43  ;;  %v760_v49 = vadd.f32 %v2304_v10, %v759_v47  ;;  %v761_v51 = vpop.f32.mrb[11].mxu0 }
 0x111   : > { %v888_v50 = vadd.f32 %v2304_v10, %v887_v48  ;;  %v889_v52 = vpop.f32.mrb[11].mxu1  ;;  %2023 = vtanh.f32 %v885_v44 }
 0x112   : > { %v2014_v53 = vpop.eup %2013  ;;  %2025 = vtanh.f32 %v760_v49 }
 0x113   : > { %v2016_v54 = vpop.eup %2015  ;;  %2027 = vtanh.f32 %v888_v50 }
 0x114   : > { %v2018_v55 = vpop.eup %2017 }
 0x115   : > { %v2020_v56 = vpop.eup %2019  ;;  %v1690_v57 = vpack.c.bf16 %v2018_v55, %v2014_v53  ;;  %v764_v58 = vpop.f32.mrb[12].mxu0 }
 0x116   : > { %v892_v59 = vpop.f32.mrb[12].mxu1  ;;  %v1770_v60 = vpack.c.bf16 %v2020_v56, %v2016_v54  ;;  %v765_v61 = vadd.f32 %v2304_v10, %v764_v58  ;;  %v766_v63 = vpop.f32.mrb[13].mxu0 }
 0x117   : > { %v893_v62 = vadd.f32 %v2304_v10, %v892_v59  ;;  %v894_v0 = vpop.f32.mrb[13].mxu1  ;;  %1842 = vst [vmem:[%s2318_s17 + $0x8] sm:$0xff] %v1690_v57   ;;  %v767_v1 = vpop.f32.mrb[14].mxu0 }
 0x118   : > { %v895_v2 = vpop.f32.mrb[14].mxu1  ;;  %1858 = vst [vmem:[%s2318_s17 + $0x88] sm:$0xff] %v1770_v60   ;;  %2029 = vtanh.f32 %v765_v61  ;;  %v768_v3 = vadd.f32 %v2304_v10, %v767_v1  ;;  %v769_v5 = vpop.f32.mrb[15].mxu0 }
 0x119   : > { %v896_v4 = vadd.f32 %v2304_v10, %v895_v2  ;;  %v897_v6 = vpop.f32.mrb[15].mxu1  ;;  %2031 = vtanh.f32 %v893_v62 }
 0x11a   : > { %v2022_v7 = vpop.eup %2021  ;;  %2033 = vtanh.f32 %v768_v3 }
 0x11b   : > { %v2024_v8 = vpop.eup %2023  ;;  %2035 = vtanh.f32 %v896_v4 }
 0x11c   : > { %v2026_v9 = vpop.eup %2025 }
 0x11d   : > { %v2028_v11 = vpop.eup %2027  ;;  %v1695_v12 = vpack.c.bf16 %v2026_v9, %v2022_v7  ;;  %v772_v13 = vpop.f32.mrb[16].mxu0 }
 0x11e   : > { %v900_v14 = vpop.f32.mrb[16].mxu1  ;;  %v1775_v15 = vpack.c.bf16 %v2028_v11, %v2024_v8  ;;  %v773_v16 = vadd.f32 %v2304_v10, %v772_v13  ;;  %v774_v18 = vpop.f32.mrb[17].mxu0 }
 0x11f   : > { %v901_v17 = vadd.f32 %v2304_v10, %v900_v14  ;;  %v902_v19 = vpop.f32.mrb[17].mxu1  ;;  %1843 = vst [vmem:[%s2318_s17 + $0x10] sm:$0xff] %v1695_v12   ;;  %v775_v20 = vpop.f32.mrb[18].mxu0 }
 0x120   : > { %v903_v21 = vpop.f32.mrb[18].mxu1  ;;  %1859 = vst [vmem:[%s2318_s17 + $0x90] sm:$0xff] %v1775_v15   ;;  %2037 = vtanh.f32 %v773_v16  ;;  %v776_v22 = vadd.f32 %v2304_v10, %v775_v20  ;;  %v777_v24 = vpop.f32.mrb[19].mxu0 }
 0x121   : > { %v904_v23 = vadd.f32 %v2304_v10, %v903_v21  ;;  %v905_v25 = vpop.f32.mrb[19].mxu1  ;;  %2039 = vtanh.f32 %v901_v17 }
 0x122   : > { %v2030_v26 = vpop.eup %2029  ;;  %2041 = vtanh.f32 %v776_v22 }
 0x123   : > { %v2032_v27 = vpop.eup %2031  ;;  %2043 = vtanh.f32 %v904_v23 }
 0x124   : > { %v2034_v28 = vpop.eup %2033 }
 0x125   : > { %v2036_v29 = vpop.eup %2035  ;;  %v1700_v30 = vpack.c.bf16 %v2034_v28, %v2030_v26  ;;  %v780_v31 = vpop.f32.mrb[20].mxu0 }
 0x126   : > { %v908_v32 = vpop.f32.mrb[20].mxu1  ;;  %v1780_v33 = vpack.c.bf16 %v2036_v29, %v2032_v27  ;;  %v781_v34 = vadd.f32 %v2304_v10, %v780_v31  ;;  %v782_v36 = vpop.f32.mrb[21].mxu0 }
 0x127   : > { %v909_v35 = vadd.f32 %v2304_v10, %v908_v32  ;;  %v910_v37 = vpop.f32.mrb[21].mxu1  ;;  %1844 = vst [vmem:[%s2318_s17 + $0x18] sm:$0xff] %v1700_v30   ;;  %v783_v38 = vpop.f32.mrb[22].mxu0 }
 0x128   : > { %v911_v39 = vpop.f32.mrb[22].mxu1  ;;  %1860 = vst [vmem:[%s2318_s17 + $0x98] sm:$0xff] %v1780_v33   ;;  %2045 = vtanh.f32 %v781_v34  ;;  %v784_v40 = vadd.f32 %v2304_v10, %v783_v38  ;;  %v785_v42 = vpop.f32.mrb[23].mxu0 }
 0x129   : > { %v912_v41 = vadd.f32 %v2304_v10, %v911_v39  ;;  %v913_v43 = vpop.f32.mrb[23].mxu1  ;;  %2047 = vtanh.f32 %v909_v35 }
 0x12a   : > { %v2038_v44 = vpop.eup %2037  ;;  %2049 = vtanh.f32 %v784_v40 }
 0x12b   : > { %v2040_v45 = vpop.eup %2039  ;;  %2051 = vtanh.f32 %v912_v41 }
 0x12c   : > { %v2042_v46 = vpop.eup %2041 }
 0x12d   : > { %v2044_v47 = vpop.eup %2043  ;;  %v1705_v48 = vpack.c.bf16 %v2042_v46, %v2038_v44  ;;  %v788_v49 = vpop.f32.mrb[24].mxu0 }
 0x12e   : > { %v916_v50 = vpop.f32.mrb[24].mxu1  ;;  %v1785_v51 = vpack.c.bf16 %v2044_v47, %v2040_v45  ;;  %v789_v52 = vadd.f32 %v2304_v10, %v788_v49  ;;  %v790_v54 = vpop.f32.mrb[25].mxu0 }
 0x12f   : > { %v917_v53 = vadd.f32 %v2304_v10, %v916_v50  ;;  %v918_v55 = vpop.f32.mrb[25].mxu1  ;;  %1845 = vst [vmem:[%s2318_s17 + $0x20] sm:$0xff] %v1705_v48   ;;  %v791_v56 = vpop.f32.mrb[26].mxu0 }
 0x130   : > { %v919_v57 = vpop.f32.mrb[26].mxu1  ;;  %1861 = vst [vmem:[%s2318_s17 + $0xa0] sm:$0xff] %v1785_v51   ;;  %2053 = vtanh.f32 %v789_v52  ;;  %v792_v58 = vadd.f32 %v2304_v10, %v791_v56  ;;  %v793_v60 = vpop.f32.mrb[27].mxu0 }
 0x131   : > { %v920_v59 = vadd.f32 %v2304_v10, %v919_v57  ;;  %v921_v61 = vpop.f32.mrb[27].mxu1  ;;  %2055 = vtanh.f32 %v917_v53 }
 0x132   : > { %v2046_v62 = vpop.eup %2045  ;;  %2057 = vtanh.f32 %v792_v58 }
 0x133   : > { %v2048_v63 = vpop.eup %2047  ;;  %2059 = vtanh.f32 %v920_v59 }
 0x134   : > { %v2050_v0 = vpop.eup %2049 }
 0x135   : > { %v2052_v1 = vpop.eup %2051  ;;  %v1710_v2 = vpack.c.bf16 %v2050_v0, %v2046_v62  ;;  %v796_v3 = vpop.f32.mrb[28].mxu0 }
 0x136   : > { %v924_v4 = vpop.f32.mrb[28].mxu1  ;;  %v1790_v5 = vpack.c.bf16 %v2052_v1, %v2048_v63  ;;  %v797_v6 = vadd.f32 %v2304_v10, %v796_v3  ;;  %v798_v8 = vpop.f32.mrb[29].mxu0 }
 0x137   : > { %v925_v7 = vadd.f32 %v2304_v10, %v924_v4  ;;  %v926_v9 = vpop.f32.mrb[29].mxu1  ;;  %1846 = vst [vmem:[%s2318_s17 + $0x28] sm:$0xff] %v1710_v2   ;;  %v799_v11 = vpop.f32.mrb[30].mxu0 }
 0x138   : > { %v927_v12 = vpop.f32.mrb[30].mxu1  ;;  %1862 = vst [vmem:[%s2318_s17 + $0xa8] sm:$0xff] %v1790_v5   ;;  %2061 = vtanh.f32 %v797_v6  ;;  %v800_v13 = vadd.f32 %v2304_v10, %v799_v11  ;;  %v801_v15 = vpop.f32.mrb[31].mxu0 }
 0x139   : > { %v928_v14 = vadd.f32 %v2304_v10, %v927_v12  ;;  %v929_v16 = vpop.f32.mrb[31].mxu1  ;;  %2063 = vtanh.f32 %v925_v7 }
 0x13a   : > { %v2054_v17 = vpop.eup %2053  ;;  %2065 = vtanh.f32 %v800_v13 }
 0x13b   : > { %v2056_v18 = vpop.eup %2055  ;;  %2067 = vtanh.f32 %v928_v14 }
 0x13c   : > { %v2058_v19 = vpop.eup %2057 }
 0x13d   : > { %v2060_v20 = vpop.eup %2059  ;;  %v1715_v21 = vpack.c.bf16 %v2058_v19, %v2054_v17  ;;  %v804_v22 = vpop.f32.mrb[32].mxu0 }
 0x13e   : > { %v932_v23 = vpop.f32.mrb[32].mxu1  ;;  %v1795_v24 = vpack.c.bf16 %v2060_v20, %v2056_v18  ;;  %v805_v25 = vadd.f32 %v2304_v10, %v804_v22  ;;  %v806_v27 = vpop.f32.mrb[33].mxu0 }
 0x13f   : > { %v933_v26 = vadd.f32 %v2304_v10, %v932_v23  ;;  %v934_v28 = vpop.f32.mrb[33].mxu1  ;;  %1847 = vst [vmem:[%s2318_s17 + $0x30] sm:$0xff] %v1715_v21   ;;  %v807_v29 = vpop.f32.mrb[34].mxu0 }
 0x140   : > { %v935_v30 = vpop.f32.mrb[34].mxu1  ;;  %1863 = vst [vmem:[%s2318_s17 + $0xb0] sm:$0xff] %v1795_v24   ;;  %2069 = vtanh.f32 %v805_v25  ;;  %v808_v31 = vadd.f32 %v2304_v10, %v807_v29  ;;  %v809_v33 = vpop.f32.mrb[35].mxu0 }
 0x141   : > { %v936_v32 = vadd.f32 %v2304_v10, %v935_v30  ;;  %v937_v34 = vpop.f32.mrb[35].mxu1  ;;  %2071 = vtanh.f32 %v933_v26 }
 0x142   : > { %v2062_v35 = vpop.eup %2061  ;;  %2073 = vtanh.f32 %v808_v31 }
 0x143   : > { %v2064_v36 = vpop.eup %2063  ;;  %2075 = vtanh.f32 %v936_v32 }
 0x144   : > { %v2066_v37 = vpop.eup %2065 }
 0x145   : > { %v2068_v38 = vpop.eup %2067  ;;  %v1720_v39 = vpack.c.bf16 %v2066_v37, %v2062_v35  ;;  %v812_v40 = vpop.f32.mrb[36].mxu0 }
 0x146   : > { %v940_v41 = vpop.f32.mrb[36].mxu1  ;;  %v1800_v42 = vpack.c.bf16 %v2068_v38, %v2064_v36  ;;  %v813_v43 = vadd.f32 %v2304_v10, %v812_v40  ;;  %v814_v45 = vpop.f32.mrb[37].mxu0 }
 0x147   : > { %v941_v44 = vadd.f32 %v2304_v10, %v940_v41  ;;  %v942_v46 = vpop.f32.mrb[37].mxu1  ;;  %1848 = vst [vmem:[%s2318_s17 + $0x38] sm:$0xff] %v1720_v39   ;;  %v815_v47 = vpop.f32.mrb[38].mxu0 }
 0x148   : > { %v943_v48 = vpop.f32.mrb[38].mxu1  ;;  %1864 = vst [vmem:[%s2318_s17 + $0xb8] sm:$0xff] %v1800_v42   ;;  %2077 = vtanh.f32 %v813_v43  ;;  %v816_v49 = vadd.f32 %v2304_v10, %v815_v47  ;;  %v817_v51 = vpop.f32.mrb[39].mxu0 }
 0x149   : > { %v944_v50 = vadd.f32 %v2304_v10, %v943_v48  ;;  %v945_v52 = vpop.f32.mrb[39].mxu1  ;;  %2079 = vtanh.f32 %v941_v44 }
 0x14a   : > { %v2070_v53 = vpop.eup %2069  ;;  %2081 = vtanh.f32 %v816_v49 }
 0x14b   : > { %v2072_v54 = vpop.eup %2071  ;;  %2083 = vtanh.f32 %v944_v50 }
 0x14c   : > { %v2074_v55 = vpop.eup %2073 }
 0x14d   : > { %v2076_v56 = vpop.eup %2075  ;;  %v1725_v57 = vpack.c.bf16 %v2074_v55, %v2070_v53  ;;  %v820_v58 = vpop.f32.mrb[40].mxu0 }
 0x14e   : > { %v948_v59 = vpop.f32.mrb[40].mxu1  ;;  %v1805_v60 = vpack.c.bf16 %v2076_v56, %v2072_v54  ;;  %v821_v61 = vadd.f32 %v2304_v10, %v820_v58  ;;  %v822_v63 = vpop.f32.mrb[41].mxu0 }
 0x14f   : > { %v949_v62 = vadd.f32 %v2304_v10, %v948_v59  ;;  %v950_v0 = vpop.f32.mrb[41].mxu1  ;;  %1849 = vst [vmem:[%s2318_s17 + $0x40] sm:$0xff] %v1725_v57   ;;  %v823_v1 = vpop.f32.mrb[42].mxu0 }
 0x150   : > { %v951_v2 = vpop.f32.mrb[42].mxu1  ;;  %1865 = vst [vmem:[%s2318_s17 + $0xc0] sm:$0xff] %v1805_v60   ;;  %2085 = vtanh.f32 %v821_v61  ;;  %v824_v3 = vadd.f32 %v2304_v10, %v823_v1  ;;  %v825_v5 = vpop.f32.mrb[43].mxu0 }
 0x151   : > { %v952_v4 = vadd.f32 %v2304_v10, %v951_v2  ;;  %v953_v6 = vpop.f32.mrb[43].mxu1  ;;  %2087 = vtanh.f32 %v949_v62 }
 0x152   : > { %v2078_v7 = vpop.eup %2077  ;;  %2089 = vtanh.f32 %v824_v3 }
 0x153   : > { %v2080_v8 = vpop.eup %2079  ;;  %2091 = vtanh.f32 %v952_v4 }
 0x154   : > { %v2082_v9 = vpop.eup %2081 }
 0x155   : > { %v2084_v11 = vpop.eup %2083  ;;  %v1730_v12 = vpack.c.bf16 %v2082_v9, %v2078_v7  ;;  %v828_v13 = vpop.f32.mrb[44].mxu0 }
 0x156   : > { %v956_v14 = vpop.f32.mrb[44].mxu1  ;;  %v1810_v15 = vpack.c.bf16 %v2084_v11, %v2080_v8  ;;  %v829_v16 = vadd.f32 %v2304_v10, %v828_v13  ;;  %v830_v18 = vpop.f32.mrb[45].mxu0 }
 0x157   : > { %v957_v17 = vadd.f32 %v2304_v10, %v956_v14  ;;  %v958_v19 = vpop.f32.mrb[45].mxu1  ;;  %1850 = vst [vmem:[%s2318_s17 + $0x48] sm:$0xff] %v1730_v12   ;;  %v831_v20 = vpop.f32.mrb[46].mxu0 }
 0x158   : > { %v959_v21 = vpop.f32.mrb[46].mxu1  ;;  %1866 = vst [vmem:[%s2318_s17 + $0xc8] sm:$0xff] %v1810_v15   ;;  %2093 = vtanh.f32 %v829_v16  ;;  %v832_v22 = vadd.f32 %v2304_v10, %v831_v20  ;;  %v833_v24 = vpop.f32.mrb[47].mxu0 }
 0x159   : > { %v960_v23 = vadd.f32 %v2304_v10, %v959_v21  ;;  %v961_v25 = vpop.f32.mrb[47].mxu1  ;;  %2095 = vtanh.f32 %v957_v17 }
 0x15a   : > { %v2086_v26 = vpop.eup %2085  ;;  %2097 = vtanh.f32 %v832_v22 }
 0x15b   : > { %v2088_v27 = vpop.eup %2087  ;;  %2099 = vtanh.f32 %v960_v23 }
 0x15c   : > { %v2090_v28 = vpop.eup %2089 }
 0x15d   : > { %v2092_v29 = vpop.eup %2091  ;;  %v1735_v30 = vpack.c.bf16 %v2090_v28, %v2086_v26  ;;  %v836_v31 = vpop.f32.mrb[48].mxu0 }
 0x15e   : > { %v964_v32 = vpop.f32.mrb[48].mxu1  ;;  %v1815_v33 = vpack.c.bf16 %v2092_v29, %v2088_v27  ;;  %v837_v34 = vadd.f32 %v2304_v10, %v836_v31  ;;  %v838_v36 = vpop.f32.mrb[49].mxu0 }
 0x15f   : > { %v965_v35 = vadd.f32 %v2304_v10, %v964_v32  ;;  %v966_v37 = vpop.f32.mrb[49].mxu1  ;;  %1851 = vst [vmem:[%s2318_s17 + $0x50] sm:$0xff] %v1735_v30   ;;  %v839_v38 = vpop.f32.mrb[50].mxu0 }
 0x160   : > { %v967_v39 = vpop.f32.mrb[50].mxu1  ;;  %1867 = vst [vmem:[%s2318_s17 + $0xd0] sm:$0xff] %v1815_v33   ;;  %2101 = vtanh.f32 %v837_v34  ;;  %v840_v40 = vadd.f32 %v2304_v10, %v839_v38  ;;  %v841_v42 = vpop.f32.mrb[51].mxu0 }
 0x161   : > { %v968_v41 = vadd.f32 %v2304_v10, %v967_v39  ;;  %v969_v43 = vpop.f32.mrb[51].mxu1  ;;  %2103 = vtanh.f32 %v965_v35 }
 0x162   : > { %v2094_v44 = vpop.eup %2093  ;;  %2105 = vtanh.f32 %v840_v40 }
 0x163   : > { %v2096_v45 = vpop.eup %2095  ;;  %2107 = vtanh.f32 %v968_v41 }
 0x164   : > { %v2098_v46 = vpop.eup %2097 }
 0x165   : > { %v2100_v47 = vpop.eup %2099  ;;  %v1740_v48 = vpack.c.bf16 %v2098_v46, %v2094_v44  ;;  %v844_v49 = vpop.f32.mrb[52].mxu0 }
 0x166   : > { %v972_v50 = vpop.f32.mrb[52].mxu1  ;;  %v1820_v51 = vpack.c.bf16 %v2100_v47, %v2096_v45  ;;  %v845_v52 = vadd.f32 %v2304_v10, %v844_v49  ;;  %v846_v54 = vpop.f32.mrb[53].mxu0 }
 0x167   : > { %v973_v53 = vadd.f32 %v2304_v10, %v972_v50  ;;  %v974_v55 = vpop.f32.mrb[53].mxu1  ;;  %1852 = vst [vmem:[%s2318_s17 + $0x58] sm:$0xff] %v1740_v48   ;;  %v847_v56 = vpop.f32.mrb[54].mxu0 }
 0x168   : > { %v975_v57 = vpop.f32.mrb[54].mxu1  ;;  %1868 = vst [vmem:[%s2318_s17 + $0xd8] sm:$0xff] %v1820_v51   ;;  %2109 = vtanh.f32 %v845_v52  ;;  %v848_v58 = vadd.f32 %v2304_v10, %v847_v56  ;;  %v849_v60 = vpop.f32.mrb[55].mxu0 }
 0x169   : > { %v976_v59 = vadd.f32 %v2304_v10, %v975_v57  ;;  %v977_v61 = vpop.f32.mrb[55].mxu1  ;;  %2111 = vtanh.f32 %v973_v53 }
 0x16a   : > { %v2102_v62 = vpop.eup %2101  ;;  %2113 = vtanh.f32 %v848_v58 }
 0x16b   : > { %v2104_v63 = vpop.eup %2103  ;;  %2115 = vtanh.f32 %v976_v59 }
 0x16c   : > { %v2106_v0 = vpop.eup %2105 }
 0x16d   : > { %v2108_v1 = vpop.eup %2107  ;;  %v1745_v2 = vpack.c.bf16 %v2106_v0, %v2102_v62  ;;  %v852_v3 = vpop.f32.mrb[56].mxu0 }
 0x16e   : > { %v980_v4 = vpop.f32.mrb[56].mxu1  ;;  %v1825_v5 = vpack.c.bf16 %v2108_v1, %v2104_v63  ;;  %v853_v6 = vadd.f32 %v2304_v10, %v852_v3  ;;  %v854_v8 = vpop.f32.mrb[57].mxu0 }
 0x16f   : > { %v981_v7 = vadd.f32 %v2304_v10, %v980_v4  ;;  %v982_v9 = vpop.f32.mrb[57].mxu1  ;;  %1853 = vst [vmem:[%s2318_s17 + $0x60] sm:$0xff] %v1745_v2   ;;  %v855_v11 = vpop.f32.mrb[58].mxu0 }
 0x170   : > { %v983_v12 = vpop.f32.mrb[58].mxu1  ;;  %1869 = vst [vmem:[%s2318_s17 + $0xe0] sm:$0xff] %v1825_v5   ;;  %2117 = vtanh.f32 %v853_v6  ;;  %v856_v13 = vadd.f32 %v2304_v10, %v855_v11  ;;  %v857_v15 = vpop.f32.mrb[59].mxu0 }
 0x171   : > { %v984_v14 = vadd.f32 %v2304_v10, %v983_v12  ;;  %v985_v16 = vpop.f32.mrb[59].mxu1  ;;  %2119 = vtanh.f32 %v981_v7 }
 0x172   : > { %v2110_v17 = vpop.eup %2109  ;;  %2121 = vtanh.f32 %v856_v13 }
 0x173   : > { %v2112_v18 = vpop.eup %2111  ;;  %2123 = vtanh.f32 %v984_v14 }
 0x174   : > { %v2114_v19 = vpop.eup %2113 }
 0x175   : > { %v2116_v20 = vpop.eup %2115  ;;  %v1750_v21 = vpack.c.bf16 %v2114_v19, %v2110_v17  ;;  %v860_v22 = vpop.f32.mrb[60].mxu0 }
 0x176   : > { %v988_v23 = vpop.f32.mrb[60].mxu1  ;;  %v1830_v24 = vpack.c.bf16 %v2116_v20, %v2112_v18  ;;  %v861_v25 = vadd.f32 %v2304_v10, %v860_v22  ;;  %v862_v27 = vpop.f32.mrb[61].mxu0 }
 0x177   : > { %v989_v26 = vadd.f32 %v2304_v10, %v988_v23  ;;  %v990_v28 = vpop.f32.mrb[61].mxu1  ;;  %1854 = vst [vmem:[%s2318_s17 + $0x68] sm:$0xff] %v1750_v21   ;;  %v863_v29 = vpop.f32.mrb[62].mxu0 }
 0x178   : > { %v991_v30 = vpop.f32.mrb[62].mxu1  ;;  %1870 = vst [vmem:[%s2318_s17 + $0xe8] sm:$0xff] %v1830_v24   ;;  %2125 = vtanh.f32 %v861_v25  ;;  %v864_v31 = vadd.f32 %v2304_v10, %v863_v29  ;;  %v865_v33 = vpop.f32.mrb[63].mxu0 }
 0x179   : > { %v992_v32 = vadd.f32 %v2304_v10, %v991_v30  ;;  %v993_v34 = vpop.f32.mrb[63].mxu1  ;;  %2127 = vtanh.f32 %v989_v26 }
 0x17a   : > { %v2118_v35 = vpop.eup %2117  ;;  %2129 = vtanh.f32 %v864_v31 }
 0x17b   : > { %v2120_v36 = vpop.eup %2119  ;;  %2131 = vtanh.f32 %v992_v32 }
 0x17c   : > { %v2122_v37 = vpop.eup %2121 }
 0x17d   : > { %v2124_v38 = vpop.eup %2123  ;;  %v1755_v39 = vpack.c.bf16 %v2122_v37, %v2118_v35 }
 0x17e   : > { %v1835_v40 = vpack.c.bf16 %v2124_v38, %v2120_v36 }
 0x17f   : > { %1855 = vst [vmem:[%s2318_s17 + $0x70] sm:$0xff] %v1755_v39  }
 0x180   : > { %1871 = vst [vmem:[%s2318_s17 + $0xf0] sm:$0xff] %v1835_v40  }
 0x182   : > { %v2126_v41 = vpop.eup %2125 }
 0x183   : > { %v2128_v42 = vpop.eup %2127 }
 0x184   : > { %v2130_v43 = vpop.eup %2129 }
 0x185   : > { %v2132_v44 = vpop.eup %2131  ;;  %v1760_v10 = vpack.c.bf16 %v2130_v43, %v2126_v41 }
 0x186   : > { %v1840_v45 = vpack.c.bf16 %v2132_v44, %v2128_v42 }
 0x187   : > { %1856 = vst [vmem:[%s2318_s17 + $0x78] sm:$0xff] %v1760_v10  }
 0x188   : > { %1872 = vst [vmem:[%s2318_s17 + $0xf8] sm:$0xff] %v1840_v45  }
 0x189 PF: > { %s13_s12 = sadd.s32 1, %s2139_s12  }
 0x18a   : > { %p10_p4 = scmp.ge.s32.totalorder %s13_s12, 6  }
 0x18c   :  { %12 = sbr.rel (!%p10_p4) target bundleno = 1 (0x1), region = 62 }

</bundles_post_ra>
